<compile_context>
chip_gen: v5e
topology: v5e:2x2
jax: 0.10.0
libtpu: 0.0.40
codegen_flags: <defaults>
</compile_context>

<pallas_src>
import jax
import jax.numpy as jnp
from jax.experimental import pallas as pl
from jax.experimental.pallas import tpu as pltpu

# ---- configuration (stands in for `lib`) -----------------------------------
VOCAB   = 50     # len(lib.ws)
EMB     = 100    # embedding_dim
HIDDEN  = 32     # lib.hidden_size
FC1     = 64
NCLASS  = 2

BATCH   = 2
SEQ_LEN = 8

H         = HIDDEN
G         = 8 * H          # fused gate width: 4 gates x 2 directions x H = 256
VOCAB_PAD = 128            # vocab padded for the one-hot matmul gather

# Fused gate column layout is gate-major, direction-minor, gate order [i f o g]:
#   [ i_fw i_bw | f_fw f_bw | o_fw o_bw | g_fw g_bw ]   (each sub-block is H=32 lanes)
# so sigmoid covers lanes 0:6H, tanh covers lanes 6H:8H, and the hidden/cell
# state is a single [B, 2H] array with lanes 0:H = forward, H:2H = backward.
GATE_SRC = (0, 1, 3, 2)    # fused block -> PyTorch gate index (i, f, g, o source order)

# ---- row offsets inside the packed bf16 parameter slab (lane width = G = 256) ----
R_WIH0 = 0                    # [VOCAB_PAD, G] folded (emb @ W_ih0_fused + b0)
R_WHH0 = R_WIH0 + VOCAB_PAD   # [2H, G]   layer-0 hidden->gates, block-diagonal
R_W1A  = R_WHH0 + 2 * H       # [2H, G]   layer-1 input->gates, fw-input rows only
R_W1B  = R_W1A + 2 * H        # [2H, G]   layer-1 input->gates, bw-input rows only
R_WHH1 = R_W1B + 2 * H        # [2H, G]   layer-1 hidden->gates, block-diagonal
R_FC1W = R_WHH1 + 2 * H       # [2H, G]   fc1 weight, cols 0:FC1 real, rest 0
R_FC2W = R_FC1W + 2 * H       # [FC1, G]  fc2 weight, cols 0:NCLASS real, rest 0
R_B1   = R_FC2W + FC1         # row 512: layer-1 fused bias (b_ih + b_hh)
R_FC1B = R_B1 + 16            # row 528: fc1 bias (padded to G)
R_FC2B = R_FC1B + 16          # row 544: fc2 bias (padded to G)
SLAB_ROWS = R_FC2B + 16       # 560 rows (multiple of 16 -> clean bf16 tiling)


# ---- in-kernel helpers ------------------------------------------------------
def _lstm_cell(gx, h_bf, c, w_hh):
    """One fused (fw+bw interleaved) LSTM step.

    gx: [B, G] f32 input gates; h_bf: [B, 2H] bf16 hidden; w_hh: [2H, G] bf16.
    """
    gates = gx + jnp.dot(h_bf, w_hh, preferred_element_type=jnp.float32)   # [B, G] f32
    sig = jax.nn.sigmoid(gates[:, :6 * H])      # i | f | o blocks only
    g = jnp.tanh(gates[:, 6 * H:])              # g block only
    i = sig[:, 0 * 2 * H:1 * 2 * H]
    f = sig[:, 1 * 2 * H:2 * 2 * H]
    o = sig[:, 2 * 2 * H:3 * 2 * H]
    c_new = f * c + i * g
    h_new = o * jnp.tanh(c_new)
    return h_new, c_new


def model_kernel(tok_ref, slab_ref, out_ref):
    Bp = out_ref.shape[0]
    T = tok_ref.shape[0] // Bp         # tokens are time-major: row t*Bp + b

    # ---- embedding gather + layer-0 input projection + bias, all folded into
    #      ONE one-hot matmul against the precomputed table (MXU, no XLA gather) ----
    tok = tok_ref[...]                                                    # [T*Bp, 1] i32
    vocab_iota = jax.lax.broadcasted_iota(jnp.int32, (T * Bp, VOCAB_PAD), 1)
    onehot = (tok == vocab_iota).astype(jnp.float32).astype(jnp.bfloat16)
    g0 = jnp.dot(onehot, slab_ref[R_WIH0:R_WIH0 + VOCAB_PAD, :],
                 preferred_element_type=jnp.float32)                      # [T*Bp, G] f32

    # forward-direction lane mask in the fused gate layout
    lane = jax.lax.broadcasted_iota(jnp.int32, (Bp, G), 1)
    is_fw = (lane % (2 * H)) < H

    w_hh0 = slab_ref[R_WHH0:R_WHH0 + 2 * H, :]                            # bf16 [2H, G]
    w_hh1 = slab_ref[R_WHH1:R_WHH1 + 2 * H, :]
    w1a   = slab_ref[R_W1A:R_W1A + 2 * H, :]
    w1b   = slab_ref[R_W1B:R_W1B + 2 * H, :]
    b1    = slab_ref[R_B1:R_B1 + 1, :].astype(jnp.float32)                # [1, G]

    # ---- layer 0: fw and bw interleaved in one time loop; layer-1 input
    #      projections issued incrementally (off the recurrent critical path) ----
    h0_bf = jnp.zeros((Bp, 2 * H), jnp.bfloat16)
    c0 = jnp.zeros((Bp, 2 * H), jnp.float32)
    p = []     # p[k]: x-gate contribution from fw-output at time k (+ bias)
    q = []     # q[k]: x-gate contribution from bw-output at time T-1-k
    for k in range(T):
        rk = T - 1 - k
        # fw lanes take x-gates at time k, bw lanes at time rk (VPU select, no shuffles)
        gx = jnp.where(is_fw, g0[k * Bp:(k + 1) * Bp, :], g0[rk * Bp:(rk + 1) * Bp, :])
        h0, c0 = _lstm_cell(gx, h0_bf, c0, w_hh0)
        h0_bf = h0.astype(jnp.bfloat16)
        p.append(jnp.dot(h0_bf, w1a, preferred_element_type=jnp.float32) + b1)
        q.append(jnp.dot(h0_bf, w1b, preferred_element_type=jnp.float32))

    # ---- layer 1: fw and bw interleaved ----
    # full layer-1 x-gates at time t == p[t] + q[T-1-t]
    h1_bf = jnp.zeros((Bp, 2 * H), jnp.bfloat16)
    c1 = jnp.zeros((Bp, 2 * H), jnp.float32)
    for k in range(T):
        rk = T - 1 - k
        gx = jnp.where(is_fw, p[k] + q[rk], p[rk] + q[k])
        h1, c1 = _lstm_cell(gx, h1_bf, c1, w_hh1)
        h1_bf = h1.astype(jnp.bfloat16)

    # after the last step: fw lanes hold h_n[-2] (t=T-1), bw lanes hold h_n[-1] (t=0);
    # h1 is already their lane-concatenation [fw | bw].

    # ---- fc1 -> relu -> fc2 -> log_softmax ----
    fc1b = slab_ref[R_FC1B:R_FC1B + 1, :].astype(jnp.float32)
    fc2b = slab_ref[R_FC2B:R_FC2B + 1, :].astype(jnp.float32)
    z1 = jnp.dot(h1_bf, slab_ref[R_FC1W:R_FC1W + 2 * H, :],
                 preferred_element_type=jnp.float32) + fc1b
    z1 = jnp.maximum(z1, 0.0)                                             # cols >= FC1 stay 0
    z2 = jnp.dot(z1[:, :FC1].astype(jnp.bfloat16), slab_ref[R_FC2W:R_FC2W + FC1, :],
                 preferred_element_type=jnp.float32) + fc2b
    logits = z2[:, :NCLASS]                                               # [Bp, 2]
    m = jnp.max(logits, axis=-1, keepdims=True)
    lse = jnp.log(jnp.sum(jnp.exp(logits - m), axis=-1, keepdims=True)) + m
    out_ref[...] = logits - lse


# ---- parameter construction (deterministic, PyTorch-like uniform init) ------
def make_params(key):
    def uniform(k, shape, bound):
        return jax.random.uniform(k, shape, jnp.float32, -bound, bound)

    keys = jax.random.split(key, 32)
    ki = iter(keys)

    params = {}
    params["embedding"] = jax.random.normal(next(ki), (VOCAB, EMB), jnp.float32)

    lstm_bound = 1.0 / jnp.sqrt(jnp.float32(H))
    # layer 0 input dim = EMB, layer 1 input dim = 2*H (bidirectional)
    for (name, in_dim) in (("0f", EMB), ("0b", EMB), ("1f", 2 * H), ("1b", 2 * H)):
        params[f"wih{name}"] = uniform(next(ki), (in_dim, 4 * H), lstm_bound)
        params[f"whh{name}"] = uniform(next(ki), (H, 4 * H), lstm_bound)
        b_ih = uniform(next(ki), (4 * H,), lstm_bound)
        b_hh = uniform(next(ki), (4 * H,), lstm_bound)
        params[f"b{name}"] = (b_ih + b_hh).reshape(1, 4 * H)

    fc1_bound = 1.0 / jnp.sqrt(jnp.float32(2 * H))
    params["fc1w"] = uniform(next(ki), (2 * H, FC1), fc1_bound)
    params["fc1b"] = uniform(next(ki), (FC1,), fc1_bound).reshape(1, FC1)
    fc2_bound = 1.0 / jnp.sqrt(jnp.float32(FC1))
    params["fc2w"] = uniform(next(ki), (FC1, NCLASS), fc2_bound)
    params["fc2b"] = uniform(next(ki), (NCLASS,), fc2_bound).reshape(1, NCLASS)
    return params


# ---- host-side packing into ONE bf16 slab ------------------------------------
def _fuse_cols(w_fw, w_bw):
    """[in, 4H] x 2 -> [in, 8H], gate order [i f o g], direction-minor per block."""
    in_dim = w_fw.shape[0]
    out = jnp.zeros((in_dim, G), jnp.float32)
    for blk, src in enumerate(GATE_SRC):
        out = out.at[:, blk * 2 * H:blk * 2 * H + H].set(w_fw[:, src * H:(src + 1) * H])
        out = out.at[:, blk * 2 * H + H:(blk + 1) * 2 * H].set(w_bw[:, src * H:(src + 1) * H])
    return out


def _fuse_hh(w_fw, w_bw):
    """[H, 4H] x 2 -> [2H, 8H] block-diagonal (per gate) fused hidden weight."""
    out = jnp.zeros((2 * H, G), jnp.float32)
    for blk, src in enumerate(GATE_SRC):
        out = out.at[:H, blk * 2 * H:blk * 2 * H + H].set(w_fw[:, src * H:(src + 1) * H])
        out = out.at[H:, blk * 2 * H + H:(blk + 1) * 2 * H].set(w_bw[:, src * H:(src + 1) * H])
    return out


def pack_params(params):
    # fold embedding table + layer-0 input weights + layer-0 bias into one table
    w_ih0 = _fuse_cols(params["wih0f"], params["wih0b"])          # [EMB, G]
    b0 = _fuse_cols(params["b0f"], params["b0b"])                 # [1, G]
    table = params["embedding"] @ w_ih0 + b0                      # [VOCAB, G]
    table_pad = jnp.zeros((VOCAB_PAD, G), jnp.float32).at[:VOCAB].set(table)

    w_hh0 = _fuse_hh(params["whh0f"], params["whh0b"])
    w_ih1 = _fuse_cols(params["wih1f"], params["wih1b"])          # [2H, G]
    w1a = w_ih1.at[H:, :].set(0.0)                                # keep fw-input rows
    w1b = w_ih1.at[:H, :].set(0.0)                                # keep bw-input rows
    w_hh1 = _fuse_hh(params["whh1f"], params["whh1b"])
    b1 = _fuse_cols(params["b1f"], params["b1b"])                 # [1, G]

    fc1w = jnp.zeros((2 * H, G), jnp.float32).at[:, :FC1].set(params["fc1w"])
    fc1b = jnp.zeros((1, G), jnp.float32).at[:, :FC1].set(params["fc1b"])
    fc2w = jnp.zeros((FC1, G), jnp.float32).at[:, :NCLASS].set(params["fc2w"])
    fc2b = jnp.zeros((1, G), jnp.float32).at[:, :NCLASS].set(params["fc2b"])

    slab = jnp.zeros((SLAB_ROWS, G), jnp.float32)
    slab = slab.at[R_WIH0:R_WIH0 + VOCAB_PAD].set(table_pad)
    slab = slab.at[R_WHH0:R_WHH0 + 2 * H].set(w_hh0)
    slab = slab.at[R_W1A:R_W1A + 2 * H].set(w1a)
    slab = slab.at[R_W1B:R_W1B + 2 * H].set(w1b)
    slab = slab.at[R_WHH1:R_WHH1 + 2 * H].set(w_hh1)
    slab = slab.at[R_FC1W:R_FC1W + 2 * H].set(fc1w)
    slab = slab.at[R_FC2W:R_FC2W + FC1].set(fc2w)
    slab = slab.at[R_B1].set(b1[0])
    slab = slab.at[R_FC1B].set(fc1b[0])
    slab = slab.at[R_FC2B].set(fc2b[0])
    return slab.astype(jnp.bfloat16)


@jax.jit
def forward(tokens, slab):
    B, T = tokens.shape
    Bp = max(8, ((B + 7) // 8) * 8)                    # sublane-aligned batch
    tok_pad = jnp.zeros((Bp, T), jnp.int32).at[:B].set(tokens.astype(jnp.int32))
    tok_tm = tok_pad.T.reshape(T * Bp, 1)              # time-major flatten
    out = pl.pallas_call(
        model_kernel,
        out_shape=jax.ShapeDtypeStruct((Bp, NCLASS), jnp.float32),
        in_specs=[pl.BlockSpec(memory_space=pltpu.MemorySpace.VMEM)] * 2,
        out_specs=pl.BlockSpec(memory_space=pltpu.MemorySpace.VMEM),
    )(tok_tm, slab)
    return out[:B]


# ---- pure-JAX reference (PyTorch semantics) for correctness checking --------
def _lstm_dir_ref(x_seq, w_ih, w_hh, b, reverse):
    T = len(x_seq)
    h = jnp.zeros((x_seq[0].shape[0], H), jnp.float32)
    c = jnp.zeros_like(h)
    outs = [None] * T
    order = range(T - 1, -1, -1) if reverse else range(T)
    for t in order:
        gates = x_seq[t] @ w_ih + h @ w_hh + b
        i = jax.nn.sigmoid(gates[:, 0:H])
        f = jax.nn.sigmoid(gates[:, H:2 * H])
        g = jnp.tanh(gates[:, 2 * H:3 * H])
        o = jax.nn.sigmoid(gates[:, 3 * H:4 * H])
        c = f * c + i * g
        h = o * jnp.tanh(c)
        outs[t] = h
    return outs, h


def forward_ref(tokens, params):
    x = jnp.take(params["embedding"], tokens, axis=0).astype(jnp.float32)
    T = tokens.shape[1]
    x_seq = [x[:, t, :] for t in range(T)]
    fw, _ = _lstm_dir_ref(x_seq, params["wih0f"], params["whh0f"], params["b0f"], False)
    bw, _ = _lstm_dir_ref(x_seq, params["wih0b"], params["whh0b"], params["b0b"], True)
    l1 = [jnp.concatenate([fw[t], bw[t]], axis=-1) for t in range(T)]
    _, hf = _lstm_dir_ref(l1, params["wih1f"], params["whh1f"], params["b1f"], False)
    _, hb = _lstm_dir_ref(l1, params["wih1b"], params["whh1b"], params["b1b"], True)
    feat = jnp.concatenate([hf, hb], axis=-1)
    z1 = jnp.maximum(feat @ params["fc1w"] + params["fc1b"], 0.0)
    z2 = z1 @ params["fc2w"] + params["fc2b"]
    return jax.nn.log_softmax(z2, axis=-1)


if __name__ == "__main__":
    key = jax.random.PRNGKey(0)
    pkey, tkey = jax.random.split(key)
    params = make_params(pkey)
    tokens = jax.random.randint(tkey, (BATCH, SEQ_LEN), 0, VOCAB, dtype=jnp.int32)

    slab = pack_params(params)
    out = forward(tokens, slab)
    out = jax.block_until_ready(out)

    assert out.shape == (BATCH, NCLASS)
    # rows of log_softmax must exp-sum to 1 (final softmax math is f32 in-kernel)
    assert bool(jnp.allclose(jnp.sum(jnp.exp(out), axis=-1), 1.0, atol=1e-5))
    # match the plain-JAX PyTorch-semantics reference (bf16 MXU operands in kernel)
    ref = forward_ref(tokens, params)
    assert bool(jnp.allclose(out, ref, atol=5e-2, rtol=5e-2))
    print("KERNEL_OK")
</pallas_src>

<mosaic_0001>
module attributes {stable_mosaic.version = 11 : i64} {
  func.func @model_kernel(%arg0: memref<64x1xi32, #tpu.memory_space<vmem>>, %arg1: memref<560x256xbf16, #tpu.memory_space<vmem>>, %arg2: memref<8x2xf32, #tpu.memory_space<vmem>>) attributes {dimension_semantics = [], scalar_prefetch = 0 : i64, scratch_operands = 0 : i64, tpu.core_type = #tpu.core_type<tc>} {
    %c0 = arith.constant 0 : index
    %c0_0 = arith.constant 0 : index
    %0 = vector.load %arg0[%c0, %c0_0] : memref<64x1xi32, #tpu.memory_space<vmem>>, vector<64x1xi32>
    %1 = tpu.iota {dimensions = array<i32: 1>} : vector<64x128xi32>
    %2 = vector.broadcast %0 : vector<64x1xi32> to vector<64x128xi32>
    %3 = arith.cmpi eq, %2, %1 : vector<64x128xi32>
    %4 = arith.extui %3 : vector<64x128xi1> to vector<64x128xi32>
    %5 = arith.sitofp %4 : vector<64x128xi32> to vector<64x128xf32>
    %6 = arith.truncf %5 : vector<64x128xf32> to vector<64x128xbf16>
    %c0_1 = arith.constant 0 : index
    %c0_2 = arith.constant 0 : index
    %7 = vector.load %arg1[%c0_1, %c0_2] : memref<560x256xbf16, #tpu.memory_space<vmem>>, vector<128x256xbf16>
    %cst = arith.constant dense<0.000000e+00> : vector<64x256xf32>
    %8 = tpu.matmul %6, %7, %cst {dimension_numbers = #tpu.dot_dimension_numbers<[1], [0], [0], [1], [0, 0, 1, 1], [], []>} : vector<64x128xbf16>, vector<128x256xbf16>, vector<64x256xf32> -> vector<64x256xf32>
    %9 = tpu.iota {dimensions = array<i32: 1>} : vector<8x256xi32>
    %c64_i32 = arith.constant 64 : i32
    %c0_i32 = arith.constant 0 : i32
    %10 = arith.cmpi eq, %c64_i32, %c0_i32 : i32
    %c1_i32 = arith.constant 1 : i32
    %11 = arith.select %10, %c1_i32, %c64_i32 : i32
    %12 = vector.broadcast %11 : i32 to vector<8x256xi32>
    %13 = arith.remsi %9, %12 : vector<8x256xi32>
    %c0_i32_3 = arith.constant 0 : i32
    %14 = vector.broadcast %c0_i32_3 : i32 to vector<8x256xi32>
    %15 = arith.cmpi ne, %13, %14 : vector<8x256xi32>
    %c0_i32_4 = arith.constant 0 : i32
    %16 = vector.broadcast %c0_i32_4 : i32 to vector<8x256xi32>
    %17 = arith.cmpi slt, %13, %16 : vector<8x256xi32>
    %c0_i32_5 = arith.constant 0 : i32
    %18 = arith.cmpi slt, %11, %c0_i32_5 : i32
    %19 = vector.broadcast %18 : i1 to vector<8x256xi1>
    %20 = vector.broadcast %19 : vector<8x256xi1> to vector<8x256xi1>
    %21 = arith.xori %17, %20 : vector<8x256xi1>
    %22 = arith.andi %21, %15 : vector<8x256xi1>
    %23 = vector.broadcast %11 : i32 to vector<8x256xi32>
    %24 = arith.addi %13, %23 : vector<8x256xi32>
    %25 = arith.select %22, %24, %13 : vector<8x256xi1>, vector<8x256xi32>
    %c32_i32 = arith.constant 32 : i32
    %26 = vector.broadcast %c32_i32 : i32 to vector<8x256xi32>
    %27 = arith.cmpi slt, %25, %26 : vector<8x256xi32>
    %c128 = arith.constant 128 : index
    %c0_6 = arith.constant 0 : index
    %28 = vector.load %arg1[%c128, %c0_6] : memref<560x256xbf16, #tpu.memory_space<vmem>>, vector<64x256xbf16>
    %c320 = arith.constant 320 : index
    %c0_7 = arith.constant 0 : index
    %29 = vector.load %arg1[%c320, %c0_7] : memref<560x256xbf16, #tpu.memory_space<vmem>>, vector<64x256xbf16>
    %c192 = arith.constant 192 : index
    %c0_8 = arith.constant 0 : index
    %30 = vector.load %arg1[%c192, %c0_8] : memref<560x256xbf16, #tpu.memory_space<vmem>>, vector<64x256xbf16>
    %c256 = arith.constant 256 : index
    %c0_9 = arith.constant 0 : index
    %31 = vector.load %arg1[%c256, %c0_9] : memref<560x256xbf16, #tpu.memory_space<vmem>>, vector<64x256xbf16>
    %c512 = arith.constant 512 : index
    %c0_10 = arith.constant 0 : index
    %32 = vector.load %arg1[%c512, %c0_10] : memref<560x256xbf16, #tpu.memory_space<vmem>>, vector<1x256xbf16>
    %33 = arith.extf %32 : vector<1x256xbf16> to vector<1x256xf32>
    %cst_11 = arith.constant 0.000000e+00 : bf16
    %34 = vector.broadcast %cst_11 : bf16 to vector<8x64xbf16>
    %cst_12 = arith.constant 0.000000e+00 : f32
    %35 = vector.broadcast %cst_12 : f32 to vector<8x64xf32>
    %36 = vector.extract_strided_slice %8 {offsets = [0, 0], sizes = [8, 256], strides = [1, 1]} : vector<64x256xf32> to vector<8x256xf32>
    %37 = vector.extract_strided_slice %8 {offsets = [56, 0], sizes = [8, 256], strides = [1, 1]} : vector<64x256xf32> to vector<8x256xf32>
    %38 = arith.select %27, %36, %37 : vector<8x256xi1>, vector<8x256xf32>
    %cst_13 = arith.constant dense<0.000000e+00> : vector<8x256xf32>
    %39 = tpu.matmul %34, %28, %cst_13 {dimension_numbers = #tpu.dot_dimension_numbers<[1], [0], [0], [1], [0, 0, 1, 1], [], []>} : vector<8x64xbf16>, vector<64x256xbf16>, vector<8x256xf32> -> vector<8x256xf32>
    %40 = arith.addf %38, %39 : vector<8x256xf32>
    %41 = vector.extract_strided_slice %40 {offsets = [0, 0], sizes = [8, 192], strides = [1, 1]} : vector<8x256xf32> to vector<8x192xf32>
    %42 = arith.negf %41 : vector<8x192xf32>
    %43 = math.exp %42 : vector<8x192xf32>
    %cst_14 = arith.constant 1.000000e+00 : f32
    %44 = vector.broadcast %cst_14 : f32 to vector<8x192xf32>
    %45 = arith.addf %44, %43 : vector<8x192xf32>
    %46 = arith.divf %44, %45 : vector<8x192xf32>
    %47 = vector.extract_strided_slice %40 {offsets = [0, 192], sizes = [8, 64], strides = [1, 1]} : vector<8x256xf32> to vector<8x64xf32>
    %48 = math.tanh %47 : vector<8x64xf32>
    %49 = vector.extract_strided_slice %46 {offsets = [0, 0], sizes = [8, 64], strides = [1, 1]} : vector<8x192xf32> to vector<8x64xf32>
    %50 = vector.extract_strided_slice %46 {offsets = [0, 64], sizes = [8, 64], strides = [1, 1]} : vector<8x192xf32> to vector<8x64xf32>
    %51 = vector.extract_strided_slice %46 {offsets = [0, 128], sizes = [8, 64], strides = [1, 1]} : vector<8x192xf32> to vector<8x64xf32>
    %52 = arith.mulf %50, %35 : vector<8x64xf32>
    %53 = arith.mulf %49, %48 : vector<8x64xf32>
    %54 = arith.addf %52, %53 : vector<8x64xf32>
    %55 = math.tanh %54 : vector<8x64xf32>
    %56 = arith.mulf %51, %55 : vector<8x64xf32>
    %57 = arith.truncf %56 : vector<8x64xf32> to vector<8x64xbf16>
    %cst_15 = arith.constant dense<0.000000e+00> : vector<8x256xf32>
    %58 = tpu.matmul %57, %30, %cst_15 {dimension_numbers = #tpu.dot_dimension_numbers<[1], [0], [0], [1], [0, 0, 1, 1], [], []>} : vector<8x64xbf16>, vector<64x256xbf16>, vector<8x256xf32> -> vector<8x256xf32>
    %59 = vector.broadcast %33 : vector<1x256xf32> to vector<8x256xf32>
    %60 = arith.addf %58, %59 : vector<8x256xf32>
    %cst_16 = arith.constant dense<0.000000e+00> : vector<8x256xf32>
    %61 = tpu.matmul %57, %31, %cst_16 {dimension_numbers = #tpu.dot_dimension_numbers<[1], [0], [0], [1], [0, 0, 1, 1], [], []>} : vector<8x64xbf16>, vector<64x256xbf16>, vector<8x256xf32> -> vector<8x256xf32>
    %62 = vector.extract_strided_slice %8 {offsets = [8, 0], sizes = [8, 256], strides = [1, 1]} : vector<64x256xf32> to vector<8x256xf32>
    %63 = vector.extract_strided_slice %8 {offsets = [48, 0], sizes = [8, 256], strides = [1, 1]} : vector<64x256xf32> to vector<8x256xf32>
    %64 = arith.select %27, %62, %63 : vector<8x256xi1>, vector<8x256xf32>
    %cst_17 = arith.constant dense<0.000000e+00> : vector<8x256xf32>
    %65 = tpu.matmul %57, %28, %cst_17 {dimension_numbers = #tpu.dot_dimension_numbers<[1], [0], [0], [1], [0, 0, 1, 1], [], []>} : vector<8x64xbf16>, vector<64x256xbf16>, vector<8x256xf32> -> vector<8x256xf32>
    %66 = arith.addf %64, %65 : vector<8x256xf32>
    %67 = vector.extract_strided_slice %66 {offsets = [0, 0], sizes = [8, 192], strides = [1, 1]} : vector<8x256xf32> to vector<8x192xf32>
    %68 = arith.negf %67 : vector<8x192xf32>
    %69 = math.exp %68 : vector<8x192xf32>
    %cst_18 = arith.constant 1.000000e+00 : f32
    %70 = vector.broadcast %cst_18 : f32 to vector<8x192xf32>
    %71 = arith.addf %70, %69 : vector<8x192xf32>
    %72 = arith.divf %70, %71 : vector<8x192xf32>
    %73 = vector.extract_strided_slice %66 {offsets = [0, 192], sizes = [8, 64], strides = [1, 1]} : vector<8x256xf32> to vector<8x64xf32>
    %74 = math.tanh %73 : vector<8x64xf32>
    %75 = vector.extract_strided_slice %72 {offsets = [0, 0], sizes = [8, 64], strides = [1, 1]} : vector<8x192xf32> to vector<8x64xf32>
    %76 = vector.extract_strided_slice %72 {offsets = [0, 64], sizes = [8, 64], strides = [1, 1]} : vector<8x192xf32> to vector<8x64xf32>
    %77 = vector.extract_strided_slice %72 {offsets = [0, 128], sizes = [8, 64], strides = [1, 1]} : vector<8x192xf32> to vector<8x64xf32>
    %78 = arith.mulf %76, %54 : vector<8x64xf32>
    %79 = arith.mulf %75, %74 : vector<8x64xf32>
    %80 = arith.addf %78, %79 : vector<8x64xf32>
    %81 = math.tanh %80 : vector<8x64xf32>
    %82 = arith.mulf %77, %81 : vector<8x64xf32>
    %83 = arith.truncf %82 : vector<8x64xf32> to vector<8x64xbf16>
    %cst_19 = arith.constant dense<0.000000e+00> : vector<8x256xf32>
    %84 = tpu.matmul %83, %30, %cst_19 {dimension_numbers = #tpu.dot_dimension_numbers<[1], [0], [0], [1], [0, 0, 1, 1], [], []>} : vector<8x64xbf16>, vector<64x256xbf16>, vector<8x256xf32> -> vector<8x256xf32>
    %85 = vector.broadcast %33 : vector<1x256xf32> to vector<8x256xf32>
    %86 = arith.addf %84, %85 : vector<8x256xf32>
    %cst_20 = arith.constant dense<0.000000e+00> : vector<8x256xf32>
    %87 = tpu.matmul %83, %31, %cst_20 {dimension_numbers = #tpu.dot_dimension_numbers<[1], [0], [0], [1], [0, 0, 1, 1], [], []>} : vector<8x64xbf16>, vector<64x256xbf16>, vector<8x256xf32> -> vector<8x256xf32>
    %88 = vector.extract_strided_slice %8 {offsets = [16, 0], sizes = [8, 256], strides = [1, 1]} : vector<64x256xf32> to vector<8x256xf32>
    %89 = vector.extract_strided_slice %8 {offsets = [40, 0], sizes = [8, 256], strides = [1, 1]} : vector<64x256xf32> to vector<8x256xf32>
    %90 = arith.select %27, %88, %89 : vector<8x256xi1>, vector<8x256xf32>
    %cst_21 = arith.constant dense<0.000000e+00> : vector<8x256xf32>
    %91 = tpu.matmul %83, %28, %cst_21 {dimension_numbers = #tpu.dot_dimension_numbers<[1], [0], [0], [1], [0, 0, 1, 1], [], []>} : vector<8x64xbf16>, vector<64x256xbf16>, vector<8x256xf32> -> vector<8x256xf32>
    %92 = arith.addf %90, %91 : vector<8x256xf32>
    %93 = vector.extract_strided_slice %92 {offsets = [0, 0], sizes = [8, 192], strides = [1, 1]} : vector<8x256xf32> to vector<8x192xf32>
    %94 = arith.negf %93 : vector<8x192xf32>
    %95 = math.exp %94 : vector<8x192xf32>
    %cst_22 = arith.constant 1.000000e+00 : f32
    %96 = vector.broadcast %cst_22 : f32 to vector<8x192xf32>
    %97 = arith.addf %96, %95 : vector<8x192xf32>
    %98 = arith.divf %96, %97 : vector<8x192xf32>
    %99 = vector.extract_strided_slice %92 {offsets = [0, 192], sizes = [8, 64], strides = [1, 1]} : vector<8x256xf32> to vector<8x64xf32>
    %100 = math.tanh %99 : vector<8x64xf32>
    %101 = vector.extract_strided_slice %98 {offsets = [0, 0], sizes = [8, 64], strides = [1, 1]} : vector<8x192xf32> to vector<8x64xf32>
    %102 = vector.extract_strided_slice %98 {offsets = [0, 64], sizes = [8, 64], strides = [1, 1]} : vector<8x192xf32> to vector<8x64xf32>
    %103 = vector.extract_strided_slice %98 {offsets = [0, 128], sizes = [8, 64], strides = [1, 1]} : vector<8x192xf32> to vector<8x64xf32>
    %104 = arith.mulf %102, %80 : vector<8x64xf32>
    %105 = arith.mulf %101, %100 : vector<8x64xf32>
    %106 = arith.addf %104, %105 : vector<8x64xf32>
    %107 = math.tanh %106 : vector<8x64xf32>
    %108 = arith.mulf %103, %107 : vector<8x64xf32>
    %109 = arith.truncf %108 : vector<8x64xf32> to vector<8x64xbf16>
    %cst_23 = arith.constant dense<0.000000e+00> : vector<8x256xf32>
    %110 = tpu.matmul %109, %30, %cst_23 {dimension_numbers = #tpu.dot_dimension_numbers<[1], [0], [0], [1], [0, 0, 1, 1], [], []>} : vector<8x64xbf16>, vector<64x256xbf16>, vector<8x256xf32> -> vector<8x256xf32>
    %111 = vector.broadcast %33 : vector<1x256xf32> to vector<8x256xf32>
    %112 = arith.addf %110, %111 : vector<8x256xf32>
    %cst_24 = arith.constant dense<0.000000e+00> : vector<8x256xf32>
    %113 = tpu.matmul %109, %31, %cst_24 {dimension_numbers = #tpu.dot_dimension_numbers<[1], [0], [0], [1], [0, 0, 1, 1], [], []>} : vector<8x64xbf16>, vector<64x256xbf16>, vector<8x256xf32> -> vector<8x256xf32>
    %114 = vector.extract_strided_slice %8 {offsets = [24, 0], sizes = [8, 256], strides = [1, 1]} : vector<64x256xf32> to vector<8x256xf32>
    %115 = vector.extract_strided_slice %8 {offsets = [32, 0], sizes = [8, 256], strides = [1, 1]} : vector<64x256xf32> to vector<8x256xf32>
    %116 = arith.select %27, %114, %115 : vector<8x256xi1>, vector<8x256xf32>
    %cst_25 = arith.constant dense<0.000000e+00> : vector<8x256xf32>
    %117 = tpu.matmul %109, %28, %cst_25 {dimension_numbers = #tpu.dot_dimension_numbers<[1], [0], [0], [1], [0, 0, 1, 1], [], []>} : vector<8x64xbf16>, vector<64x256xbf16>, vector<8x256xf32> -> vector<8x256xf32>
    %118 = arith.addf %116, %117 : vector<8x256xf32>
    %119 = vector.extract_strided_slice %118 {offsets = [0, 0], sizes = [8, 192], strides = [1, 1]} : vector<8x256xf32> to vector<8x192xf32>
    %120 = arith.negf %119 : vector<8x192xf32>
    %121 = math.exp %120 : vector<8x192xf32>
    %cst_26 = arith.constant 1.000000e+00 : f32
    %122 = vector.broadcast %cst_26 : f32 to vector<8x192xf32>
    %123 = arith.addf %122, %121 : vector<8x192xf32>
    %124 = arith.divf %122, %123 : vector<8x192xf32>
    %125 = vector.extract_strided_slice %118 {offsets = [0, 192], sizes = [8, 64], strides = [1, 1]} : vector<8x256xf32> to vector<8x64xf32>
    %126 = math.tanh %125 : vector<8x64xf32>
    %127 = vector.extract_strided_slice %124 {offsets = [0, 0], sizes = [8, 64], strides = [1, 1]} : vector<8x192xf32> to vector<8x64xf32>
    %128 = vector.extract_strided_slice %124 {offsets = [0, 64], sizes = [8, 64], strides = [1, 1]} : vector<8x192xf32> to vector<8x64xf32>
    %129 = vector.extract_strided_slice %124 {offsets = [0, 128], sizes = [8, 64], strides = [1, 1]} : vector<8x192xf32> to vector<8x64xf32>
    %130 = arith.mulf %128, %106 : vector<8x64xf32>
    %131 = arith.mulf %127, %126 : vector<8x64xf32>
    %132 = arith.addf %130, %131 : vector<8x64xf32>
    %133 = math.tanh %132 : vector<8x64xf32>
    %134 = arith.mulf %129, %133 : vector<8x64xf32>
    %135 = arith.truncf %134 : vector<8x64xf32> to vector<8x64xbf16>
    %cst_27 = arith.constant dense<0.000000e+00> : vector<8x256xf32>
    %136 = tpu.matmul %135, %30, %cst_27 {dimension_numbers = #tpu.dot_dimension_numbers<[1], [0], [0], [1], [0, 0, 1, 1], [], []>} : vector<8x64xbf16>, vector<64x256xbf16>, vector<8x256xf32> -> vector<8x256xf32>
    %137 = vector.broadcast %33 : vector<1x256xf32> to vector<8x256xf32>
    %138 = arith.addf %136, %137 : vector<8x256xf32>
    %cst_28 = arith.constant dense<0.000000e+00> : vector<8x256xf32>
    %139 = tpu.matmul %135, %31, %cst_28 {dimension_numbers = #tpu.dot_dimension_numbers<[1], [0], [0], [1], [0, 0, 1, 1], [], []>} : vector<8x64xbf16>, vector<64x256xbf16>, vector<8x256xf32> -> vector<8x256xf32>
    %140 = vector.extract_strided_slice %8 {offsets = [32, 0], sizes = [8, 256], strides = [1, 1]} : vector<64x256xf32> to vector<8x256xf32>
    %141 = vector.extract_strided_slice %8 {offsets = [24, 0], sizes = [8, 256], strides = [1, 1]} : vector<64x256xf32> to vector<8x256xf32>
    %142 = arith.select %27, %140, %141 : vector<8x256xi1>, vector<8x256xf32>
    %cst_29 = arith.constant dense<0.000000e+00> : vector<8x256xf32>
    %143 = tpu.matmul %135, %28, %cst_29 {dimension_numbers = #tpu.dot_dimension_numbers<[1], [0], [0], [1], [0, 0, 1, 1], [], []>} : vector<8x64xbf16>, vector<64x256xbf16>, vector<8x256xf32> -> vector<8x256xf32>
    %144 = arith.addf %142, %143 : vector<8x256xf32>
    %145 = vector.extract_strided_slice %144 {offsets = [0, 0], sizes = [8, 192], strides = [1, 1]} : vector<8x256xf32> to vector<8x192xf32>
    %146 = arith.negf %145 : vector<8x192xf32>
    %147 = math.exp %146 : vector<8x192xf32>
    %cst_30 = arith.constant 1.000000e+00 : f32
    %148 = vector.broadcast %cst_30 : f32 to vector<8x192xf32>
    %149 = arith.addf %148, %147 : vector<8x192xf32>
    %150 = arith.divf %148, %149 : vector<8x192xf32>
    %151 = vector.extract_strided_slice %144 {offsets = [0, 192], sizes = [8, 64], strides = [1, 1]} : vector<8x256xf32> to vector<8x64xf32>
    %152 = math.tanh %151 : vector<8x64xf32>
    %153 = vector.extract_strided_slice %150 {offsets = [0, 0], sizes = [8, 64], strides = [1, 1]} : vector<8x192xf32> to vector<8x64xf32>
    %154 = vector.extract_strided_slice %150 {offsets = [0, 64], sizes = [8, 64], strides = [1, 1]} : vector<8x192xf32> to vector<8x64xf32>
    %155 = vector.extract_strided_slice %150 {offsets = [0, 128], sizes = [8, 64], strides = [1, 1]} : vector<8x192xf32> to vector<8x64xf32>
    %156 = arith.mulf %154, %132 : vector<8x64xf32>
    %157 = arith.mulf %153, %152 : vector<8x64xf32>
    %158 = arith.addf %156, %157 : vector<8x64xf32>
    %159 = math.tanh %158 : vector<8x64xf32>
    %160 = arith.mulf %155, %159 : vector<8x64xf32>
    %161 = arith.truncf %160 : vector<8x64xf32> to vector<8x64xbf16>
    %cst_31 = arith.constant dense<0.000000e+00> : vector<8x256xf32>
    %162 = tpu.matmul %161, %30, %cst_31 {dimension_numbers = #tpu.dot_dimension_numbers<[1], [0], [0], [1], [0, 0, 1, 1], [], []>} : vector<8x64xbf16>, vector<64x256xbf16>, vector<8x256xf32> -> vector<8x256xf32>
    %163 = vector.broadcast %33 : vector<1x256xf32> to vector<8x256xf32>
    %164 = arith.addf %162, %163 : vector<8x256xf32>
    %cst_32 = arith.constant dense<0.000000e+00> : vector<8x256xf32>
    %165 = tpu.matmul %161, %31, %cst_32 {dimension_numbers = #tpu.dot_dimension_numbers<[1], [0], [0], [1], [0, 0, 1, 1], [], []>} : vector<8x64xbf16>, vector<64x256xbf16>, vector<8x256xf32> -> vector<8x256xf32>
    %166 = vector.extract_strided_slice %8 {offsets = [40, 0], sizes = [8, 256], strides = [1, 1]} : vector<64x256xf32> to vector<8x256xf32>
    %167 = vector.extract_strided_slice %8 {offsets = [16, 0], sizes = [8, 256], strides = [1, 1]} : vector<64x256xf32> to vector<8x256xf32>
    %168 = arith.select %27, %166, %167 : vector<8x256xi1>, vector<8x256xf32>
    %cst_33 = arith.constant dense<0.000000e+00> : vector<8x256xf32>
    %169 = tpu.matmul %161, %28, %cst_33 {dimension_numbers = #tpu.dot_dimension_numbers<[1], [0], [0], [1], [0, 0, 1, 1], [], []>} : vector<8x64xbf16>, vector<64x256xbf16>, vector<8x256xf32> -> vector<8x256xf32>
    %170 = arith.addf %168, %169 : vector<8x256xf32>
    %171 = vector.extract_strided_slice %170 {offsets = [0, 0], sizes = [8, 192], strides = [1, 1]} : vector<8x256xf32> to vector<8x192xf32>
    %172 = arith.negf %171 : vector<8x192xf32>
    %173 = math.exp %172 : vector<8x192xf32>
    %cst_34 = arith.constant 1.000000e+00 : f32
    %174 = vector.broadcast %cst_34 : f32 to vector<8x192xf32>
    %175 = arith.addf %174, %173 : vector<8x192xf32>
    %176 = arith.divf %174, %175 : vector<8x192xf32>
    %177 = vector.extract_strided_slice %170 {offsets = [0, 192], sizes = [8, 64], strides = [1, 1]} : vector<8x256xf32> to vector<8x64xf32>
    %178 = math.tanh %177 : vector<8x64xf32>
    %179 = vector.extract_strided_slice %176 {offsets = [0, 0], sizes = [8, 64], strides = [1, 1]} : vector<8x192xf32> to vector<8x64xf32>
    %180 = vector.extract_strided_slice %176 {offsets = [0, 64], sizes = [8, 64], strides = [1, 1]} : vector<8x192xf32> to vector<8x64xf32>
    %181 = vector.extract_strided_slice %176 {offsets = [0, 128], sizes = [8, 64], strides = [1, 1]} : vector<8x192xf32> to vector<8x64xf32>
    %182 = arith.mulf %180, %158 : vector<8x64xf32>
    %183 = arith.mulf %179, %178 : vector<8x64xf32>
    %184 = arith.addf %182, %183 : vector<8x64xf32>
    %185 = math.tanh %184 : vector<8x64xf32>
    %186 = arith.mulf %181, %185 : vector<8x64xf32>
    %187 = arith.truncf %186 : vector<8x64xf32> to vector<8x64xbf16>
    %cst_35 = arith.constant dense<0.000000e+00> : vector<8x256xf32>
    %188 = tpu.matmul %187, %30, %cst_35 {dimension_numbers = #tpu.dot_dimension_numbers<[1], [0], [0], [1], [0, 0, 1, 1], [], []>} : vector<8x64xbf16>, vector<64x256xbf16>, vector<8x256xf32> -> vector<8x256xf32>
    %189 = vector.broadcast %33 : vector<1x256xf32> to vector<8x256xf32>
    %190 = arith.addf %188, %189 : vector<8x256xf32>
    %cst_36 = arith.constant dense<0.000000e+00> : vector<8x256xf32>
    %191 = tpu.matmul %187, %31, %cst_36 {dimension_numbers = #tpu.dot_dimension_numbers<[1], [0], [0], [1], [0, 0, 1, 1], [], []>} : vector<8x64xbf16>, vector<64x256xbf16>, vector<8x256xf32> -> vector<8x256xf32>
    %192 = vector.extract_strided_slice %8 {offsets = [48, 0], sizes = [8, 256], strides = [1, 1]} : vector<64x256xf32> to vector<8x256xf32>
    %193 = vector.extract_strided_slice %8 {offsets = [8, 0], sizes = [8, 256], strides = [1, 1]} : vector<64x256xf32> to vector<8x256xf32>
    %194 = arith.select %27, %192, %193 : vector<8x256xi1>, vector<8x256xf32>
    %cst_37 = arith.constant dense<0.000000e+00> : vector<8x256xf32>
    %195 = tpu.matmul %187, %28, %cst_37 {dimension_numbers = #tpu.dot_dimension_numbers<[1], [0], [0], [1], [0, 0, 1, 1], [], []>} : vector<8x64xbf16>, vector<64x256xbf16>, vector<8x256xf32> -> vector<8x256xf32>
    %196 = arith.addf %194, %195 : vector<8x256xf32>
    %197 = vector.extract_strided_slice %196 {offsets = [0, 0], sizes = [8, 192], strides = [1, 1]} : vector<8x256xf32> to vector<8x192xf32>
    %198 = arith.negf %197 : vector<8x192xf32>
    %199 = math.exp %198 : vector<8x192xf32>
    %cst_38 = arith.constant 1.000000e+00 : f32
    %200 = vector.broadcast %cst_38 : f32 to vector<8x192xf32>
    %201 = arith.addf %200, %199 : vector<8x192xf32>
    %202 = arith.divf %200, %201 : vector<8x192xf32>
    %203 = vector.extract_strided_slice %196 {offsets = [0, 192], sizes = [8, 64], strides = [1, 1]} : vector<8x256xf32> to vector<8x64xf32>
    %204 = math.tanh %203 : vector<8x64xf32>
    %205 = vector.extract_strided_slice %202 {offsets = [0, 0], sizes = [8, 64], strides = [1, 1]} : vector<8x192xf32> to vector<8x64xf32>
    %206 = vector.extract_strided_slice %202 {offsets = [0, 64], sizes = [8, 64], strides = [1, 1]} : vector<8x192xf32> to vector<8x64xf32>
    %207 = vector.extract_strided_slice %202 {offsets = [0, 128], sizes = [8, 64], strides = [1, 1]} : vector<8x192xf32> to vector<8x64xf32>
    %208 = arith.mulf %206, %184 : vector<8x64xf32>
    %209 = arith.mulf %205, %204 : vector<8x64xf32>
    %210 = arith.addf %208, %209 : vector<8x64xf32>
    %211 = math.tanh %210 : vector<8x64xf32>
    %212 = arith.mulf %207, %211 : vector<8x64xf32>
    %213 = arith.truncf %212 : vector<8x64xf32> to vector<8x64xbf16>
    %cst_39 = arith.constant dense<0.000000e+00> : vector<8x256xf32>
    %214 = tpu.matmul %213, %30, %cst_39 {dimension_numbers = #tpu.dot_dimension_numbers<[1], [0], [0], [1], [0, 0, 1, 1], [], []>} : vector<8x64xbf16>, vector<64x256xbf16>, vector<8x256xf32> -> vector<8x256xf32>
    %215 = vector.broadcast %33 : vector<1x256xf32> to vector<8x256xf32>
    %216 = arith.addf %214, %215 : vector<8x256xf32>
    %cst_40 = arith.constant dense<0.000000e+00> : vector<8x256xf32>
    %217 = tpu.matmul %213, %31, %cst_40 {dimension_numbers = #tpu.dot_dimension_numbers<[1], [0], [0], [1], [0, 0, 1, 1], [], []>} : vector<8x64xbf16>, vector<64x256xbf16>, vector<8x256xf32> -> vector<8x256xf32>
    %218 = vector.extract_strided_slice %8 {offsets = [56, 0], sizes = [8, 256], strides = [1, 1]} : vector<64x256xf32> to vector<8x256xf32>
    %219 = vector.extract_strided_slice %8 {offsets = [0, 0], sizes = [8, 256], strides = [1, 1]} : vector<64x256xf32> to vector<8x256xf32>
    %220 = arith.select %27, %218, %219 : vector<8x256xi1>, vector<8x256xf32>
    %cst_41 = arith.constant dense<0.000000e+00> : vector<8x256xf32>
    %221 = tpu.matmul %213, %28, %cst_41 {dimension_numbers = #tpu.dot_dimension_numbers<[1], [0], [0], [1], [0, 0, 1, 1], [], []>} : vector<8x64xbf16>, vector<64x256xbf16>, vector<8x256xf32> -> vector<8x256xf32>
    %222 = arith.addf %220, %221 : vector<8x256xf32>
    %223 = vector.extract_strided_slice %222 {offsets = [0, 0], sizes = [8, 192], strides = [1, 1]} : vector<8x256xf32> to vector<8x192xf32>
    %224 = arith.negf %223 : vector<8x192xf32>
    %225 = math.exp %224 : vector<8x192xf32>
    %cst_42 = arith.constant 1.000000e+00 : f32
    %226 = vector.broadcast %cst_42 : f32 to vector<8x192xf32>
    %227 = arith.addf %226, %225 : vector<8x192xf32>
    %228 = arith.divf %226, %227 : vector<8x192xf32>
    %229 = vector.extract_strided_slice %222 {offsets = [0, 192], sizes = [8, 64], strides = [1, 1]} : vector<8x256xf32> to vector<8x64xf32>
    %230 = math.tanh %229 : vector<8x64xf32>
    %231 = vector.extract_strided_slice %228 {offsets = [0, 0], sizes = [8, 64], strides = [1, 1]} : vector<8x192xf32> to vector<8x64xf32>
    %232 = vector.extract_strided_slice %228 {offsets = [0, 64], sizes = [8, 64], strides = [1, 1]} : vector<8x192xf32> to vector<8x64xf32>
    %233 = vector.extract_strided_slice %228 {offsets = [0, 128], sizes = [8, 64], strides = [1, 1]} : vector<8x192xf32> to vector<8x64xf32>
    %234 = arith.mulf %232, %210 : vector<8x64xf32>
    %235 = arith.mulf %231, %230 : vector<8x64xf32>
    %236 = arith.addf %234, %235 : vector<8x64xf32>
    %237 = math.tanh %236 : vector<8x64xf32>
    %238 = arith.mulf %233, %237 : vector<8x64xf32>
    %239 = arith.truncf %238 : vector<8x64xf32> to vector<8x64xbf16>
    %cst_43 = arith.constant dense<0.000000e+00> : vector<8x256xf32>
    %240 = tpu.matmul %239, %30, %cst_43 {dimension_numbers = #tpu.dot_dimension_numbers<[1], [0], [0], [1], [0, 0, 1, 1], [], []>} : vector<8x64xbf16>, vector<64x256xbf16>, vector<8x256xf32> -> vector<8x256xf32>
    %241 = vector.broadcast %33 : vector<1x256xf32> to vector<8x256xf32>
    %242 = arith.addf %240, %241 : vector<8x256xf32>
    %cst_44 = arith.constant dense<0.000000e+00> : vector<8x256xf32>
    %243 = tpu.matmul %239, %31, %cst_44 {dimension_numbers = #tpu.dot_dimension_numbers<[1], [0], [0], [1], [0, 0, 1, 1], [], []>} : vector<8x64xbf16>, vector<64x256xbf16>, vector<8x256xf32> -> vector<8x256xf32>
    %cst_45 = arith.constant 0.000000e+00 : bf16
    %244 = vector.broadcast %cst_45 : bf16 to vector<8x64xbf16>
    %cst_46 = arith.constant 0.000000e+00 : f32
    %245 = vector.broadcast %cst_46 : f32 to vector<8x64xf32>
    %246 = arith.addf %60, %243 : vector<8x256xf32>
    %247 = arith.addf %242, %61 : vector<8x256xf32>
    %248 = arith.select %27, %246, %247 : vector<8x256xi1>, vector<8x256xf32>
    %cst_47 = arith.constant dense<0.000000e+00> : vector<8x256xf32>
    %249 = tpu.matmul %244, %29, %cst_47 {dimension_numbers = #tpu.dot_dimension_numbers<[1], [0], [0], [1], [0, 0, 1, 1], [], []>} : vector<8x64xbf16>, vector<64x256xbf16>, vector<8x256xf32> -> vector<8x256xf32>
    %250 = arith.addf %248, %249 : vector<8x256xf32>
    %251 = vector.extract_strided_slice %250 {offsets = [0, 0], sizes = [8, 192], strides = [1, 1]} : vector<8x256xf32> to vector<8x192xf32>
    %252 = arith.negf %251 : vector<8x192xf32>
    %253 = math.exp %252 : vector<8x192xf32>
    %cst_48 = arith.constant 1.000000e+00 : f32
    %254 = vector.broadcast %cst_48 : f32 to vector<8x192xf32>
    %255 = arith.addf %254, %253 : vector<8x192xf32>
    %256 = arith.divf %254, %255 : vector<8x192xf32>
    %257 = vector.extract_strided_slice %250 {offsets = [0, 192], sizes = [8, 64], strides = [1, 1]} : vector<8x256xf32> to vector<8x64xf32>
    %258 = math.tanh %257 : vector<8x64xf32>
    %259 = vector.extract_strided_slice %256 {offsets = [0, 0], sizes = [8, 64], strides = [1, 1]} : vector<8x192xf32> to vector<8x64xf32>
    %260 = vector.extract_strided_slice %256 {offsets = [0, 64], sizes = [8, 64], strides = [1, 1]} : vector<8x192xf32> to vector<8x64xf32>
    %261 = vector.extract_strided_slice %256 {offsets = [0, 128], sizes = [8, 64], strides = [1, 1]} : vector<8x192xf32> to vector<8x64xf32>
    %262 = arith.mulf %260, %245 : vector<8x64xf32>
    %263 = arith.mulf %259, %258 : vector<8x64xf32>
    %264 = arith.addf %262, %263 : vector<8x64xf32>
    %265 = math.tanh %264 : vector<8x64xf32>
    %266 = arith.mulf %261, %265 : vector<8x64xf32>
    %267 = arith.truncf %266 : vector<8x64xf32> to vector<8x64xbf16>
    %268 = arith.addf %86, %217 : vector<8x256xf32>
    %269 = arith.addf %216, %87 : vector<8x256xf32>
    %270 = arith.select %27, %268, %269 : vector<8x256xi1>, vector<8x256xf32>
    %cst_49 = arith.constant dense<0.000000e+00> : vector<8x256xf32>
    %271 = tpu.matmul %267, %29, %cst_49 {dimension_numbers = #tpu.dot_dimension_numbers<[1], [0], [0], [1], [0, 0, 1, 1], [], []>} : vector<8x64xbf16>, vector<64x256xbf16>, vector<8x256xf32> -> vector<8x256xf32>
    %272 = arith.addf %270, %271 : vector<8x256xf32>
    %273 = vector.extract_strided_slice %272 {offsets = [0, 0], sizes = [8, 192], strides = [1, 1]} : vector<8x256xf32> to vector<8x192xf32>
    %274 = arith.negf %273 : vector<8x192xf32>
    %275 = math.exp %274 : vector<8x192xf32>
    %cst_50 = arith.constant 1.000000e+00 : f32
    %276 = vector.broadcast %cst_50 : f32 to vector<8x192xf32>
    %277 = arith.addf %276, %275 : vector<8x192xf32>
    %278 = arith.divf %276, %277 : vector<8x192xf32>
    %279 = vector.extract_strided_slice %272 {offsets = [0, 192], sizes = [8, 64], strides = [1, 1]} : vector<8x256xf32> to vector<8x64xf32>
    %280 = math.tanh %279 : vector<8x64xf32>
    %281 = vector.extract_strided_slice %278 {offsets = [0, 0], sizes = [8, 64], strides = [1, 1]} : vector<8x192xf32> to vector<8x64xf32>
    %282 = vector.extract_strided_slice %278 {offsets = [0, 64], sizes = [8, 64], strides = [1, 1]} : vector<8x192xf32> to vector<8x64xf32>
    %283 = vector.extract_strided_slice %278 {offsets = [0, 128], sizes = [8, 64], strides = [1, 1]} : vector<8x192xf32> to vector<8x64xf32>
    %284 = arith.mulf %282, %264 : vector<8x64xf32>
    %285 = arith.mulf %281, %280 : vector<8x64xf32>
    %286 = arith.addf %284, %285 : vector<8x64xf32>
    %287 = math.tanh %286 : vector<8x64xf32>
    %288 = arith.mulf %283, %287 : vector<8x64xf32>
    %289 = arith.truncf %288 : vector<8x64xf32> to vector<8x64xbf16>
    %290 = arith.addf %112, %191 : vector<8x256xf32>
    %291 = arith.addf %190, %113 : vector<8x256xf32>
    %292 = arith.select %27, %290, %291 : vector<8x256xi1>, vector<8x256xf32>
    %cst_51 = arith.constant dense<0.000000e+00> : vector<8x256xf32>
    %293 = tpu.matmul %289, %29, %cst_51 {dimension_numbers = #tpu.dot_dimension_numbers<[1], [0], [0], [1], [0, 0, 1, 1], [], []>} : vector<8x64xbf16>, vector<64x256xbf16>, vector<8x256xf32> -> vector<8x256xf32>
    %294 = arith.addf %292, %293 : vector<8x256xf32>
    %295 = vector.extract_strided_slice %294 {offsets = [0, 0], sizes = [8, 192], strides = [1, 1]} : vector<8x256xf32> to vector<8x192xf32>
    %296 = arith.negf %295 : vector<8x192xf32>
    %297 = math.exp %296 : vector<8x192xf32>
    %cst_52 = arith.constant 1.000000e+00 : f32
    %298 = vector.broadcast %cst_52 : f32 to vector<8x192xf32>
    %299 = arith.addf %298, %297 : vector<8x192xf32>
    %300 = arith.divf %298, %299 : vector<8x192xf32>
    %301 = vector.extract_strided_slice %294 {offsets = [0, 192], sizes = [8, 64], strides = [1, 1]} : vector<8x256xf32> to vector<8x64xf32>
    %302 = math.tanh %301 : vector<8x64xf32>
    %303 = vector.extract_strided_slice %300 {offsets = [0, 0], sizes = [8, 64], strides = [1, 1]} : vector<8x192xf32> to vector<8x64xf32>
    %304 = vector.extract_strided_slice %300 {offsets = [0, 64], sizes = [8, 64], strides = [1, 1]} : vector<8x192xf32> to vector<8x64xf32>
    %305 = vector.extract_strided_slice %300 {offsets = [0, 128], sizes = [8, 64], strides = [1, 1]} : vector<8x192xf32> to vector<8x64xf32>
    %306 = arith.mulf %304, %286 : vector<8x64xf32>
    %307 = arith.mulf %303, %302 : vector<8x64xf32>
    %308 = arith.addf %306, %307 : vector<8x64xf32>
    %309 = math.tanh %308 : vector<8x64xf32>
    %310 = arith.mulf %305, %309 : vector<8x64xf32>
    %311 = arith.truncf %310 : vector<8x64xf32> to vector<8x64xbf16>
    %312 = arith.addf %138, %165 : vector<8x256xf32>
    %313 = arith.addf %164, %139 : vector<8x256xf32>
    %314 = arith.select %27, %312, %313 : vector<8x256xi1>, vector<8x256xf32>
    %cst_53 = arith.constant dense<0.000000e+00> : vector<8x256xf32>
    %315 = tpu.matmul %311, %29, %cst_53 {dimension_numbers = #tpu.dot_dimension_numbers<[1], [0], [0], [1], [0, 0, 1, 1], [], []>} : vector<8x64xbf16>, vector<64x256xbf16>, vector<8x256xf32> -> vector<8x256xf32>
    %316 = arith.addf %314, %315 : vector<8x256xf32>
    %317 = vector.extract_strided_slice %316 {offsets = [0, 0], sizes = [8, 192], strides = [1, 1]} : vector<8x256xf32> to vector<8x192xf32>
    %318 = arith.negf %317 : vector<8x192xf32>
    %319 = math.exp %318 : vector<8x192xf32>
    %cst_54 = arith.constant 1.000000e+00 : f32
    %320 = vector.broadcast %cst_54 : f32 to vector<8x192xf32>
    %321 = arith.addf %320, %319 : vector<8x192xf32>
    %322 = arith.divf %320, %321 : vector<8x192xf32>
    %323 = vector.extract_strided_slice %316 {offsets = [0, 192], sizes = [8, 64], strides = [1, 1]} : vector<8x256xf32> to vector<8x64xf32>
    %324 = math.tanh %323 : vector<8x64xf32>
    %325 = vector.extract_strided_slice %322 {offsets = [0, 0], sizes = [8, 64], strides = [1, 1]} : vector<8x192xf32> to vector<8x64xf32>
    %326 = vector.extract_strided_slice %322 {offsets = [0, 64], sizes = [8, 64], strides = [1, 1]} : vector<8x192xf32> to vector<8x64xf32>
    %327 = vector.extract_strided_slice %322 {offsets = [0, 128], sizes = [8, 64], strides = [1, 1]} : vector<8x192xf32> to vector<8x64xf32>
    %328 = arith.mulf %326, %308 : vector<8x64xf32>
    %329 = arith.mulf %325, %324 : vector<8x64xf32>
    %330 = arith.addf %328, %329 : vector<8x64xf32>
    %331 = math.tanh %330 : vector<8x64xf32>
    %332 = arith.mulf %327, %331 : vector<8x64xf32>
    %333 = arith.truncf %332 : vector<8x64xf32> to vector<8x64xbf16>
    %334 = arith.addf %164, %139 : vector<8x256xf32>
    %335 = arith.addf %138, %165 : vector<8x256xf32>
    %336 = arith.select %27, %334, %335 : vector<8x256xi1>, vector<8x256xf32>
    %cst_55 = arith.constant dense<0.000000e+00> : vector<8x256xf32>
    %337 = tpu.matmul %333, %29, %cst_55 {dimension_numbers = #tpu.dot_dimension_numbers<[1], [0], [0], [1], [0, 0, 1, 1], [], []>} : vector<8x64xbf16>, vector<64x256xbf16>, vector<8x256xf32> -> vector<8x256xf32>
    %338 = arith.addf %336, %337 : vector<8x256xf32>
    %339 = vector.extract_strided_slice %338 {offsets = [0, 0], sizes = [8, 192], strides = [1, 1]} : vector<8x256xf32> to vector<8x192xf32>
    %340 = arith.negf %339 : vector<8x192xf32>
    %341 = math.exp %340 : vector<8x192xf32>
    %cst_56 = arith.constant 1.000000e+00 : f32
    %342 = vector.broadcast %cst_56 : f32 to vector<8x192xf32>
    %343 = arith.addf %342, %341 : vector<8x192xf32>
    %344 = arith.divf %342, %343 : vector<8x192xf32>
    %345 = vector.extract_strided_slice %338 {offsets = [0, 192], sizes = [8, 64], strides = [1, 1]} : vector<8x256xf32> to vector<8x64xf32>
    %346 = math.tanh %345 : vector<8x64xf32>
    %347 = vector.extract_strided_slice %344 {offsets = [0, 0], sizes = [8, 64], strides = [1, 1]} : vector<8x192xf32> to vector<8x64xf32>
    %348 = vector.extract_strided_slice %344 {offsets = [0, 64], sizes = [8, 64], strides = [1, 1]} : vector<8x192xf32> to vector<8x64xf32>
    %349 = vector.extract_strided_slice %344 {offsets = [0, 128], sizes = [8, 64], strides = [1, 1]} : vector<8x192xf32> to vector<8x64xf32>
    %350 = arith.mulf %348, %330 : vector<8x64xf32>
    %351 = arith.mulf %347, %346 : vector<8x64xf32>
    %352 = arith.addf %350, %351 : vector<8x64xf32>
    %353 = math.tanh %352 : vector<8x64xf32>
    %354 = arith.mulf %349, %353 : vector<8x64xf32>
    %355 = arith.truncf %354 : vector<8x64xf32> to vector<8x64xbf16>
    %356 = arith.addf %190, %113 : vector<8x256xf32>
    %357 = arith.addf %112, %191 : vector<8x256xf32>
    %358 = arith.select %27, %356, %357 : vector<8x256xi1>, vector<8x256xf32>
    %cst_57 = arith.constant dense<0.000000e+00> : vector<8x256xf32>
    %359 = tpu.matmul %355, %29, %cst_57 {dimension_numbers = #tpu.dot_dimension_numbers<[1], [0], [0], [1], [0, 0, 1, 1], [], []>} : vector<8x64xbf16>, vector<64x256xbf16>, vector<8x256xf32> -> vector<8x256xf32>
    %360 = arith.addf %358, %359 : vector<8x256xf32>
    %361 = vector.extract_strided_slice %360 {offsets = [0, 0], sizes = [8, 192], strides = [1, 1]} : vector<8x256xf32> to vector<8x192xf32>
    %362 = arith.negf %361 : vector<8x192xf32>
    %363 = math.exp %362 : vector<8x192xf32>
    %cst_58 = arith.constant 1.000000e+00 : f32
    %364 = vector.broadcast %cst_58 : f32 to vector<8x192xf32>
    %365 = arith.addf %364, %363 : vector<8x192xf32>
    %366 = arith.divf %364, %365 : vector<8x192xf32>
    %367 = vector.extract_strided_slice %360 {offsets = [0, 192], sizes = [8, 64], strides = [1, 1]} : vector<8x256xf32> to vector<8x64xf32>
    %368 = math.tanh %367 : vector<8x64xf32>
    %369 = vector.extract_strided_slice %366 {offsets = [0, 0], sizes = [8, 64], strides = [1, 1]} : vector<8x192xf32> to vector<8x64xf32>
    %370 = vector.extract_strided_slice %366 {offsets = [0, 64], sizes = [8, 64], strides = [1, 1]} : vector<8x192xf32> to vector<8x64xf32>
    %371 = vector.extract_strided_slice %366 {offsets = [0, 128], sizes = [8, 64], strides = [1, 1]} : vector<8x192xf32> to vector<8x64xf32>
    %372 = arith.mulf %370, %352 : vector<8x64xf32>
    %373 = arith.mulf %369, %368 : vector<8x64xf32>
    %374 = arith.addf %372, %373 : vector<8x64xf32>
    %375 = math.tanh %374 : vector<8x64xf32>
    %376 = arith.mulf %371, %375 : vector<8x64xf32>
    %377 = arith.truncf %376 : vector<8x64xf32> to vector<8x64xbf16>
    %378 = arith.addf %216, %87 : vector<8x256xf32>
    %379 = arith.addf %86, %217 : vector<8x256xf32>
    %380 = arith.select %27, %378, %379 : vector<8x256xi1>, vector<8x256xf32>
    %cst_59 = arith.constant dense<0.000000e+00> : vector<8x256xf32>
    %381 = tpu.matmul %377, %29, %cst_59 {dimension_numbers = #tpu.dot_dimension_numbers<[1], [0], [0], [1], [0, 0, 1, 1], [], []>} : vector<8x64xbf16>, vector<64x256xbf16>, vector<8x256xf32> -> vector<8x256xf32>
    %382 = arith.addf %380, %381 : vector<8x256xf32>
    %383 = vector.extract_strided_slice %382 {offsets = [0, 0], sizes = [8, 192], strides = [1, 1]} : vector<8x256xf32> to vector<8x192xf32>
    %384 = arith.negf %383 : vector<8x192xf32>
    %385 = math.exp %384 : vector<8x192xf32>
    %cst_60 = arith.constant 1.000000e+00 : f32
    %386 = vector.broadcast %cst_60 : f32 to vector<8x192xf32>
    %387 = arith.addf %386, %385 : vector<8x192xf32>
    %388 = arith.divf %386, %387 : vector<8x192xf32>
    %389 = vector.extract_strided_slice %382 {offsets = [0, 192], sizes = [8, 64], strides = [1, 1]} : vector<8x256xf32> to vector<8x64xf32>
    %390 = math.tanh %389 : vector<8x64xf32>
    %391 = vector.extract_strided_slice %388 {offsets = [0, 0], sizes = [8, 64], strides = [1, 1]} : vector<8x192xf32> to vector<8x64xf32>
    %392 = vector.extract_strided_slice %388 {offsets = [0, 64], sizes = [8, 64], strides = [1, 1]} : vector<8x192xf32> to vector<8x64xf32>
    %393 = vector.extract_strided_slice %388 {offsets = [0, 128], sizes = [8, 64], strides = [1, 1]} : vector<8x192xf32> to vector<8x64xf32>
    %394 = arith.mulf %392, %374 : vector<8x64xf32>
    %395 = arith.mulf %391, %390 : vector<8x64xf32>
    %396 = arith.addf %394, %395 : vector<8x64xf32>
    %397 = math.tanh %396 : vector<8x64xf32>
    %398 = arith.mulf %393, %397 : vector<8x64xf32>
    %399 = arith.truncf %398 : vector<8x64xf32> to vector<8x64xbf16>
    %400 = arith.addf %242, %61 : vector<8x256xf32>
    %401 = arith.addf %60, %243 : vector<8x256xf32>
    %402 = arith.select %27, %400, %401 : vector<8x256xi1>, vector<8x256xf32>
    %cst_61 = arith.constant dense<0.000000e+00> : vector<8x256xf32>
    %403 = tpu.matmul %399, %29, %cst_61 {dimension_numbers = #tpu.dot_dimension_numbers<[1], [0], [0], [1], [0, 0, 1, 1], [], []>} : vector<8x64xbf16>, vector<64x256xbf16>, vector<8x256xf32> -> vector<8x256xf32>
    %404 = arith.addf %402, %403 : vector<8x256xf32>
    %405 = vector.extract_strided_slice %404 {offsets = [0, 0], sizes = [8, 192], strides = [1, 1]} : vector<8x256xf32> to vector<8x192xf32>
    %406 = arith.negf %405 : vector<8x192xf32>
    %407 = math.exp %406 : vector<8x192xf32>
    %cst_62 = arith.constant 1.000000e+00 : f32
    %408 = vector.broadcast %cst_62 : f32 to vector<8x192xf32>
    %409 = arith.addf %408, %407 : vector<8x192xf32>
    %410 = arith.divf %408, %409 : vector<8x192xf32>
    %411 = vector.extract_strided_slice %404 {offsets = [0, 192], sizes = [8, 64], strides = [1, 1]} : vector<8x256xf32> to vector<8x64xf32>
    %412 = math.tanh %411 : vector<8x64xf32>
    %413 = vector.extract_strided_slice %410 {offsets = [0, 0], sizes = [8, 64], strides = [1, 1]} : vector<8x192xf32> to vector<8x64xf32>
    %414 = vector.extract_strided_slice %410 {offsets = [0, 64], sizes = [8, 64], strides = [1, 1]} : vector<8x192xf32> to vector<8x64xf32>
    %415 = vector.extract_strided_slice %410 {offsets = [0, 128], sizes = [8, 64], strides = [1, 1]} : vector<8x192xf32> to vector<8x64xf32>
    %416 = arith.mulf %414, %396 : vector<8x64xf32>
    %417 = arith.mulf %413, %412 : vector<8x64xf32>
    %418 = arith.addf %416, %417 : vector<8x64xf32>
    %419 = math.tanh %418 : vector<8x64xf32>
    %420 = arith.mulf %415, %419 : vector<8x64xf32>
    %421 = arith.truncf %420 : vector<8x64xf32> to vector<8x64xbf16>
    %c528 = arith.constant 528 : index
    %c0_63 = arith.constant 0 : index
    %422 = vector.load %arg1[%c528, %c0_63] : memref<560x256xbf16, #tpu.memory_space<vmem>>, vector<1x256xbf16>
    %423 = arith.extf %422 : vector<1x256xbf16> to vector<1x256xf32>
    %c544 = arith.constant 544 : index
    %c0_64 = arith.constant 0 : index
    %424 = vector.load %arg1[%c544, %c0_64] : memref<560x256xbf16, #tpu.memory_space<vmem>>, vector<1x256xbf16>
    %425 = arith.extf %424 : vector<1x256xbf16> to vector<1x256xf32>
    %c384 = arith.constant 384 : index
    %c0_65 = arith.constant 0 : index
    %426 = vector.load %arg1[%c384, %c0_65] : memref<560x256xbf16, #tpu.memory_space<vmem>>, vector<64x256xbf16>
    %cst_66 = arith.constant dense<0.000000e+00> : vector<8x256xf32>
    %427 = tpu.matmul %421, %426, %cst_66 {dimension_numbers = #tpu.dot_dimension_numbers<[1], [0], [0], [1], [0, 0, 1, 1], [], []>} : vector<8x64xbf16>, vector<64x256xbf16>, vector<8x256xf32> -> vector<8x256xf32>
    %428 = vector.broadcast %423 : vector<1x256xf32> to vector<8x256xf32>
    %429 = arith.addf %427, %428 : vector<8x256xf32>
    %cst_67 = arith.constant 0.000000e+00 : f32
    %430 = vector.broadcast %cst_67 : f32 to vector<8x256xf32>
    %431 = arith.maximumf %429, %430 : vector<8x256xf32>
    %432 = vector.extract_strided_slice %431 {offsets = [0, 0], sizes = [8, 64], strides = [1, 1]} : vector<8x256xf32> to vector<8x64xf32>
    %433 = arith.truncf %432 : vector<8x64xf32> to vector<8x64xbf16>
    %c448 = arith.constant 448 : index
    %c0_68 = arith.constant 0 : index
    %434 = vector.load %arg1[%c448, %c0_68] : memref<560x256xbf16, #tpu.memory_space<vmem>>, vector<64x256xbf16>
    %cst_69 = arith.constant dense<0.000000e+00> : vector<8x256xf32>
    %435 = tpu.matmul %433, %434, %cst_69 {dimension_numbers = #tpu.dot_dimension_numbers<[1], [0], [0], [1], [0, 0, 1, 1], [], []>} : vector<8x64xbf16>, vector<64x256xbf16>, vector<8x256xf32> -> vector<8x256xf32>
    %436 = vector.broadcast %425 : vector<1x256xf32> to vector<8x256xf32>
    %437 = arith.addf %435, %436 : vector<8x256xf32>
    %438 = vector.extract_strided_slice %437 {offsets = [0, 0], sizes = [8, 2], strides = [1, 1]} : vector<8x256xf32> to vector<8x2xf32>
    %cst_70 = arith.constant dense<0xFF800000> : vector<8xf32>
    %439 = vector.multi_reduction <maximumf>, %438, %cst_70 [1] : vector<8x2xf32> to vector<8xf32>
    %440 = vector.shape_cast %439 : vector<8xf32> to vector<8x1xf32>
    %441 = vector.broadcast %440 : vector<8x1xf32> to vector<8x2xf32>
    %442 = arith.subf %438, %441 : vector<8x2xf32>
    %443 = math.exp %442 : vector<8x2xf32>
    %cst_71 = arith.constant dense<0.000000e+00> : vector<8xf32>
    %444 = vector.multi_reduction <add>, %443, %cst_71 [1] : vector<8x2xf32> to vector<8xf32>
    %445 = vector.shape_cast %444 : vector<8xf32> to vector<8x1xf32>
    %446 = math.log %445 : vector<8x1xf32>
    %447 = arith.addf %446, %440 : vector<8x1xf32>
    %448 = vector.broadcast %447 : vector<8x1xf32> to vector<8x2xf32>
    %449 = arith.subf %438, %448 : vector<8x2xf32>
    %c0_72 = arith.constant 0 : index
    %c0_73 = arith.constant 0 : index
    %450 = vector.load %arg2[%c0_72, %c0_73] : memref<8x2xf32, #tpu.memory_space<vmem>>, vector<8x2xf32>
    tpu.vector_store %arg2[%c0_72, %c0_73], %449 {strides = array<i32>} : memref<8x2xf32, #tpu.memory_space<vmem>>, vector<8x2xf32>,
    return
  }
}

</mosaic_0001>

<bundles_post_ra>
// kernel: forward.1
= control target key start
LH: loop header
LB: loop body
LE: loop exit
PB: predicated region body
PF: predicated region fallthrough
CT: control target
= control target key end

     0   :  { %7 = vsyncpa [#allocation3], 0  ;;  %s3094_s12 = smov [#allocation2]   ;;  %s3095_s14 = smov 128   ;;  %s3990_s0 = inlined_call_operand.vmem [shape: s32[64,1], index: 0, kind: input, shape index: {}]   ;;  %s3991_s1 = inlined_call_operand.hbm [shape: bf16[560,256], index: 1, kind: input, shape index: {}]   ;;  %s3992_s2 = inlined_call_operand.vmem [shape: f32[8,2], index: 2, kind: output, shape index: {}]  }
   0x1   :  { %s14_s11 = sshll.u32 %s3991_s1, 4  ;;  %s16_s13 = sshll.u32 %s3094_s12, 4  ;;  %s15_s11 = int_to_ptr.hbm [resolvable:$true] %s14_s11  ;;  %s17_s13 = int_to_ptr.vmem [resolvable:$true] %s16_s13 }
   0x2   :  { %s3096_s15 = smov 8  }
   0x3   :  { %22 = dma.hbm_to_vmem [thread:$0]  %s15_s11, 8960, %s17_s13, [#allocation3], %s3095_s14, %s3095_s14, %s3096_s15  }
   0x4   :  { %3092 = dma.done.wait [#allocation3], 8960  }
   0x5   :  { %3093 = vsyncadd [#allocation3], 4294958336  ;;  %v3993_v0 = vmov 0   ;;  %v30_v1 = vld [vmem:[%s3990_s0 + $0x10] sm:$0xff]  ;;  %v28_v2 = vld [vmem:[%s3990_s0] sm:$0xff]  ;;  %v36_v61 = vlaneseq }
   0x6   :  { %2870 = vset.pattern.permute.xlu1 %v3993_v0  ;;  %2869 = vset.pattern.permute.xlu0 %v3993_v0  ;;  %v32_v3 = vld [vmem:[%s3990_s0 + $0x20] sm:$0xff]  ;;  %v2531_v4 = vld [vmem:[#allocation2 + $0x70] sm:$0xf]  ;;  %v2822_v5 = vld [vmem:[#allocation2 + $0x74] sm:$0xf0] }
   0x7   :  { %2871 = vset.pattern.permute.xlu2 %v3993_v0  ;;  %45 = vperm.xlu1 %2870, %v30_v1   ;;  %v2821_v6 = vld [vmem:[#allocation2 + $0x74] sm:$0xf]  ;;  %v2533_v7 = vld [vmem:[#allocation2 + $0x78] sm:$0xf0]  ;;  %v2532_v8 = vor.u32 %v2822_v5, %v2531_v4  ;;  %v2523_v10 = vld [vmem:[#allocation2 + $0x60] sm:$0xf] }
   0x8   :  { %39 = vperm.xlu0 %2869, %v28_v2   ;;  %51 = vperm.xlu2 %2871, %v32_v3   ;;  %v2536_v9 = vor.u32 %v2821_v6, %v2533_v7  ;;  %v2820_v11 = vld [vmem:[#allocation2 + $0x64] sm:$0xf0]  ;;  %v2819_v12 = vld [vmem:[#allocation2 + $0x64] sm:$0xf]  ;;  %v2525_v13 = vld [vmem:[#allocation2 + $0x68] sm:$0xf0] }
   0x9   :  { %v31_v14 = vld [vmem:[%s3990_s0 + $0x18] sm:$0xff]  ;;  %v29_v15 = vld [vmem:[%s3990_s0 + $0x8] sm:$0xff]  ;;  %186 = vmatpush.bf16.msra.mxu0 %v2532_v8  ;;  %v2524_v16 = vor.u32 %v2820_v11, %v2523_v10  ;;  %v2528_v17 = vor.u32 %v2819_v12, %v2525_v13  ;;  %v2515_v18 = vld [vmem:[#allocation2 + $0x50] sm:$0xf]  ;;  %v3148_v62 = vand.u32 127, %v36_v61 }
   0xa   :  { %215 = vmatpush.bf16.msra.mxu1 %v2536_v9  ;;  %v2818_v19 = vld [vmem:[#allocation2 + $0x54] sm:$0xf0]  ;;  %v2817_v20 = vld [vmem:[#allocation2 + $0x54] sm:$0xf]  ;;  %v2517_v21 = vld [vmem:[#allocation2 + $0x58] sm:$0xf0] }
   0xb   :  { %v33_v22 = vld [vmem:[%s3990_s0 + $0x28] sm:$0xff]  ;;  %v2516_v23 = vor.u32 %v2818_v19, %v2515_v18  ;;  %v2520_v24 = vor.u32 %v2817_v20, %v2517_v21  ;;  %v2507_v25 = vld [vmem:[#allocation2 + $0x40] sm:$0xf]  ;;  %v2815_v27 = vld [vmem:[#allocation2 + $0x44] sm:$0xf] }
   0xc   :  { %v2816_v26 = vld [vmem:[#allocation2 + $0x44] sm:$0xf0]  ;;  %v2509_v28 = vld [vmem:[#allocation2 + $0x48] sm:$0xf0]  ;;  %v35_v29 = vld [vmem:[%s3990_s0 + $0x38] sm:$0xff] }
   0xd   :  { %187 = vmatpush.bf16.msra.mxu0 %v2524_v16  ;;  %v34_v30 = vld [vmem:[%s3990_s0 + $0x30] sm:$0xff]  ;;  %v2508_v31 = vor.u32 %v2816_v26, %v2507_v25  ;;  %v2512_v32 = vor.u32 %v2815_v27, %v2509_v28  ;;  %v2814_v34 = vld [vmem:[#allocation2 + $0x34] sm:$0xf0]  ;;  %v2501_v36 = vld [vmem:[#allocation2 + $0x38] sm:$0xf0]  ;;  %s3099_s0 = smov 64  }
   0xe   :  { %216 = vmatpush.bf16.msra.mxu1 %v2528_v17  ;;  %v2499_v33 = vld [vmem:[#allocation2 + $0x30] sm:$0xf]  ;;  %v2813_v35 = vld [vmem:[#allocation2 + $0x34] sm:$0xf]  ;;  %v2491_v39 = vld [vmem:[#allocation2 + $0x20] sm:$0xf] }
   0xf   :  { %48 = vperm.xlu1 %2870, %v31_v14   ;;  %v2500_v37 = vor.u32 %v2814_v34, %v2499_v33  ;;  %v2504_v38 = vor.u32 %v2813_v35, %v2501_v36  ;;  %v2812_v40 = vld [vmem:[#allocation2 + $0x24] sm:$0xf0]  ;;  %v2811_v41 = vld [vmem:[#allocation2 + $0x24] sm:$0xf]  ;;  %v2493_v42 = vld [vmem:[#allocation2 + $0x28] sm:$0xf0] }
  0x10   :  { %42 = vperm.xlu0 %2869, %v29_v15   ;;  %54 = vperm.xlu2 %2871, %v33_v22   ;;  %v2492_v43 = vor.u32 %v2812_v40, %v2491_v39  ;;  %v2496_v44 = vor.u32 %v2811_v41, %v2493_v42  ;;  %v2483_v45 = vld [vmem:[#allocation2 + $0x10] sm:$0xf]  ;;  %v2810_v46 = vld [vmem:[#allocation2 + $0x14] sm:$0xf0]  ;;  %v2809_v47 = vld [vmem:[#allocation2 + $0x14] sm:$0xf] }
  0x11   :  { %188 = vmatpush.bf16.msra.mxu0 %v2516_v23  ;;  %v2484_v48 = vor.u32 %v2810_v46, %v2483_v45  ;;  %v2485_v49 = vld [vmem:[#allocation2 + $0x18] sm:$0xf0]  ;;  %v2475_v50 = vld [vmem:[#allocation2] sm:$0xf]  ;;  %v2808_v51 = vld [vmem:[#allocation2 + $0x4] sm:$0xf0] }
  0x12   :  { %217 = vmatpush.bf16.msra.mxu1 %v2520_v24  ;;  %v2488_v52 = vor.u32 %v2809_v47, %v2485_v49  ;;  %v2807_v53 = vld [vmem:[#allocation2 + $0x4] sm:$0xf]  ;;  %v2477_v54 = vld [vmem:[#allocation2 + $0x8] sm:$0xf0]  ;;  %v2476_v55 = vor.u32 %v2808_v51, %v2475_v50  ;;  %v2829_v57 = vld [vmem:[#allocation2 + $0xb4] sm:$0xf] }
  0x13   :  { %v2480_v56 = vor.u32 %v2807_v53, %v2477_v54  ;;  %v2581_v58 = vld [vmem:[#allocation2 + $0xb8] sm:$0xf0]  ;;  %v2827_v1 = vld [vmem:[#allocation2 + $0xa4] sm:$0xf]  ;;  %v2573_v2 = vld [vmem:[#allocation2 + $0xa8] sm:$0xf0] }
  0x14   :  { %v3145_v59 = vor.u32 %v2829_v57, %v2581_v58  ;;  %v3152_v3 = vor.u32 %v2827_v1, %v2573_v2  ;;  %v3098_v4 = vmov 1.0|1.0   ;;  %v2579_v5 = vld [vmem:[#allocation2 + $0xb0] sm:$0xf]  ;;  %v2830_v6 = vld [vmem:[#allocation2 + $0xb4] sm:$0xf0] }
  0x15   :  { %189 = vmatpush.bf16.msra.mxu0 %v2508_v31  ;;  %v2825_v7 = vld [vmem:[#allocation2 + $0x94] sm:$0xf]  ;;  %v3155_v9 = vor.u32 %v2830_v6, %v2579_v5  ;;  %v2565_v10 = vld [vmem:[#allocation2 + $0x98] sm:$0xf0]  ;;  %v2571_v11 = vld [vmem:[#allocation2 + $0xa0] sm:$0xf] }
  0x16   :  { %218 = vmatpush.bf16.msra.mxu1 %v2512_v32  ;;  %369 = vmatpush.bf16.msra.mxu3 %v3145_v59  ;;  %v2828_v12 = vld [vmem:[#allocation2 + $0xa4] sm:$0xf0]  ;;  %v3157_v13 = vor.u32 %v2825_v7, %v2565_v10  ;;  %v2823_v14 = vld [vmem:[#allocation2 + $0x84] sm:$0xf]  ;;  %v2557_v15 = vld [vmem:[#allocation2 + $0x88] sm:$0xf0] }
  0x17   :  { %60 = vperm.xlu1 %2870, %v35_v29   ;;  %356 = vmatpush.bf16.msra.mxu2 %v3155_v9  ;;  %v3160_v16 = vor.u32 %v2828_v12, %v2571_v11  ;;  %v2563_v17 = vld [vmem:[#allocation2 + $0x90] sm:$0xf]  ;;  %v2826_v18 = vld [vmem:[#allocation2 + $0x94] sm:$0xf0]  ;;  %v3163_v19 = vor.u32 %v2823_v14, %v2557_v15  ;;  %v2555_v22 = vld [vmem:[#allocation2 + $0x80] sm:$0xf] }
  0x18   :  { %57 = vperm.xlu0 %2869, %v34_v30   ;;  %v3166_v20 = vor.u32 %v2826_v18, %v2563_v17  ;;  %v2824_v23 = vld [vmem:[#allocation2 + $0x84] sm:$0xf0]  ;;  %v244_v42 = vadd.s32 128, %v3148_v62  ;;  %v249_v54 = vand.u32 63, %v3148_v62  ;;  %v2845_v15 = vld [vmem:[#allocation2 + $0xf4] sm:$0xf] }
  0x19   :  { %190 = vmatpush.bf16.msra.mxu0 %v2500_v37  ;;  %v3173_v24 = vor.u32 %v2824_v23, %v2555_v22  ;;  %v2615_v17 = vld [vmem:[#allocation2 + $0xf8] sm:$0xf0]  ;;  %v2613_v18 = vld [vmem:[#allocation2 + $0xf0] sm:$0xf]  ;;  %v2846_v22 = vld [vmem:[#allocation2 + $0xf4] sm:$0xf0] }
  0x1a   :  { %219 = vmatpush.bf16.msra.mxu1 %v2504_v38  ;;  %370 = vmatpush.bf16.msra.mxu3 %v3152_v3  ;;  %vm3227_vm13 = vcmp.lt.s32.totalorder %v249_v54, 32  ;;  %v2843_v23 = vld [vmem:[#allocation2 + $0xe4] sm:$0xf] }
  0x1b   :  { %357 = vmatpush.bf16.msra.mxu2 %v3160_v16 }
  0x1d   :  { %191 = vmatpush.bf16.msra.mxu0 %v2492_v43 }
  0x1e   :  { %220 = vmatpush.bf16.msra.mxu1 %v2496_v44  ;;  %371 = vmatpush.bf16.msra.mxu3 %v3157_v13  ;;  %v256_v44 = vand.u32 63, %v244_v42  ;;  %v2597_v42 = vld [vmem:[#allocation2 + $0xd0] sm:$0xf] }
  0x1f   :  { %358 = vmatpush.bf16.msra.mxu2 %v3166_v20 }
  0x20   :  { %vm3204_vm12 = vcmp.lt.s32.totalorder %v256_v44, 32  ;;  %v2842_v44 = vld [vmem:[#allocation2 + $0xd4] sm:$0xf0] }
  0x21   :  { %192 = vmatpush.bf16.msra.mxu0 %v2484_v48 }
  0x22   :  { %221 = vmatpush.bf16.msra.mxu1 %v2488_v52  ;;  %372 = vmatpush.bf16.msra.mxu3 %v3163_v19 }
  0x23   :  { %359 = vmatpush.bf16.msra.mxu2 %v3173_v24 }
  0x25   :  { %193 = vmatpush.bf16.msra.mxu0 %v2476_v55  ;;  %373 = vmatmul.bf16.vlgmr.msra.gmra.mxu3 %v3993_v0 }
  0x26   :  { %222 = vmatpush.bf16.msra.mxu1 %v2480_v56  ;;  %360 = vmatmul.bf16.vlgmr.msra.gmra.mxu2 %v3993_v0 }
  0x62   :  { %v52_v25 = vpop.permute.xlu2 %51 }
  0x63   :  { %vm66_vm6 = vcmp.eq.s32.totalorder %v52_v25, %v3148_v62  ;;  %v2607_v25 = vld [vmem:[#allocation2 + $0xe8] sm:$0xf0] }
  0x6a   :  { %v55_v26 = vpop.permute.xlu2 %54 }
  0x6b   :  { %vm67_vm7 = vcmp.eq.s32.totalorder %v55_v26, %v3148_v62  ;;  %v3238_v26 = vor.u32 %v2846_v22, %v2613_v18  ;;  %v2639_v18 = vld [vmem:[#allocation2 + $0x120] sm:$0xf]  ;;  %v2852_v22 = vld [vmem:[#allocation2 + $0x124] sm:$0xf0] }
  0x6c   :  { %vm2541_vm8 = vmpackc.low %vm67_vm7, %vm66_vm6  ;;  %vm348_vm6 = vcmask 523264  }
  0x6d   :  { %486 = vmatpush.bf16.msrb.mxu2 %v3238_v26 }
  0x79   :  { %v46_v8 = vpop.permute.xlu1 %45 }
  0x7a   :  { %v40_v60 = vpop.permute.xlu0 %39  ;;  %vm64_vm3 = vcmp.eq.s32.totalorder %v46_v8, %v3148_v62 }
  0x7b   :  { %vm62_vm1 = vcmp.eq.s32.totalorder %v40_v60, %v3148_v62 }
  0x81   :  { %v49_v21 = vpop.permute.xlu1 %48 }
  0x82   :  { %v43_v63 = vpop.permute.xlu0 %42  ;;  %vm65_vm4 = vcmp.eq.s32.totalorder %v49_v21, %v3148_v62  ;;  %v3236_v21 = vor.u32 %v2845_v15, %v2615_v17  ;;  %v2641_v15 = vld [vmem:[#allocation2 + $0x128] sm:$0xf0] }
  0x83   :  { %vm63_vm0 = vcmp.eq.s32.totalorder %v43_v63, %v3148_v62  ;;  %vm2539_vm5 = vmpackc.low %vm65_vm4, %vm64_vm3 }
  0x84   :  { %vm2537_vm2 = vmpackc.low %vm63_vm0, %vm62_vm1  ;;  %499 = vmatpush.bf16.msrb.mxu3 %v3236_v21 }
  0x85   :  { %2538 = vmatmul.msk.bf16.vlgmr.msra.gmra.mxu0 %vm2537_vm2, %v3098_v4  ;;  %2546 = vmatmul.msk.bf16.vlgmr.msra.gmra.mxu1 %vm2537_vm2, %v3098_v4 }
  0x89   :  { %v61_v27 = vpop.permute.xlu1 %60 }
  0x8a   :  { %v58_v28 = vpop.permute.xlu0 %57  ;;  %vm69_vm9 = vcmp.eq.s32.totalorder %v61_v27, %v3148_v62  ;;  %v2605_v27 = vld [vmem:[#allocation2 + $0xe0] sm:$0xf] }
  0x8b   :  { %vm68_vm10 = vcmp.eq.s32.totalorder %v58_v28, %v3148_v62  ;;  %v2844_v28 = vld [vmem:[#allocation2 + $0xe4] sm:$0xf0] }
  0x8c   :  { %vm2543_vm11 = vmpackc.low %vm69_vm9, %vm68_vm10 }
  0x95   :  { %2540 = vmatmul.msk.bf16.gmra.mxu0 %vm2539_vm5, %v3098_v4  ;;  %2548 = vmatmul.msk.bf16.gmra.mxu1 %vm2539_vm5, %v3098_v4 }
  0xa5   :  { %2542 = vmatmul.msk.bf16.gmra.mxu0 %vm2541_vm8, %v3098_v4  ;;  %2550 = vmatmul.msk.bf16.gmra.mxu1 %vm2541_vm8, %v3098_v4 }
  0xa8   :  { %v374_v32 = vpop.f32.mrf.mxu3 }
  0xa9   :  { %v361_v34 = vpop.f32.mrf.mxu2 }
  0xb0   :  { %v376_v35 = vpop.f32.mrf.mxu3 }
  0xb1   :  { %v363_v38 = vpop.f32.mrf.mxu2  ;;  %v2841_v35 = vld [vmem:[#allocation2 + $0xd4] sm:$0xf] }
  0xb2   :  { %v2599_v38 = vld [vmem:[#allocation2 + $0xd8] sm:$0xf0] }
  0xb5   :  { %2544 = vmatmul.msk.bf16.gmra.mxu0 %vm2543_vm11, %v3098_v4  ;;  %2552 = vmatmul.msk.bf16.gmra.mxu1 %vm2543_vm11, %v3098_v4 }
 0x102   :  { %v3181_v29 = vpop.f32.mrf.mxu1  ;;  %v3189_v36 = vpop.f32.mrf.mxu0 }
 0x103   :  { %3999 = vst [vmem:[#allocation5_spill] sm:$0xff] %v3181_v29 }
 0x104   :  { %4000 = vst [vmem:[#allocation6_spill] sm:$0xff] %v3189_v36 }
 0x10a   :  { %v3183_v30 = vpop.f32.mrf.mxu1  ;;  %v3195_v40 = vpop.f32.mrf.mxu0 }
 0x112   :  { %v3185_v31 = vpop.f32.mrf.mxu1  ;;  %v3200_v43 = vpop.f32.mrf.mxu0 }
 0x11a   :  { %v3187_v33 = vpop.f32.mrf.mxu1  ;;  %v3215_v49 = vpop.f32.mrf.mxu0 }
 0x122   :  { %v3191_v37 = vpop.f32.mrf.mxu1  ;;  %v3218_v51 = vpop.f32.mrf.mxu0 }
 0x12a   :  { %v3193_v39 = vpop.f32.mrf.mxu1  ;;  %v3220_v52 = vpop.f32.mrf.mxu0 }
 0x132   :  { %v3197_v41 = vpop.f32.mrf.mxu1  ;;  %v3222_v53 = vpop.f32.mrf.mxu0 }
 0x13a   :  { %v3202_v45 = vpop.f32.mrf.mxu1  ;;  %v3225_v55 = vpop.f32.mrf.mxu0 }
 0x13b   :  { %4001 = vst [vmem:[#allocation7_spill] sm:$0xff] %v3202_v45  ;;  %v307_v47 = vsel %vm3204_vm12, %v3181_v29, %v3202_v45  ;;  %v306_v57 = vsel %vm3227_vm13, %v3189_v36, %v3225_v55 }
 0x13c   :  { %v3212_v48 = vadd.f32 %v374_v32, %v307_v47  ;;  %4004 = vst [vmem:[#allocation8_spill] sm:$0xff] %v3225_v55  ;;  %v378_v58 = vadd.f32 %v361_v34, %v306_v57  ;;  %v3241_v32 = vor.u32 %v2843_v23, %v2607_v25  ;;  %v3244_v34 = vor.u32 %v2844_v28, %v2605_v27  ;;  %v2849_v27 = vld [vmem:[#allocation2 + $0x114] sm:$0xf]  ;;  %v2633_v28 = vld [vmem:[#allocation2 + $0x118] sm:$0xf0] }
 0x13d   :  { %v3247_v47 = vor.u32 %v2841_v35, %v2599_v38  ;;  %v3277_v25 = vor.u32 %v2852_v22, %v2639_v18  ;;  %v2631_v35 = vld [vmem:[#allocation2 + $0x110] sm:$0xf]  ;;  %v2850_v38 = vld [vmem:[#allocation2 + $0x114] sm:$0xf0] }
 0x13e   :  { %2872 = vtanh.f32 %v3212_v48  ;;  %v2585_v60 = vmul.f32 -1.442695, %v378_v58  ;;  %500 = vmatpush.bf16.msrb.mxu3 %v3241_v32  ;;  %487 = vmatpush.bf16.msrb.mxu2 %v3244_v34 }
 0x140   :  { %2874 = vpow2.f32 %v2585_v60 }
 0x142   :  { %501 = vmatpush.bf16.msrb.mxu3 %v3247_v47 }
 0x144   :  { %v2873_v50 = vpop.eup %2872 }
 0x145   :  { %421 = vrot.lane.b32.xlu2 %v2873_v50, %s3099_s0  ;;  %v3250_v50 = vor.u32 %v2842_v44, %v2597_v42  ;;  %v3281_v44 = vor.u32 %v2849_v27, %v2633_v28 }
 0x146   :  { %v2875_v61 = vpop.eup %2874 }
 0x147   :  { %v386_v63 = vadd.f32 1.0, %v2875_v61  ;;  %488 = vmatpush.bf16.msrb.mxu2 %v3250_v50  ;;  %v2586_v61 = vmul.f32 -1.442695, %v3212_v48  ;;  %v2649_v48 = vld [vmem:[#allocation2 + $0x138] sm:$0xf0] }
 0x149   :  { %2876 = vrcp.f32 %v386_v63  ;;  %v399_v6 = vand.u32 2147483648, %v386_v63  ;;  %vm393_vm15 = vweird.f32 %v386_v63  ;;  %v397_v7 = vand.u32 2147483647, %v386_v63 }
 0x14b   :  { %v400_v10 = vor.u32 1.1754944e-38, %v399_v6  ;;  %vm398_vm1 = vcmp.eq.f32.partialorder %v397_v7, 8.507059e+37  ;;  %v2840_v6 = vld [vmem:[#allocation2 + $0xc4] sm:$0xf0] }
 0x14f   :  { %v2877_v1 = vpop.eup %2876 }
 0x150   :  { %v389_v2 = vmul.f32 %v2877_v1, %v386_v63  ;;  %vm394_vm14 = vweird.f32 %v2877_v1 }
 0x151   :  { %vm395_vm0 = vmor %vm393_vm15, %vm394_vm14 }
 0x152   :  { %v390_v62 = vsub.f32 1.0, %v389_v2  ;;  %v2839_v2 = vld [vmem:[#allocation2 + $0xc4] sm:$0xf] }
 0x154   :  { %v391_v4 = vmul.f32 %v2877_v1, %v390_v62  ;;  %v2591_v62 = vld [vmem:[#allocation2 + $0xc8] sm:$0xf0] }
 0x156   :  { %v392_v5 = vadd.f32 %v2877_v1, %v391_v4  ;;  %v2589_v4 = vld [vmem:[#allocation2 + $0xc0] sm:$0xf] }
 0x157   :  { %v3263_v7 = vor.u32 %v2840_v6, %v2589_v4 }
 0x158   :  { %v396_v8 = vsel %vm395_vm0, %v2877_v1, %v392_v5  ;;  %v3261_v5 = vor.u32 %v2839_v2, %v2591_v62  ;;  %v2848_v2 = vld [vmem:[#allocation2 + $0x104] sm:$0xf0] }
 0x159   :  { %v401_v12 = vsel %vm398_vm1, %v400_v10, %v396_v8  ;;  %489 = vmatpush.bf16.msrb.mxu2 %v3263_v7  ;;  %v2853_v8 = vld [vmem:[#allocation2 + $0x134] sm:$0xf]  ;;  %v2647_v10 = vld [vmem:[#allocation2 + $0x130] sm:$0xf] }
 0x15a   :  { %v419_v54 = vmul.f32 0.0, %v401_v12  ;;  %502 = vmatpush.bf16.msrb.mxu3 %v3261_v5 }
 0x19f   :  { %v422_v11 = vpop.permute.xlu2 %421 }
 0x1a0   :  { %v424_v14 = vmul.f32 %v422_v11, %v401_v12  ;;  %v3268_v11 = vor.u32 %v2853_v8, %v2649_v48  ;;  %v2854_v12 = vld [vmem:[#allocation2 + $0x134] sm:$0xf0] }
 0x1a1   :  { %v3270_v17 = vor.u32 %v2854_v12, %v2647_v10 }
 0x1a2   :  { %426 = vrot.lane.b32.xlu0 %v424_v14, %s3099_s0  ;;  %v2851_v14 = vld [vmem:[#allocation2 + $0x124] sm:$0xf]  ;;  %565 = vmatpush.bf16.msra.mxu3 %v3268_v11 }
 0x1a3   :  { %v3273_v23 = vor.u32 %v2851_v14, %v2641_v15  ;;  %707 = vmatpush.bf16.msrb.mxu1 %v3268_v11  ;;  %552 = vmatpush.bf16.msra.mxu2 %v3270_v17 }
 0x1a4   :  { %694 = vmatpush.bf16.msrb.mxu0 %v3270_v17 }
 0x1a6   :  { %566 = vmatpush.bf16.msra.mxu3 %v3273_v23 }
 0x1a7   :  { %708 = vmatpush.bf16.msrb.mxu1 %v3273_v23  ;;  %553 = vmatpush.bf16.msra.mxu2 %v3277_v25 }
 0x1a8   :  { %695 = vmatpush.bf16.msrb.mxu0 %v3277_v25 }
 0x1aa   :  { %567 = vmatpush.bf16.msra.mxu3 %v3281_v44 }
 0x1ab   :  { %709 = vmatpush.bf16.msrb.mxu1 %v3281_v44 }
 0x214   :  { %v427_v57 = vpop.permute.xlu0 %426 }
 0x215   :  { %v3254_v58 = vadd.f32 %v427_v57, %v419_v54  ;;  %v3285_v54 = vor.u32 %v2850_v38, %v2631_v35  ;;  %v2847_v57 = vld [vmem:[#allocation2 + $0x104] sm:$0xf] }
 0x217   :  { %2878 = vtanh.f32 %v3254_v58  ;;  %554 = vmatpush.bf16.msra.mxu2 %v3285_v54  ;;  %696 = vmatpush.bf16.msrb.mxu0 %v3285_v54 }
 0x218   :  { %2880 = vpow2.f32 %v2586_v61 }
 0x21d   :  { %v2879_v60 = vpop.eup %2878 }
 0x21e   :  { %432 = vrot.lane.b32.xlu1 %v2879_v60, %s3099_s0  ;;  %v2881_v63 = vpop.eup %2880  ;;  %v2625_v60 = vld [vmem:[#allocation2 + $0x108] sm:$0xf0] }
 0x21f   :  { %v3259_v1 = vadd.f32 1.0, %v2881_v63  ;;  %v2623_v63 = vld [vmem:[#allocation2 + $0x100] sm:$0xf]  ;;  %v3290_v62 = vor.u32 %v2847_v57, %v2625_v60 }
 0x220   :  { %v3294_v4 = vor.u32 %v2848_v2, %v2623_v63  ;;  %v574_v2 = vsel %vm3227_vm13, %v3195_v40, %v3222_v53 }
 0x221   :  { %2882 = vrcp.f32 %v3259_v1  ;;  %568 = vmatpush.bf16.msra.mxu3 %v3290_v62  ;;  %710 = vmatpush.bf16.msrb.mxu1 %v3290_v62  ;;  %v414_v10 = vand.u32 2147483648, %v3259_v1  ;;  %vm408_vm3 = vweird.f32 %v3259_v1  ;;  %v412_v12 = vand.u32 2147483647, %v3259_v1 }
 0x222   :  { %555 = vmatpush.bf16.msra.mxu2 %v3294_v4  ;;  %697 = vmatpush.bf16.msrb.mxu0 %v3294_v4 }
 0x223   :  { %v415_v15 = vor.u32 1.1754944e-38, %v414_v10  ;;  %vm413_vm5 = vcmp.eq.f32.partialorder %v412_v12, 8.507059e+37 }
 0x225   :  { %823 = vmatpush.bf16.msra.mxu1 %v3236_v21 }
 0x226   :  { %810 = vmatpush.bf16.msra.mxu0 %v3238_v26 }
 0x227   :  { %v2883_v42 = vpop.eup %2882 }
 0x228   :  { %v404_v61 = vmul.f32 %v2883_v42, %v3259_v1  ;;  %vm409_vm2 = vweird.f32 %v2883_v42 }
 0x229   :  { %824 = vmatpush.bf16.msra.mxu1 %v3241_v32  ;;  %vm410_vm4 = vmor %vm408_vm3, %vm409_vm2 }
 0x22a   :  { %v405_v6 = vsub.f32 1.0, %v404_v61  ;;  %811 = vmatpush.bf16.msra.mxu0 %v3244_v34 }
 0x22c   :  { %v406_v8 = vmul.f32 %v2883_v42, %v405_v6 }
 0x22d   :  { %825 = vmatpush.bf16.msra.mxu1 %v3247_v47 }
 0x22e   :  { %v407_v48 = vadd.f32 %v2883_v42, %v406_v8  ;;  %812 = vmatpush.bf16.msra.mxu0 %v3250_v50  ;;  %v575_v8 = vsel %vm3204_vm12, %v3183_v30, %v3197_v41 }
 0x230   :  { %v411_v14 = vsel %vm410_vm4, %v2883_v42, %v407_v48 }
 0x231   :  { %v416_v18 = vsel %vm413_vm5, %v415_v15, %v411_v14  ;;  %826 = vmatpush.bf16.msra.mxu1 %v3261_v5 }
 0x232   :  { %813 = vmatpush.bf16.msra.mxu0 %v3263_v7 }
 0x290   :  { %v433_v22 = vpop.permute.xlu1 %432 }
 0x291   :  { %v435_v27 = vmul.f32 %v433_v22, %v416_v18 }
 0x293   :  { %v436_v28 = vpack.c.bf16 %v435_v27, %v435_v27 }
 0x295   :  { %2619 = vmatmul.msk.bf16.vlgmr.msrb.gmra.mxu2 %vm348_vm6, %v436_v28  ;;  %2620 = vmatmul.msk.bf16.vlgmr.msrb.gmra.mxu3 %vm348_vm6, %v436_v28 }
 0x296   :  { %593 = vmatpush.bf16.msrb.mxu3 %v3145_v59  ;;  %580 = vmatpush.bf16.msrb.mxu2 %v3155_v9 }
 0x29a   :  { %594 = vmatpush.bf16.msrb.mxu3 %v3152_v3  ;;  %581 = vmatpush.bf16.msrb.mxu2 %v3160_v16 }
 0x29e   :  { %595 = vmatpush.bf16.msrb.mxu3 %v3157_v13  ;;  %582 = vmatpush.bf16.msrb.mxu2 %v3166_v20 }
 0x2a2   :  { %596 = vmatpush.bf16.msrb.mxu3 %v3163_v19  ;;  %583 = vmatpush.bf16.msrb.mxu2 %v3173_v24 }
 0x2a5   :  { %2653 = vmatmul.msk.bf16.vlgmr.msra.gmra.mxu2 %vm348_vm6, %v436_v28  ;;  %2654 = vmatmul.msk.bf16.vlgmr.msra.gmra.mxu3 %vm348_vm6, %v436_v28 }
 0x2a6   :  { %681 = vmatpush.bf16.msra.mxu3 %v3236_v21  ;;  %668 = vmatpush.bf16.msra.mxu2 %v3238_v26 }
 0x2aa   :  { %682 = vmatpush.bf16.msra.mxu3 %v3241_v32  ;;  %669 = vmatpush.bf16.msra.mxu2 %v3244_v34 }
 0x2ae   :  { %683 = vmatpush.bf16.msra.mxu3 %v3247_v47  ;;  %670 = vmatpush.bf16.msra.mxu2 %v3250_v50 }
 0x2b2   :  { %684 = vmatpush.bf16.msra.mxu3 %v3261_v5  ;;  %671 = vmatpush.bf16.msra.mxu2 %v3263_v7 }
 0x2b5   :  { %2655 = vmatmul.msk.bf16.vlgmr.msrb.gmra.mxu2 %vm348_vm6, %v436_v28  ;;  %2656 = vmatmul.msk.bf16.vlgmr.msrb.gmra.mxu3 %vm348_vm6, %v436_v28 }
 0x2b6   :  { %735 = vmatpush.bf16.msrb.mxu3 %v3145_v59  ;;  %722 = vmatpush.bf16.msrb.mxu2 %v3155_v9 }
 0x2ba   :  { %736 = vmatpush.bf16.msrb.mxu3 %v3152_v3  ;;  %723 = vmatpush.bf16.msrb.mxu2 %v3160_v16 }
 0x2be   :  { %737 = vmatpush.bf16.msrb.mxu3 %v3157_v13  ;;  %724 = vmatpush.bf16.msrb.mxu2 %v3166_v20 }
 0x2c2   :  { %738 = vmatpush.bf16.msrb.mxu3 %v3163_v19  ;;  %725 = vmatpush.bf16.msrb.mxu2 %v3173_v24 }
 0x318   :  { %v3342_v1 = vpop.f32.mrf.mxu2  ;;  %v3344_v35 = vpop.f32.mrf.mxu3 }
 0x319   :  { %4007 = vst [vmem:[#allocation9_spill] sm:$0xff] %v3342_v1 }
 0x31a   :  { %4008 = vst [vmem:[#allocation10_spill] sm:$0xff] %v3344_v35 }
 0x320   :  { %v493_v38 = vpop.f32.mrf.mxu2  ;;  %v506_v42 = vpop.f32.mrf.mxu3 }
 0x328   :  { %v3346_v57 = vpop.f32.mrf.mxu2  ;;  %v3348_v60 = vpop.f32.mrf.mxu3 }
 0x329   :  { %4009 = vst [vmem:[#allocation11_spill] sm:$0xff] %v3346_v57 }
 0x32a   :  { %4010 = vst [vmem:[#allocation12_spill] sm:$0xff] %v3348_v60 }
 0x330   :  { %v559_v61 = vpop.f32.mrf.mxu2  ;;  %v572_v63 = vpop.f32.mrf.mxu3 }
 0x338   :  { %v585_v6 = vpop.f32.mrf.mxu2  ;;  %v598_v48 = vpop.f32.mrf.mxu3 }
 0x339   :  { %v602_v10 = vadd.f32 %v585_v6, %v574_v2  ;;  %v603_v12 = vadd.f32 %v598_v48, %v575_v8 }
 0x33b   :  { %2884 = vtanh.f32 %v603_v12  ;;  %v2657_v22 = vmul.f32 -1.442695, %v602_v10 }
 0x33d   :  { %2886 = vpow2.f32 %v2657_v22 }
 0x340   :  { %v587_v14 = vpop.f32.mrf.mxu2  ;;  %v600_v15 = vpop.f32.mrf.mxu3 }
 0x341   :  { %v2885_v18 = vpop.eup %2884 }
 0x342   :  { %645 = vrot.lane.b32.xlu2 %v2885_v18, %s3099_s0 }
 0x343   :  { %v2887_v27 = vpop.eup %2886 }
 0x344   :  { %v610_v28 = vadd.f32 1.0, %v2887_v27 }
 0x346   :  { %2888 = vrcp.f32 %v610_v28  ;;  %v623_v60 = vand.u32 2147483648, %v610_v28  ;;  %vm617_vm8 = vweird.f32 %v610_v28  ;;  %v621_v2 = vand.u32 2147483647, %v610_v28 }
 0x348   :  { %v624_v8 = vor.u32 1.1754944e-38, %v623_v60  ;;  %vm622_vm10 = vcmp.eq.f32.partialorder %v621_v2, 8.507059e+37 }
 0x34c   :  { %v2889_v38 = vpop.eup %2888 }
 0x34d   :  { %v613_v42 = vmul.f32 %v2889_v38, %v610_v28  ;;  %vm618_vm7 = vweird.f32 %v2889_v38  ;;  %v2658_v28 = vmul.f32 -1.442695, %v603_v12 }
 0x34e   :  { %vm619_vm9 = vmor %vm617_vm8, %vm618_vm7 }
 0x34f   :  { %v614_v61 = vsub.f32 1.0, %v613_v42 }
 0x351   :  { %v615_v63 = vmul.f32 %v2889_v38, %v614_v61 }
 0x353   :  { %v616_v0 = vadd.f32 %v2889_v38, %v615_v63 }
 0x355   :  { %v620_v6 = vsel %vm619_vm9, %v2889_v38, %v616_v0 }
 0x356   :  { %v625_v14 = vsel %vm622_vm10, %v624_v8, %v620_v6 }
 0x357   :  { %v643_v15 = vmul.f32 %v625_v14, %v3254_v58 }
 0x39c   :  { %v646_v48 = vpop.permute.xlu2 %645 }
 0x39d   :  { %v648_v10 = vmul.f32 %v646_v48, %v625_v14 }
 0x39f   :  { %650 = vrot.lane.b32.xlu0 %v648_v10, %s3099_s0 }
 0x411   :  { %v651_v18 = vpop.permute.xlu0 %650 }
 0x412   :  { %v3361_v22 = vadd.f32 %v651_v18, %v643_v15 }
 0x414   :  { %2890 = vtanh.f32 %v3361_v22 }
 0x415   :  { %2892 = vpow2.f32 %v2658_v28 }
 0x41a   :  { %v2891_v27 = vpop.eup %2890 }
 0x41b   :  { %656 = vrot.lane.b32.xlu1 %v2891_v27, %s3099_s0  ;;  %v2893_v0 = vpop.eup %2892 }
 0x41c   :  { %v611_v60 = vadd.f32 1.0, %v2893_v0 }
 0x41e   :  { %2894 = vrcp.f32 %v611_v60  ;;  %v638_v58 = vand.u32 2147483648, %v611_v60  ;;  %vm632_vm14 = vweird.f32 %v611_v60  ;;  %v636_v6 = vand.u32 2147483647, %v611_v60 }
 0x420   :  { %v639_v48 = vor.u32 1.1754944e-38, %v638_v58  ;;  %vm637_vm0 = vcmp.eq.f32.partialorder %v636_v6, 8.507059e+37  ;;  %v717_v58 = vsel %vm3204_vm12, %v3185_v31, %v3193_v39 }
 0x424   :  { %v2895_v38 = vpop.eup %2894 }
 0x425   :  { %v628_v42 = vmul.f32 %v2895_v38, %v611_v60  ;;  %vm633_vm11 = vweird.f32 %v2895_v38 }
 0x426   :  { %vm634_vm15 = vmor %vm632_vm14, %vm633_vm11 }
 0x427   :  { %v629_v61 = vsub.f32 1.0, %v628_v42 }
 0x429   :  { %v630_v63 = vmul.f32 %v2895_v38, %v629_v61 }
 0x42b   :  { %v631_v2 = vadd.f32 %v2895_v38, %v630_v63  ;;  %v716_v63 = vsel %vm3227_vm13, %v3200_v43, %v3220_v52 }
 0x42d   :  { %v635_v8 = vsel %vm634_vm15, %v2895_v38, %v631_v2 }
 0x42e   :  { %v640_v14 = vsel %vm637_vm0, %v639_v48, %v635_v8 }
 0x48d   :  { %v657_v10 = vpop.permute.xlu1 %656 }
 0x48e   :  { %v659_v12 = vmul.f32 %v657_v10, %v640_v14 }
 0x490   :  { %v660_v15 = vpack.c.bf16 %v659_v12, %v659_v12 }
 0x492   :  { %2659 = vmatmul.msk.bf16.vlgmr.msra.gmra.mxu2 %vm348_vm6, %v660_v15  ;;  %2660 = vmatmul.msk.bf16.vlgmr.msra.gmra.mxu3 %vm348_vm6, %v660_v15 }
 0x493   :  { %2661 = vmatmul.msk.bf16.vlgmr.msrb.gmra.mxu0 %vm348_vm6, %v660_v15  ;;  %2662 = vmatmul.msk.bf16.vlgmr.msrb.gmra.mxu1 %vm348_vm6, %v660_v15 }
 0x494   :  { %836 = vmatpush.bf16.msra.mxu2 %v3270_v17  ;;  %849 = vmatpush.bf16.msra.mxu3 %v3268_v11 }
 0x495   :  { %877 = vmatpush.bf16.msrb.mxu1 %v3145_v59  ;;  %864 = vmatpush.bf16.msrb.mxu0 %v3155_v9 }
 0x498   :  { %837 = vmatpush.bf16.msra.mxu2 %v3277_v25  ;;  %850 = vmatpush.bf16.msra.mxu3 %v3273_v23 }
 0x499   :  { %878 = vmatpush.bf16.msrb.mxu1 %v3152_v3  ;;  %865 = vmatpush.bf16.msrb.mxu0 %v3160_v16 }
 0x49c   :  { %838 = vmatpush.bf16.msra.mxu2 %v3285_v54  ;;  %851 = vmatpush.bf16.msra.mxu3 %v3281_v44 }
 0x49d   :  { %879 = vmatpush.bf16.msrb.mxu1 %v3157_v13  ;;  %866 = vmatpush.bf16.msrb.mxu0 %v3166_v20 }
 0x4a0   :  { %839 = vmatpush.bf16.msra.mxu2 %v3294_v4  ;;  %852 = vmatpush.bf16.msra.mxu3 %v3290_v62 }
 0x4a1   :  { %880 = vmatpush.bf16.msrb.mxu1 %v3163_v19  ;;  %867 = vmatpush.bf16.msrb.mxu0 %v3173_v24 }
 0x4a2   :  { %2663 = vmatmul.msk.bf16.vlgmr.msrb.gmra.mxu2 %vm348_vm6, %v660_v15  ;;  %2664 = vmatmul.msk.bf16.vlgmr.msrb.gmra.mxu3 %vm348_vm6, %v660_v15 }
 0x4a4   :  { %965 = vmatpush.bf16.msrb.mxu3 %v3236_v21  ;;  %952 = vmatpush.bf16.msrb.mxu2 %v3238_v26 }
 0x4a8   :  { %966 = vmatpush.bf16.msrb.mxu3 %v3241_v32  ;;  %953 = vmatpush.bf16.msrb.mxu2 %v3244_v34 }
 0x4ac   :  { %967 = vmatpush.bf16.msrb.mxu3 %v3247_v47  ;;  %954 = vmatpush.bf16.msrb.mxu2 %v3250_v50 }
 0x4b0   :  { %968 = vmatpush.bf16.msrb.mxu3 %v3261_v5  ;;  %955 = vmatpush.bf16.msrb.mxu2 %v3263_v7 }
 0x510   :  { %v3395_v18 = vpop.f32.mrf.mxu0  ;;  %v3397_v27 = vpop.f32.mrf.mxu1 }
 0x511   :  { %4011 = vst [vmem:[#allocation13_spill] sm:$0xff] %v3395_v18 }
 0x512   :  { %4012 = vst [vmem:[#allocation14_spill] sm:$0xff] %v3397_v27 }
 0x515   :  { %v3399_v28 = vpop.f32.mrf.mxu2  ;;  %v3401_v0 = vpop.f32.mrf.mxu3 }
 0x518   :  { %v701_v60 = vpop.f32.mrf.mxu0  ;;  %v714_v38 = vpop.f32.mrf.mxu1 }
 0x51d   :  { %v675_v42 = vpop.f32.mrf.mxu2  ;;  %v688_v61 = vpop.f32.mrf.mxu3 }
 0x525   :  { %v727_v2 = vpop.f32.mrf.mxu2  ;;  %v740_v6 = vpop.f32.mrf.mxu3 }
 0x526   :  { %v744_v8 = vadd.f32 %v727_v2, %v716_v63  ;;  %v745_v48 = vadd.f32 %v740_v6, %v717_v58 }
 0x528   :  { %2896 = vtanh.f32 %v745_v48  ;;  %v2665_v15 = vmul.f32 -1.442695, %v744_v8 }
 0x52a   :  { %2898 = vpow2.f32 %v2665_v15 }
 0x52d   :  { %v729_v14 = vpop.f32.mrf.mxu2  ;;  %v742_v10 = vpop.f32.mrf.mxu3 }
 0x52e   :  { %v2897_v12 = vpop.eup %2896 }
 0x52f   :  { %787 = vrot.lane.b32.xlu2 %v2897_v12, %s3099_s0 }
 0x530   :  { %v2899_v60 = vpop.eup %2898 }
 0x531   :  { %v752_v38 = vadd.f32 1.0, %v2899_v60 }
 0x533   :  { %2900 = vrcp.f32 %v752_v38  ;;  %v765_v45 = vand.u32 2147483648, %v752_v38  ;;  %vm759_vm2 = vweird.f32 %v752_v38  ;;  %v763_v63 = vand.u32 2147483647, %v752_v38 }
 0x535   :  { %v766_v58 = vor.u32 1.1754944e-38, %v765_v45  ;;  %vm764_vm4 = vcmp.eq.f32.partialorder %v763_v63, 8.507059e+37 }
 0x539   :  { %v2901_v42 = vpop.eup %2900 }
 0x53a   :  { %v755_v61 = vmul.f32 %v2901_v42, %v752_v38  ;;  %vm760_vm1 = vweird.f32 %v2901_v42 }
 0x53b   :  { %vm761_vm3 = vmor %vm759_vm2, %vm760_vm1 }
 0x53c   :  { %v756_v57 = vsub.f32 1.0, %v755_v61 }
 0x53e   :  { %v757_v35 = vmul.f32 %v2901_v42, %v756_v57  ;;  %v2666_v57 = vmul.f32 -1.442695, %v745_v48 }
 0x540   :  { %v758_v1 = vadd.f32 %v2901_v42, %v757_v35 }
 0x542   :  { %v762_v2 = vsel %vm761_vm3, %v2901_v42, %v758_v1 }
 0x543   :  { %v767_v14 = vsel %vm764_vm4, %v766_v58, %v762_v2 }
 0x544   :  { %v785_v10 = vmul.f32 %v767_v14, %v3361_v22 }
 0x589   :  { %v788_v6 = vpop.permute.xlu2 %787 }
 0x58a   :  { %v790_v8 = vmul.f32 %v788_v6, %v767_v14 }
 0x58c   :  { %792 = vrot.lane.b32.xlu0 %v790_v8, %s3099_s0 }
 0x5fe   :  { %v793_v12 = vpop.permute.xlu0 %792 }
 0x5ff   :  { %v3414_v15 = vadd.f32 %v793_v12, %v785_v10 }
 0x601   :  { %2902 = vtanh.f32 %v3414_v15 }
 0x602   :  { %2904 = vpow2.f32 %v2666_v57 }
 0x607   :  { %v2903_v35 = vpop.eup %2902 }
 0x608   :  { %798 = vrot.lane.b32.xlu1 %v2903_v35, %s3099_s0  ;;  %v2905_v1 = vpop.eup %2904 }
 0x609   :  { %v753_v45 = vadd.f32 1.0, %v2905_v1 }
 0x60b   :  { %2906 = vrcp.f32 %v753_v45  ;;  %v780_v22 = vand.u32 2147483648, %v753_v45  ;;  %vm774_vm7 = vweird.f32 %v753_v45  ;;  %v778_v2 = vand.u32 2147483647, %v753_v45 }
 0x60d   :  { %v781_v6 = vor.u32 1.1754944e-38, %v780_v22  ;;  %vm779_vm9 = vcmp.eq.f32.partialorder %v778_v2, 8.507059e+37  ;;  %v859_v22 = vsel %vm3204_vm12, %v3187_v33, %v3191_v37 }
 0x611   :  { %v2907_v60 = vpop.eup %2906 }
 0x612   :  { %v770_v38 = vmul.f32 %v2907_v60, %v753_v45  ;;  %vm775_vm5 = vweird.f32 %v2907_v60 }
 0x613   :  { %vm776_vm8 = vmor %vm774_vm7, %vm775_vm5 }
 0x614   :  { %v771_v42 = vsub.f32 1.0, %v770_v38 }
 0x616   :  { %v772_v61 = vmul.f32 %v2907_v60, %v771_v42 }
 0x618   :  { %v773_v63 = vadd.f32 %v2907_v60, %v772_v61  ;;  %v858_v61 = vsel %vm3227_vm13, %v3215_v49, %v3218_v51 }
 0x61a   :  { %v777_v58 = vsel %vm776_vm8, %v2907_v60, %v773_v63 }
 0x61b   :  { %v782_v14 = vsel %vm779_vm9, %v781_v6, %v777_v58 }
 0x67a   :  { %v799_v8 = vpop.permute.xlu1 %798 }
 0x67b   :  { %v801_v48 = vmul.f32 %v799_v8, %v782_v14 }
 0x67d   :  { %v802_v10 = vpack.c.bf16 %v801_v48, %v801_v48 }
 0x67f   :  { %2667 = vmatmul.msk.bf16.vlgmr.msra.gmra.mxu0 %vm348_vm6, %v802_v10  ;;  %2668 = vmatmul.msk.bf16.vlgmr.msra.gmra.mxu1 %vm348_vm6, %v802_v10 }
 0x680   :  { %2669 = vmatmul.msk.bf16.vlgmr.msra.gmra.mxu2 %vm348_vm6, %v802_v10  ;;  %2670 = vmatmul.msk.bf16.vlgmr.msra.gmra.mxu3 %vm348_vm6, %v802_v10 }
 0x681   :  { %978 = vmatpush.bf16.msra.mxu0 %v3270_v17  ;;  %991 = vmatpush.bf16.msra.mxu1 %v3268_v11 }
 0x682   :  { %1019 = vmatpush.bf16.msra.mxu3 %v3145_v59  ;;  %1006 = vmatpush.bf16.msra.mxu2 %v3155_v9 }
 0x685   :  { %979 = vmatpush.bf16.msra.mxu0 %v3277_v25  ;;  %992 = vmatpush.bf16.msra.mxu1 %v3273_v23 }
 0x686   :  { %1020 = vmatpush.bf16.msra.mxu3 %v3152_v3  ;;  %1007 = vmatpush.bf16.msra.mxu2 %v3160_v16 }
 0x689   :  { %980 = vmatpush.bf16.msra.mxu0 %v3285_v54  ;;  %993 = vmatpush.bf16.msra.mxu1 %v3281_v44 }
 0x68a   :  { %1021 = vmatpush.bf16.msra.mxu3 %v3157_v13  ;;  %1008 = vmatpush.bf16.msra.mxu2 %v3166_v20 }
 0x68d   :  { %981 = vmatpush.bf16.msra.mxu0 %v3294_v4  ;;  %994 = vmatpush.bf16.msra.mxu1 %v3290_v62 }
 0x68e   :  { %1022 = vmatpush.bf16.msra.mxu3 %v3163_v19  ;;  %1009 = vmatpush.bf16.msra.mxu2 %v3173_v24 }
 0x68f   :  { %2671 = vmatmul.msk.bf16.vlgmr.msrb.gmra.mxu0 %vm348_vm6, %v802_v10  ;;  %2672 = vmatmul.msk.bf16.vlgmr.msrb.gmra.mxu1 %vm348_vm6, %v802_v10 }
 0x691   :  { %1107 = vmatpush.bf16.msrb.mxu1 %v3236_v21  ;;  %1094 = vmatpush.bf16.msrb.mxu0 %v3238_v26 }
 0x695   :  { %1108 = vmatpush.bf16.msrb.mxu1 %v3241_v32  ;;  %1095 = vmatpush.bf16.msrb.mxu0 %v3244_v34 }
 0x699   :  { %1109 = vmatpush.bf16.msrb.mxu1 %v3247_v47  ;;  %1096 = vmatpush.bf16.msrb.mxu0 %v3250_v50 }
 0x69d   :  { %1110 = vmatpush.bf16.msrb.mxu1 %v3261_v5  ;;  %1097 = vmatpush.bf16.msrb.mxu0 %v3263_v7 }
 0x6fc   :  { %v3448_v12 = vpop.f32.mrf.mxu0  ;;  %v3450_v35 = vpop.f32.mrf.mxu1 }
 0x703   :  { %v3452_v57 = vpop.f32.mrf.mxu2  ;;  %v3454_v1 = vpop.f32.mrf.mxu3 }
 0x704   :  { %v817_v45 = vpop.f32.mrf.mxu0  ;;  %v830_v60 = vpop.f32.mrf.mxu1 }
 0x70b   :  { %v843_v38 = vpop.f32.mrf.mxu2  ;;  %v856_v42 = vpop.f32.mrf.mxu3 }
 0x70c   :  { %v869_v63 = vpop.f32.mrf.mxu0  ;;  %v882_v2 = vpop.f32.mrf.mxu1 }
 0x70d   :  { %v886_v58 = vadd.f32 %v869_v63, %v858_v61  ;;  %v887_v6 = vadd.f32 %v882_v2, %v859_v22 }
 0x70f   :  { %2908 = vtanh.f32 %v887_v6  ;;  %v2673_v10 = vmul.f32 -1.442695, %v886_v58 }
 0x711   :  { %2910 = vpow2.f32 %v2673_v10 }
 0x714   :  { %v871_v14 = vpop.f32.mrf.mxu0  ;;  %v884_v8 = vpop.f32.mrf.mxu1 }
 0x715   :  { %v2909_v48 = vpop.eup %2908 }
 0x716   :  { %929 = vrot.lane.b32.xlu2 %v2909_v48, %s3099_s0 }
 0x717   :  { %v2911_v45 = vpop.eup %2910 }
 0x718   :  { %v894_v60 = vadd.f32 1.0, %v2911_v45 }
 0x71a   :  { %2912 = vrcp.f32 %v894_v60  ;;  %v907_v27 = vand.u32 2147483648, %v894_v60  ;;  %vm901_vm11 = vweird.f32 %v894_v60  ;;  %v905_v61 = vand.u32 2147483647, %v894_v60 }
 0x71c   :  { %v908_v22 = vor.u32 1.1754944e-38, %v907_v27  ;;  %vm906_vm15 = vcmp.eq.f32.partialorder %v905_v61, 8.507059e+37 }
 0x720   :  { %v2913_v38 = vpop.eup %2912 }
 0x721   :  { %v897_v42 = vmul.f32 %v2913_v38, %v894_v60  ;;  %vm902_vm10 = vweird.f32 %v2913_v38 }
 0x722   :  { %vm903_vm14 = vmor %vm901_vm11, %vm902_vm10 }
 0x723   :  { %v898_v29 = vsub.f32 1.0, %v897_v42 }
 0x725   :  { %v899_v55 = vmul.f32 %v2913_v38, %v898_v29 }
 0x727   :  { %v900_v36 = vadd.f32 %v2913_v38, %v899_v55  ;;  %v2674_v55 = vmul.f32 -1.442695, %v887_v6 }
 0x729   :  { %v904_v63 = vsel %vm903_vm14, %v2913_v38, %v900_v36 }
 0x72a   :  { %v909_v14 = vsel %vm906_vm15, %v908_v22, %v904_v63 }
 0x72b   :  { %v927_v8 = vmul.f32 %v909_v14, %v3414_v15 }
 0x770   :  { %v930_v2 = vpop.permute.xlu2 %929 }
 0x771   :  { %v932_v58 = vmul.f32 %v930_v2, %v909_v14 }
 0x773   :  { %934 = vrot.lane.b32.xlu0 %v932_v58, %s3099_s0 }
 0x7e5   :  { %v935_v48 = vpop.permute.xlu0 %934 }
 0x7e6   :  { %v3467_v10 = vadd.f32 %v935_v48, %v927_v8 }
 0x7e8   :  { %2914 = vtanh.f32 %v3467_v10 }
 0x7e9   :  { %2916 = vpow2.f32 %v2674_v55 }
 0x7ee   :  { %v2915_v29 = vpop.eup %2914 }
 0x7ef   :  { %940 = vrot.lane.b32.xlu1 %v2915_v29, %s3099_s0  ;;  %v2917_v36 = vpop.eup %2916 }
 0x7f0   :  { %v895_v27 = vadd.f32 1.0, %v2917_v36 }
 0x7f2   :  { %2918 = vrcp.f32 %v895_v27  ;;  %v922_v15 = vand.u32 2147483648, %v895_v27  ;;  %vm916_vm1 = vweird.f32 %v895_v27  ;;  %v920_v63 = vand.u32 2147483647, %v895_v27 }
 0x7f4   :  { %v923_v2 = vor.u32 1.1754944e-38, %v922_v15  ;;  %vm921_vm3 = vcmp.eq.f32.partialorder %v920_v63, 8.507059e+37  ;;  %v1001_v15 = vsel %vm3204_vm12, %v3191_v37, %v3187_v33 }
 0x7f8   :  { %v2919_v45 = vpop.eup %2918 }
 0x7f9   :  { %v912_v60 = vmul.f32 %v2919_v45, %v895_v27  ;;  %vm917_vm0 = vweird.f32 %v2919_v45 }
 0x7fa   :  { %vm918_vm2 = vmor %vm916_vm1, %vm917_vm0 }
 0x7fb   :  { %v913_v38 = vsub.f32 1.0, %v912_v60 }
 0x7fd   :  { %v914_v42 = vmul.f32 %v2919_v45, %v913_v38 }
 0x7ff   :  { %v915_v61 = vadd.f32 %v2919_v45, %v914_v42  ;;  %v1000_v42 = vsel %vm3227_vm13, %v3218_v51, %v3215_v49 }
 0x801   :  { %v919_v22 = vsel %vm918_vm2, %v2919_v45, %v915_v61 }
 0x802   :  { %v924_v14 = vsel %vm921_vm3, %v923_v2, %v919_v22 }
 0x861   :  { %v941_v58 = vpop.permute.xlu1 %940 }
 0x862   :  { %v943_v6 = vmul.f32 %v941_v58, %v924_v14 }
 0x864   :  { %v944_v8 = vpack.c.bf16 %v943_v6, %v943_v6 }
 0x866   :  { %2675 = vmatmul.msk.bf16.vlgmr.msrb.gmra.mxu2 %vm348_vm6, %v944_v8  ;;  %2676 = vmatmul.msk.bf16.vlgmr.msrb.gmra.mxu3 %vm348_vm6, %v944_v8 }
 0x867   :  { %2677 = vmatmul.msk.bf16.vlgmr.msra.gmra.mxu0 %vm348_vm6, %v944_v8  ;;  %2678 = vmatmul.msk.bf16.vlgmr.msra.gmra.mxu1 %vm348_vm6, %v944_v8 }
 0x868   :  { %1120 = vmatpush.bf16.msrb.mxu2 %v3270_v17  ;;  %1133 = vmatpush.bf16.msrb.mxu3 %v3268_v11 }
 0x869   :  { %1161 = vmatpush.bf16.msra.mxu1 %v3145_v59  ;;  %1148 = vmatpush.bf16.msra.mxu0 %v3155_v9 }
 0x86c   :  { %1121 = vmatpush.bf16.msrb.mxu2 %v3277_v25  ;;  %1134 = vmatpush.bf16.msrb.mxu3 %v3273_v23 }
 0x86d   :  { %1162 = vmatpush.bf16.msra.mxu1 %v3152_v3  ;;  %1149 = vmatpush.bf16.msra.mxu0 %v3160_v16 }
 0x870   :  { %1122 = vmatpush.bf16.msrb.mxu2 %v3285_v54  ;;  %1135 = vmatpush.bf16.msrb.mxu3 %v3281_v44 }
 0x871   :  { %1163 = vmatpush.bf16.msra.mxu1 %v3157_v13  ;;  %1150 = vmatpush.bf16.msra.mxu0 %v3166_v20 }
 0x874   :  { %1123 = vmatpush.bf16.msrb.mxu2 %v3294_v4  ;;  %1136 = vmatpush.bf16.msrb.mxu3 %v3290_v62 }
 0x875   :  { %1164 = vmatpush.bf16.msra.mxu1 %v3163_v19  ;;  %1151 = vmatpush.bf16.msra.mxu0 %v3173_v24 }
 0x876   :  { %2679 = vmatmul.msk.bf16.vlgmr.msra.gmra.mxu2 %vm348_vm6, %v944_v8  ;;  %2680 = vmatmul.msk.bf16.vlgmr.msra.gmra.mxu3 %vm348_vm6, %v944_v8 }
 0x878   :  { %1249 = vmatpush.bf16.msra.mxu3 %v3236_v21  ;;  %1236 = vmatpush.bf16.msra.mxu2 %v3238_v26 }
 0x87c   :  { %1250 = vmatpush.bf16.msra.mxu3 %v3241_v32  ;;  %1237 = vmatpush.bf16.msra.mxu2 %v3244_v34 }
 0x880   :  { %1251 = vmatpush.bf16.msra.mxu3 %v3247_v47  ;;  %1238 = vmatpush.bf16.msra.mxu2 %v3250_v50 }
 0x884   :  { %1252 = vmatpush.bf16.msra.mxu3 %v3261_v5  ;;  %1239 = vmatpush.bf16.msra.mxu2 %v3263_v7 }
 0x8e4   :  { %v3501_v48 = vpop.f32.mrf.mxu0  ;;  %v3503_v29 = vpop.f32.mrf.mxu1 }
 0x8e9   :  { %v3505_v55 = vpop.f32.mrf.mxu2  ;;  %v3507_v36 = vpop.f32.mrf.mxu3 }
 0x8ec   :  { %v985_v27 = vpop.f32.mrf.mxu0  ;;  %v998_v45 = vpop.f32.mrf.mxu1 }
 0x8f1   :  { %v959_v60 = vpop.f32.mrf.mxu2  ;;  %v972_v38 = vpop.f32.mrf.mxu3 }
 0x8f9   :  { %v1011_v61 = vpop.f32.mrf.mxu2  ;;  %v1024_v63 = vpop.f32.mrf.mxu3 }
 0x8fa   :  { %v1028_v22 = vadd.f32 %v1011_v61, %v1000_v42  ;;  %v1029_v2 = vadd.f32 %v1024_v63, %v1001_v15 }
 0x8fc   :  { %2920 = vtanh.f32 %v1029_v2  ;;  %v2681_v8 = vmul.f32 -1.442695, %v1028_v22 }
 0x8fe   :  { %2922 = vpow2.f32 %v2681_v8 }
 0x901   :  { %v1013_v14 = vpop.f32.mrf.mxu2  ;;  %v1026_v58 = vpop.f32.mrf.mxu3 }
 0x902   :  { %v2921_v6 = vpop.eup %2920 }
 0x903   :  { %1071 = vrot.lane.b32.xlu2 %v2921_v6, %s3099_s0 }
 0x904   :  { %v2923_v27 = vpop.eup %2922 }
 0x905   :  { %v1036_v45 = vadd.f32 1.0, %v2923_v27  ;;  %v2682_v27 = vmul.f32 -1.442695, %v1029_v2 }
 0x907   :  { %2924 = vrcp.f32 %v1036_v45  ;;  %v1049_v33 = vand.u32 2147483648, %v1036_v45  ;;  %vm1043_vm5 = vweird.f32 %v1036_v45  ;;  %v1047_v37 = vand.u32 2147483647, %v1036_v45 }
 0x909   :  { %v1050_v61 = vor.u32 1.1754944e-38, %v1049_v33  ;;  %vm1048_vm8 = vcmp.eq.f32.partialorder %v1047_v37, 8.507059e+37 }
 0x90d   :  { %v2925_v49 = vpop.eup %2924 }
 0x90e   :  { %v1039_v51 = vmul.f32 %v2925_v49, %v1036_v45  ;;  %vm1044_vm4 = vweird.f32 %v2925_v49 }
 0x90f   :  { %vm1045_vm7 = vmor %vm1043_vm5, %vm1044_vm4 }
 0x910   :  { %v1040_v60 = vsub.f32 1.0, %v1039_v51 }
 0x912   :  { %v1041_v38 = vmul.f32 %v2925_v49, %v1040_v60 }
 0x914   :  { %v1042_v18 = vadd.f32 %v2925_v49, %v1041_v38 }
 0x916   :  { %v1046_v42 = vsel %vm1045_vm7, %v2925_v49, %v1042_v18 }
 0x917   :  { %v1051_v63 = vsel %vm1048_vm8, %v1050_v61, %v1046_v42 }
 0x918   :  { %v1069_v14 = vmul.f32 %v1051_v63, %v3467_v10 }
 0x95d   :  { %v1072_v15 = vpop.permute.xlu2 %1071 }
 0x95e   :  { %v1074_v22 = vmul.f32 %v1072_v15, %v1051_v63 }
 0x960   :  { %1076 = vrot.lane.b32.xlu0 %v1074_v22, %s3099_s0 }
 0x9d2   :  { %v1077_v58 = vpop.permute.xlu0 %1076 }
 0x9d3   :  { %v3520_v6 = vadd.f32 %v1077_v58, %v1069_v14  ;;  %v303_v14 = vld [vmem:[#allocation2 + $0x200] sm:$0x11] }
 0x9d4   :  { %v304_v58 = vunpack.c.l.bf16 %v303_v14 }
 0x9d5   :  { %2926 = vtanh.f32 %v3520_v6 }
 0x9d6   :  { %2928 = vpow2.f32 %v2682_v27 }
 0x9db   :  { %v2927_v8 = vpop.eup %2926 }
 0x9dc   :  { %1082 = vrot.lane.b32.xlu1 %v2927_v8, %s3099_s0  ;;  %v2929_v18 = vpop.eup %2928  ;;  %v305_v8 = vunpack.c.h.bf16 %v303_v14 }
 0x9dd   :  { %v1037_v45 = vadd.f32 1.0, %v2929_v18 }
 0x9df   :  { %2930 = vrcp.f32 %v1037_v45  ;;  %v1064_v10 = vand.u32 2147483648, %v1037_v45  ;;  %vm1058_vm10 = vweird.f32 %v1037_v45  ;;  %v1062_v37 = vand.u32 2147483647, %v1037_v45 }
 0x9e1   :  { %v1065_v61 = vor.u32 1.1754944e-38, %v1064_v10  ;;  %vm1063_vm14 = vcmp.eq.f32.partialorder %v1062_v37, 8.507059e+37 }
 0x9e5   :  { %v2931_v49 = vpop.eup %2930 }
 0x9e6   :  { %v1054_v51 = vmul.f32 %v2931_v49, %v1037_v45  ;;  %vm1059_vm9 = vweird.f32 %v2931_v49  ;;  %v3554_v45 = vperm.slane %v304_v58, 0 }
 0x9e7   :  { %vm1060_vm11 = vmor %vm1058_vm10, %vm1059_vm9 }
 0x9e8   :  { %v1055_v60 = vsub.f32 1.0, %v1054_v51 }
 0x9ea   :  { %v1056_v38 = vmul.f32 %v2931_v49, %v1055_v60 }
 0x9ec   :  { %v1057_v33 = vadd.f32 %v2931_v49, %v1056_v38  ;;  %v958_v38 = vadd.f32 %v3505_v55, %v3554_v45 }
 0x9ee   :  { %v1061_v42 = vsel %vm1060_vm11, %v2931_v49, %v1057_v33  ;;  %v3556_v49 = vperm.slane %v305_v8, 0  ;;  %v1142_v8 = vsel %vm3227_vm13, %v3220_v52, %v3200_v43 }
 0x9ef   :  { %v1066_v15 = vsel %vm1063_vm14, %v1065_v61, %v1061_v42 }
 0x9f0   :  { %v971_v33 = vadd.f32 %v3507_v36, %v3556_v49 }
 0xa4e   :  { %v1083_v63 = vpop.permute.xlu1 %1082 }
 0xa4f   :  { %v1085_v2 = vmul.f32 %v1083_v63, %v1066_v15 }
 0xa51   :  { %v1086_v22 = vpack.c.bf16 %v1085_v2, %v1085_v2 }
 0xa53   :  { %2683 = vmatmul.msk.bf16.vlgmr.msrb.gmra.mxu0 %vm348_vm6, %v1086_v22  ;;  %2684 = vmatmul.msk.bf16.vlgmr.msrb.gmra.mxu1 %vm348_vm6, %v1086_v22 }
 0xa54   :  { %2685 = vmatmul.msk.bf16.vlgmr.msrb.gmra.mxu2 %vm348_vm6, %v1086_v22  ;;  %2686 = vmatmul.msk.bf16.vlgmr.msrb.gmra.mxu3 %vm348_vm6, %v1086_v22 }
 0xa55   :  { %1262 = vmatpush.bf16.msrb.mxu0 %v3270_v17  ;;  %1275 = vmatpush.bf16.msrb.mxu1 %v3268_v11 }
 0xa56   :  { %1303 = vmatpush.bf16.msrb.mxu3 %v3145_v59  ;;  %1290 = vmatpush.bf16.msrb.mxu2 %v3155_v9 }
 0xa59   :  { %1263 = vmatpush.bf16.msrb.mxu0 %v3277_v25  ;;  %1276 = vmatpush.bf16.msrb.mxu1 %v3273_v23 }
 0xa5a   :  { %1304 = vmatpush.bf16.msrb.mxu3 %v3152_v3  ;;  %1291 = vmatpush.bf16.msrb.mxu2 %v3160_v16 }
 0xa5d   :  { %1264 = vmatpush.bf16.msrb.mxu0 %v3285_v54  ;;  %1277 = vmatpush.bf16.msrb.mxu1 %v3281_v44 }
 0xa5e   :  { %1305 = vmatpush.bf16.msrb.mxu3 %v3157_v13  ;;  %1292 = vmatpush.bf16.msrb.mxu2 %v3166_v20 }
 0xa61   :  { %1265 = vmatpush.bf16.msrb.mxu0 %v3294_v4  ;;  %1278 = vmatpush.bf16.msrb.mxu1 %v3290_v62 }
 0xa62   :  { %1306 = vmatpush.bf16.msrb.mxu3 %v3163_v19  ;;  %1293 = vmatpush.bf16.msrb.mxu2 %v3173_v24 }
 0xa63   :  { %2687 = vmatmul.msk.bf16.vlgmr.msra.gmra.mxu0 %vm348_vm6, %v1086_v22  ;;  %2688 = vmatmul.msk.bf16.vlgmr.msra.gmra.mxu1 %vm348_vm6, %v1086_v22 }
 0xa65   :  { %1391 = vmatpush.bf16.msra.mxu1 %v3236_v21  ;;  %1378 = vmatpush.bf16.msra.mxu0 %v3238_v26 }
 0xa69   :  { %1392 = vmatpush.bf16.msra.mxu1 %v3241_v32  ;;  %1379 = vmatpush.bf16.msra.mxu0 %v3244_v34 }
 0xa6d   :  { %1393 = vmatpush.bf16.msra.mxu1 %v3247_v47  ;;  %1380 = vmatpush.bf16.msra.mxu0 %v3250_v50 }
 0xa71   :  { %1394 = vmatpush.bf16.msra.mxu1 %v3261_v5  ;;  %1381 = vmatpush.bf16.msra.mxu0 %v3263_v7 }
 0xad0   :  { %v1099_v27 = vpop.f32.mrf.mxu0  ;;  %v1112_v18 = vpop.f32.mrf.mxu1 }
 0xad1   :  { %v1100_v51 = vadd.f32 %v1099_v27, %v3554_v45  ;;  %v1113_v60 = vadd.f32 %v1112_v18, %v3556_v49  ;;  %v1143_v18 = vsel %vm3204_vm12, %v3193_v39, %v3185_v31 }
 0xad3   :  { %v3565_v42 = vadd.f32 %v1100_v51, %v3501_v48  ;;  %v3568_v61 = vadd.f32 %v1113_v60, %v3503_v29 }
 0xad7   :  { %v1125_v10 = vpop.f32.mrf.mxu2  ;;  %v1138_v37 = vpop.f32.mrf.mxu3 }
 0xad8   :  { %v3570_v15 = vadd.f32 %v1125_v10, %v958_v38  ;;  %v3572_v63 = vadd.f32 %v1138_v37, %v971_v33  ;;  %v1101_v2 = vpop.f32.mrf.mxu0  ;;  %v1114_v22 = vpop.f32.mrf.mxu1 }
 0xada   :  { %v1891_v55 = vsel %vm3227_vm13, %v3570_v15, %v3565_v42  ;;  %v1892_v48 = vsel %vm3204_vm12, %v3572_v63, %v3568_v61 }
 0xadf   :  { %v1127_v14 = vpop.f32.mrf.mxu2  ;;  %v1140_v58 = vpop.f32.mrf.mxu3 }
 0xae0   :  { %v1153_v27 = vpop.f32.mrf.mxu0  ;;  %v1166_v51 = vpop.f32.mrf.mxu1 }
 0xae1   :  { %v1170_v60 = vadd.f32 %v1153_v27, %v1142_v8  ;;  %v1171_v38 = vadd.f32 %v1166_v51, %v1143_v18 }
 0xae3   :  { %2932 = vtanh.f32 %v1171_v38  ;;  %v2689_v2 = vmul.f32 -1.442695, %v1170_v60 }
 0xae5   :  { %2934 = vpow2.f32 %v2689_v2  ;;  %v2690_v2 = vmul.f32 -1.442695, %v1171_v38 }
 0xae8   :  { %v1155_v33 = vpop.f32.mrf.mxu0  ;;  %v1168_v10 = vpop.f32.mrf.mxu1 }
 0xae9   :  { %v2933_v37 = vpop.eup %2932 }
 0xaea   :  { %1213 = vrot.lane.b32.xlu2 %v2933_v37, %s3099_s0 }
 0xaeb   :  { %v2935_v22 = vpop.eup %2934 }
 0xaec   :  { %v1178_v14 = vadd.f32 1.0, %v2935_v22 }
 0xaee   :  { %2936 = vrcp.f32 %v1178_v14  ;;  %v1191_v31 = vand.u32 2147483648, %v1178_v14  ;;  %vm1185_vm0 = vweird.f32 %v1178_v14  ;;  %v1189_v39 = vand.u32 2147483647, %v1178_v14 }
 0xaf0   :  { %v1192_v27 = vor.u32 1.1754944e-38, %v1191_v31  ;;  %vm1190_vm2 = vcmp.eq.f32.partialorder %v1189_v39, 8.507059e+37 }
 0xaf4   :  { %v2937_v43 = vpop.eup %2936 }
 0xaf5   :  { %v1181_v52 = vmul.f32 %v2937_v43, %v1178_v14  ;;  %vm1186_vm15 = vweird.f32 %v2937_v43 }
 0xaf6   :  { %vm1187_vm1 = vmor %vm1185_vm0, %vm1186_vm15 }
 0xaf7   :  { %v1182_v58 = vsub.f32 1.0, %v1181_v52 }
 0xaf9   :  { %v1183_v36 = vmul.f32 %v2937_v43, %v1182_v58 }
 0xafb   :  { %v1184_v29 = vadd.f32 %v2937_v43, %v1183_v36 }
 0xafd   :  { %v1188_v8 = vsel %vm1187_vm1, %v2937_v43, %v1184_v29 }
 0xafe   :  { %v1193_v51 = vsel %vm1190_vm2, %v1192_v27, %v1188_v8 }
 0xaff   :  { %v1211_v33 = vmul.f32 %v1193_v51, %v3520_v6 }
 0xb44   :  { %v1214_v18 = vpop.permute.xlu2 %1213 }
 0xb45   :  { %v1216_v60 = vmul.f32 %v1214_v18, %v1193_v51 }
 0xb47   :  { %1218 = vrot.lane.b32.xlu0 %v1216_v60, %s3099_s0 }
 0xbb9   :  { %v1219_v10 = vpop.permute.xlu0 %1218 }
 0xbba   :  { %v3601_v37 = vadd.f32 %v1219_v10, %v1211_v33  ;;  %v1284_v33 = vsel %vm3227_vm13, %v3222_v53, %v3195_v40 }
 0xbbc   :  { %2938 = vtanh.f32 %v3601_v37 }
 0xbbd   :  { %2940 = vpow2.f32 %v2690_v2 }
 0xbc2   :  { %v2939_v36 = vpop.eup %2938 }
 0xbc3   :  { %1224 = vrot.lane.b32.xlu1 %v2939_v36, %s3099_s0  ;;  %v2941_v29 = vpop.eup %2940  ;;  %v1285_v36 = vsel %vm3204_vm12, %v3197_v41, %v3183_v30 }
 0xbc4   :  { %v1179_v22 = vadd.f32 1.0, %v2941_v29 }
 0xbc6   :  { %2942 = vrcp.f32 %v1179_v22  ;;  %v1206_v6 = vand.u32 2147483648, %v1179_v22  ;;  %vm1200_vm4 = vweird.f32 %v1179_v22  ;;  %v1204_v39 = vand.u32 2147483647, %v1179_v22 }
 0xbc8   :  { %v1207_v27 = vor.u32 1.1754944e-38, %v1206_v6  ;;  %vm1205_vm7 = vcmp.eq.f32.partialorder %v1204_v39, 8.507059e+37 }
 0xbcc   :  { %v2943_v14 = vpop.eup %2942 }
 0xbcd   :  { %v1196_v43 = vmul.f32 %v2943_v14, %v1179_v22  ;;  %vm1201_vm3 = vweird.f32 %v2943_v14 }
 0xbce   :  { %vm1202_vm5 = vmor %vm1200_vm4, %vm1201_vm3 }
 0xbcf   :  { %v1197_v52 = vsub.f32 1.0, %v1196_v43 }
 0xbd1   :  { %v1198_v58 = vmul.f32 %v2943_v14, %v1197_v52 }
 0xbd3   :  { %v1199_v31 = vadd.f32 %v2943_v14, %v1198_v58 }
 0xbd5   :  { %v1203_v8 = vsel %vm1202_vm5, %v2943_v14, %v1199_v31 }
 0xbd6   :  { %v1208_v18 = vsel %vm1205_vm7, %v1207_v27, %v1203_v8 }
 0xc35   :  { %v1225_v51 = vpop.permute.xlu1 %1224 }
 0xc36   :  { %v1227_v38 = vmul.f32 %v1225_v51, %v1208_v18 }
 0xc38   :  { %v1228_v60 = vpack.c.bf16 %v1227_v38, %v1227_v38 }
 0xc3a   :  { %2691 = vmatmul.msk.bf16.vlgmr.msra.gmra.mxu2 %vm348_vm6, %v1228_v60  ;;  %2692 = vmatmul.msk.bf16.vlgmr.msra.gmra.mxu3 %vm348_vm6, %v1228_v60 }
 0xc3b   :  { %2693 = vmatmul.msk.bf16.vlgmr.msrb.gmra.mxu0 %vm348_vm6, %v1228_v60  ;;  %2694 = vmatmul.msk.bf16.vlgmr.msrb.gmra.mxu1 %vm348_vm6, %v1228_v60 }
 0xc3c   :  { %1404 = vmatpush.bf16.msra.mxu2 %v3270_v17  ;;  %1417 = vmatpush.bf16.msra.mxu3 %v3268_v11 }
 0xc3d   :  { %1445 = vmatpush.bf16.msrb.mxu1 %v3145_v59  ;;  %1432 = vmatpush.bf16.msrb.mxu0 %v3155_v9  ;;  %v816_v59 = vadd.f32 %v3448_v12, %v3554_v45 }
 0xc40   :  { %1405 = vmatpush.bf16.msra.mxu2 %v3277_v25  ;;  %1418 = vmatpush.bf16.msra.mxu3 %v3273_v23 }
 0xc41   :  { %1446 = vmatpush.bf16.msrb.mxu1 %v3152_v3  ;;  %1433 = vmatpush.bf16.msrb.mxu0 %v3160_v16  ;;  %v829_v3 = vadd.f32 %v3450_v35, %v3556_v49 }
 0xc44   :  { %1406 = vmatpush.bf16.msra.mxu2 %v3285_v54  ;;  %1419 = vmatpush.bf16.msra.mxu3 %v3281_v44 }
 0xc45   :  { %1447 = vmatpush.bf16.msrb.mxu1 %v3157_v13  ;;  %1434 = vmatpush.bf16.msrb.mxu0 %v3166_v20 }
 0xc48   :  { %1407 = vmatpush.bf16.msra.mxu2 %v3294_v4  ;;  %1420 = vmatpush.bf16.msra.mxu3 %v3290_v62 }
 0xc49   :  { %1448 = vmatpush.bf16.msrb.mxu1 %v3163_v19  ;;  %1435 = vmatpush.bf16.msrb.mxu0 %v3173_v24 }
 0xc4a   :  { %2695 = vmatmul.msk.bf16.vlgmr.msrb.gmra.mxu2 %vm348_vm6, %v1228_v60  ;;  %2696 = vmatmul.msk.bf16.vlgmr.msrb.gmra.mxu3 %vm348_vm6, %v1228_v60 }
 0xc4c   :  { %1533 = vmatpush.bf16.msrb.mxu3 %v3236_v21  ;;  %1520 = vmatpush.bf16.msrb.mxu2 %v3238_v26 }
 0xc50   :  { %1534 = vmatpush.bf16.msrb.mxu3 %v3241_v32  ;;  %1521 = vmatpush.bf16.msrb.mxu2 %v3244_v34 }
 0xc54   :  { %1535 = vmatpush.bf16.msrb.mxu3 %v3247_v47  ;;  %1522 = vmatpush.bf16.msrb.mxu2 %v3250_v50 }
 0xc58   :  { %1536 = vmatpush.bf16.msrb.mxu3 %v3261_v5  ;;  %1523 = vmatpush.bf16.msrb.mxu2 %v3263_v7 }
 0xcb8   :  { %v1267_v9 = vpop.f32.mrf.mxu0  ;;  %v1280_v13 = vpop.f32.mrf.mxu1 }
 0xcb9   :  { %v3639_v16 = vadd.f32 %v1267_v9, %v816_v59  ;;  %v3641_v19 = vadd.f32 %v1280_v13, %v829_v3 }
 0xcbd   :  { %v1241_v20 = vpop.f32.mrf.mxu2  ;;  %v1254_v24 = vpop.f32.mrf.mxu3 }
 0xcbe   :  { %v1242_v21 = vadd.f32 %v1241_v20, %v3554_v45  ;;  %v1255_v26 = vadd.f32 %v1254_v24, %v3556_v49 }
 0xcc0   :  { %v3646_v32 = vadd.f32 %v1242_v21, %v3452_v57  ;;  %v3649_v34 = vadd.f32 %v1255_v26, %v3454_v1  ;;  %v1269_v47 = vpop.f32.mrf.mxu0  ;;  %v1282_v50 = vpop.f32.mrf.mxu1 }
 0xcc2   :  { %v1797_v5 = vsel %vm3227_vm13, %v3639_v16, %v3646_v32  ;;  %v1798_v7 = vsel %vm3204_vm12, %v3641_v19, %v3649_v34  ;;  %v2071_v12 = vsel %vm3227_vm13, %v3646_v32, %v3639_v16  ;;  %v2072_v35 = vsel %vm3204_vm12, %v3649_v34, %v3641_v19 }
 0xcc5   :  { %v1243_v57 = vpop.f32.mrf.mxu2  ;;  %v1256_v1 = vpop.f32.mrf.mxu3 }
 0xccd   :  { %v1295_v10 = vpop.f32.mrf.mxu2  ;;  %v1308_v2 = vpop.f32.mrf.mxu3 }
 0xcce   :  { %v1312_v29 = vadd.f32 %v1295_v10, %v1284_v33  ;;  %v1313_v22 = vadd.f32 %v1308_v2, %v1285_v36 }
 0xcd0   :  { %2944 = vtanh.f32 %v1313_v22  ;;  %v2697_v58 = vmul.f32 -1.442695, %v1312_v29  ;;  %v2698_v24 = vmul.f32 -1.442695, %v1313_v22 }
 0xcd2   :  { %2946 = vpow2.f32 %v2697_v58  ;;  %v4013_v58 = vld [vmem:[#allocation13_spill] sm:$0xff] }
 0xcd5   :  { %v1297_v14 = vpop.f32.mrf.mxu2  ;;  %v1310_v43 = vpop.f32.mrf.mxu3 }
 0xcd6   :  { %v2945_v52 = vpop.eup %2944 }
 0xcd7   :  { %1355 = vrot.lane.b32.xlu2 %v2945_v52, %s3099_s0 }
 0xcd8   :  { %v2947_v31 = vpop.eup %2946 }
 0xcd9   :  { %v1320_v6 = vadd.f32 1.0, %v2947_v31  ;;  %v4014_v31 = vld [vmem:[#allocation14_spill] sm:$0xff] }
 0xcdb   :  { %2948 = vrcp.f32 %v1320_v6  ;;  %v1333_v30 = vand.u32 2147483648, %v1320_v6  ;;  %vm1327_vm9 = vweird.f32 %v1320_v6  ;;  %v1331_v41 = vand.u32 2147483647, %v1320_v6 }
 0xcdd   :  { %v1334_v51 = vor.u32 1.1754944e-38, %v1333_v30  ;;  %vm1332_vm11 = vcmp.eq.f32.partialorder %v1331_v41, 8.507059e+37 }
 0xce1   :  { %v2949_v40 = vpop.eup %2948 }
 0xce2   :  { %v1323_v53 = vmul.f32 %v2949_v40, %v1320_v6  ;;  %vm1328_vm8 = vweird.f32 %v2949_v40 }
 0xce3   :  { %vm1329_vm10 = vmor %vm1327_vm9, %vm1328_vm8 }
 0xce4   :  { %v1324_v39 = vsub.f32 1.0, %v1323_v53 }
 0xce6   :  { %v1325_v8 = vmul.f32 %v2949_v40, %v1324_v39 }
 0xce8   :  { %v1326_v27 = vadd.f32 %v2949_v40, %v1325_v8 }
 0xcea   :  { %v1330_v18 = vsel %vm1329_vm10, %v2949_v40, %v1326_v27 }
 0xceb   :  { %v1335_v60 = vsel %vm1332_vm11, %v1334_v51, %v1330_v18  ;;  %v4015_v51 = vld [vmem:[#allocation6_spill] sm:$0xff] }
 0xcec   :  { %v1353_v3 = vmul.f32 %v1335_v60, %v3601_v37 }
 0xd31   :  { %v1356_v38 = vpop.permute.xlu2 %1355 }
 0xd32   :  { %v1358_v59 = vmul.f32 %v1356_v38, %v1335_v60  ;;  %v4016_v38 = vld [vmem:[#allocation8_spill] sm:$0xff] }
 0xd33   :  { %v1426_v60 = vsel %vm3227_vm13, %v4016_v38, %v4015_v51  ;;  %v2737_v51 = vld [vmem:[#allocation2 + $0x170] sm:$0xf] }
 0xd34   :  { %1360 = vrot.lane.b32.xlu0 %v1358_v59, %s3099_s0 }
 0xda6   :  { %v1361_v9 = vpop.permute.xlu0 %1360 }
 0xda7   :  { %v3678_v13 = vadd.f32 %v1361_v9, %v1353_v3  ;;  %v4017_v3 = vld [vmem:[#allocation5_spill] sm:$0xff]  ;;  %v4018_v9 = vld [vmem:[#allocation7_spill] sm:$0xff] }
 0xda9   :  { %2950 = vtanh.f32 %v3678_v13 }
 0xdaa   :  { %2952 = vpow2.f32 %v2698_v24 }
 0xdaf   :  { %v2951_v20 = vpop.eup %2950 }
 0xdb0   :  { %1366 = vrot.lane.b32.xlu1 %v2951_v20, %s3099_s0  ;;  %v2953_v21 = vpop.eup %2952  ;;  %v1427_v20 = vsel %vm3204_vm12, %v4018_v9, %v4017_v3  ;;  %v2731_v3 = vld [vmem:[#allocation2 + $0x168] sm:$0xf0]  ;;  %v2729_v9 = vld [vmem:[#allocation2 + $0x160] sm:$0xf] }
 0xdb1   :  { %v1321_v26 = vadd.f32 1.0, %v2953_v21 }
 0xdb3   :  { %2954 = vrcp.f32 %v1321_v26  ;;  %v1348_v37 = vand.u32 2147483648, %v1321_v26  ;;  %vm1342_vm15 = vweird.f32 %v1321_v26  ;;  %v1346_v10 = vand.u32 2147483647, %v1321_v26 }
 0xdb5   :  { %v1349_v2 = vor.u32 1.1754944e-38, %v1348_v37  ;;  %vm1347_vm1 = vcmp.eq.f32.partialorder %v1346_v10, 8.507059e+37 }
 0xdb9   :  { %v2955_v47 = vpop.eup %2954 }
 0xdba   :  { %v1338_v50 = vmul.f32 %v2955_v47, %v1321_v26  ;;  %vm1343_vm14 = vweird.f32 %v2955_v47 }
 0xdbb   :  { %vm1344_vm0 = vmor %vm1342_vm15, %vm1343_vm14 }
 0xdbc   :  { %v1339_v57 = vsub.f32 1.0, %v1338_v50 }
 0xdbe   :  { %v1340_v1 = vmul.f32 %v2955_v47, %v1339_v57 }
 0xdc0   :  { %v1341_v33 = vadd.f32 %v2955_v47, %v1340_v1 }
 0xdc2   :  { %v1345_v36 = vsel %vm1344_vm0, %v2955_v47, %v1341_v33 }
 0xdc3   :  { %v1350_v29 = vsel %vm1347_vm1, %v1349_v2, %v1345_v36 }
 0xe22   :  { %v1367_v14 = vpop.permute.xlu1 %1366 }
 0xe23   :  { %v1369_v22 = vmul.f32 %v1367_v14, %v1350_v29 }
 0xe25   :  { %v1370_v43 = vpack.c.bf16 %v1369_v22, %v1369_v22 }
 0xe27   :  { %2699 = vmatmul.msk.bf16.vlgmr.msra.gmra.mxu0 %vm348_vm6, %v1370_v43  ;;  %2700 = vmatmul.msk.bf16.vlgmr.msra.gmra.mxu1 %vm348_vm6, %v1370_v43 }
 0xe28   :  { %2701 = vmatmul.msk.bf16.vlgmr.msra.gmra.mxu2 %vm348_vm6, %v1370_v43  ;;  %2702 = vmatmul.msk.bf16.vlgmr.msra.gmra.mxu3 %vm348_vm6, %v1370_v43 }
 0xe29   :  { %1546 = vmatpush.bf16.msra.mxu0 %v3270_v17  ;;  %1559 = vmatpush.bf16.msra.mxu1 %v3268_v11 }
 0xe2d   :  { %1547 = vmatpush.bf16.msra.mxu0 %v3277_v25  ;;  %1560 = vmatpush.bf16.msra.mxu1 %v3273_v23  ;;  %v674_v23 = vadd.f32 %v3399_v28, %v3554_v45 }
 0xe31   :  { %1548 = vmatpush.bf16.msra.mxu0 %v3285_v54  ;;  %1561 = vmatpush.bf16.msra.mxu1 %v3281_v44  ;;  %v687_v44 = vadd.f32 %v3401_v0, %v3556_v49 }
 0xe35   :  { %1549 = vmatpush.bf16.msra.mxu0 %v3294_v4  ;;  %1562 = vmatpush.bf16.msra.mxu1 %v3290_v62 }
 0xe37   :  { %2703 = vmatmul.msk.bf16.vlgmr.msrb.gmra.mxu0 %vm348_vm6, %v1370_v43  ;;  %2704 = vmatmul.msk.bf16.vlgmr.msrb.gmra.mxu1 %vm348_vm6, %v1370_v43 }
 0xea4   :  { %v1383_v52 = vpop.f32.mrf.mxu0  ;;  %v1396_v17 = vpop.f32.mrf.mxu1 }
 0xea5   :  { %v1384_v11 = vadd.f32 %v1383_v52, %v3554_v45  ;;  %v1397_v25 = vadd.f32 %v1396_v17, %v3556_v49 }
 0xea7   :  { %v3703_v62 = vadd.f32 %v1384_v11, %v4013_v58  ;;  %v3706_v6 = vadd.f32 %v1397_v25, %v4014_v31 }
 0xeab   :  { %v1409_v54 = vpop.f32.mrf.mxu2  ;;  %v1422_v4 = vpop.f32.mrf.mxu3 }
 0xeac   :  { %v3708_v40 = vadd.f32 %v1409_v54, %v674_v23  ;;  %v3710_v53 = vadd.f32 %v1422_v4, %v687_v44  ;;  %v1385_v39 = vpop.f32.mrf.mxu0  ;;  %v1398_v8 = vpop.f32.mrf.mxu1 }
 0xeae   :  { %v1703_v28 = vsel %vm3227_vm13, %v3708_v40, %v3703_v62  ;;  %v1704_v0 = vsel %vm3204_vm12, %v3710_v53, %v3706_v6  ;;  %v2161_v27 = vsel %vm3227_vm13, %v3703_v62, %v3708_v40  ;;  %v2162_v30 = vsel %vm3204_vm12, %v3706_v6, %v3710_v53 }
 0xeb3   :  { %v1411_v41 = vpop.f32.mrf.mxu2  ;;  %v1424_v18 = vpop.f32.mrf.mxu3 }
 0xeb4   :  { %v1437_v59 = vpop.f32.mrf.mxu0  ;;  %v1450_v24 = vpop.f32.mrf.mxu1  ;;  %v2837_v41 = vld [vmem:[#allocation2 + $0x174] sm:$0xf]  ;;  %v2739_v18 = vld [vmem:[#allocation2 + $0x178] sm:$0xf0] }
 0xeb5   :  { %v1454_v21 = vadd.f32 %v1437_v59, %v1426_v60  ;;  %v1455_v26 = vadd.f32 %v1450_v24, %v1427_v20  ;;  %v3740_v38 = vor.u32 %v2837_v41, %v2739_v18  ;;  %v2838_v60 = vld [vmem:[#allocation2 + $0x174] sm:$0xf0]  ;;  %v2836_v24 = vld [vmem:[#allocation2 + $0x164] sm:$0xf0]  ;;  %v4020_v41 = vld [vmem:[#allocation9_spill] sm:$0xff] }
 0xeb6   :  { %v3742_v59 = vor.u32 %v2838_v60, %v2737_v51  ;;  %v492_v18 = vadd.f32 %v4020_v41, %v3554_v45 }
 0xeb7   :  { %2956 = vtanh.f32 %v1455_v26  ;;  %v2705_v1 = vmul.f32 -1.442695, %v1454_v21  ;;  %v2706_v31 = vmul.f32 -1.442695, %v1455_v26  ;;  %1631 = vmatpush.bf16.msra.mxu3 %v3740_v38  ;;  %1725 = vmatpush.bf16.msrb.mxu1 %v3740_v38  ;;  %v3749_v21 = vor.u32 %v2836_v24, %v2729_v9  ;;  %v2833_v26 = vld [vmem:[#allocation2 + $0x154] sm:$0xf] }
 0xeb8   :  { %1618 = vmatpush.bf16.msra.mxu2 %v3742_v59  ;;  %1712 = vmatpush.bf16.msrb.mxu0 %v3742_v59  ;;  %v4021_v24 = vld [vmem:[#allocation10_spill] sm:$0xff] }
 0xeb9   :  { %2958 = vpow2.f32 %v2705_v1 }
 0xebc   :  { %v1439_v47 = vpop.f32.mrf.mxu0  ;;  %v1452_v50 = vpop.f32.mrf.mxu1  ;;  %1619 = vmatpush.bf16.msra.mxu2 %v3749_v21  ;;  %1713 = vmatpush.bf16.msrb.mxu0 %v3749_v21 }
 0xebd   :  { %v2957_v57 = vpop.eup %2956  ;;  %v2723_v47 = vld [vmem:[#allocation2 + $0x158] sm:$0xf0]  ;;  %v2721_v50 = vld [vmem:[#allocation2 + $0x150] sm:$0xf] }
 0xebe   :  { %1497 = vrot.lane.b32.xlu2 %v2957_v57, %s3099_s0  ;;  %v2834_v57 = vld [vmem:[#allocation2 + $0x154] sm:$0xf0] }
 0xebf   :  { %v2959_v33 = vpop.eup %2958 }
 0xec0   :  { %v1462_v37 = vadd.f32 1.0, %v2959_v33  ;;  %v3753_v33 = vor.u32 %v2833_v26, %v2723_v47  ;;  %v505_v26 = vadd.f32 %v4021_v24, %v3556_v49 }
 0xec2   :  { %2960 = vrcp.f32 %v1462_v37  ;;  %v1475_v22 = vand.u32 2147483648, %v1462_v37  ;;  %vm1469_vm3 = vweird.f32 %v1462_v37  ;;  %v1473_v43 = vand.u32 2147483647, %v1462_v37 }
 0xec4   :  { %v1476_v17 = vor.u32 1.1754944e-38, %v1475_v22  ;;  %vm1474_vm5 = vcmp.eq.f32.partialorder %v1473_v43, 8.507059e+37 }
 0xec8   :  { %v2961_v10 = vpop.eup %2960 }
 0xec9   :  { %v1465_v36 = vmul.f32 %v2961_v10, %v1462_v37  ;;  %vm1470_vm2 = vweird.f32 %v2961_v10  ;;  %v3757_v37 = vor.u32 %v2834_v57, %v2721_v50 }
 0xeca   :  { %vm1471_vm4 = vmor %vm1469_vm3, %vm1470_vm2 }
 0xecb   :  { %v1466_v2 = vsub.f32 1.0, %v1465_v36  ;;  %v2715_v36 = vld [vmem:[#allocation2 + $0x148] sm:$0xf0]  ;;  %1620 = vmatpush.bf16.msra.mxu2 %v3757_v37  ;;  %1714 = vmatpush.bf16.msrb.mxu0 %v3757_v37 }
 0xecd   :  { %v1467_v29 = vmul.f32 %v2961_v10, %v1466_v2 }
 0xecf   :  { %v1468_v14 = vadd.f32 %v2961_v10, %v1467_v29  ;;  %v2713_v29 = vld [vmem:[#allocation2 + $0x140] sm:$0xf] }
 0xed1   :  { %v1472_v52 = vsel %vm1471_vm4, %v2961_v10, %v1468_v14  ;;  %v2831_v10 = vld [vmem:[#allocation2 + $0x144] sm:$0xf]  ;;  %v2832_v14 = vld [vmem:[#allocation2 + $0x144] sm:$0xf0] }
 0xed2   :  { %v1477_v25 = vsel %vm1474_vm5, %v1476_v17, %v1472_v52  ;;  %v3761_v22 = vor.u32 %v2831_v10, %v2715_v36  ;;  %v3765_v43 = vor.u32 %v2832_v14, %v2713_v29  ;;  %v4023_v36 = vld [vmem:[#allocation12_spill] sm:$0xff] }
 0xed3   :  { %v1495_v44 = vmul.f32 %v1477_v25, %v3678_v13  ;;  %v2835_v13 = vld [vmem:[#allocation2 + $0x164] sm:$0xf] }
 0xed4   :  { %v3745_v20 = vor.u32 %v2835_v13, %v2731_v3  ;;  %1621 = vmatpush.bf16.msra.mxu2 %v3765_v43  ;;  %1715 = vmatpush.bf16.msrb.mxu0 %v3765_v43 }
 0xed6   :  { %1632 = vmatpush.bf16.msra.mxu3 %v3745_v20  ;;  %1726 = vmatpush.bf16.msrb.mxu1 %v3745_v20 }
 0xeda   :  { %1633 = vmatpush.bf16.msra.mxu3 %v3753_v33  ;;  %1727 = vmatpush.bf16.msrb.mxu1 %v3753_v33 }
 0xede   :  { %1634 = vmatpush.bf16.msra.mxu3 %v3761_v22  ;;  %1728 = vmatpush.bf16.msrb.mxu1 %v3761_v22 }
 0xf18   :  { %v1498_v11 = vpop.permute.xlu2 %1497 }
 0xf19   :  { %v1500_v23 = vmul.f32 %v1498_v11, %v1477_v25 }
 0xf1b   :  { %1502 = vrot.lane.b32.xlu0 %v1500_v23, %s3099_s0 }
 0xf8d   :  { %v1503_v54 = vpop.permute.xlu0 %1502 }
 0xf8e   :  { %v1505_v4 = vadd.f32 %v1503_v54, %v1495_v44 }
 0xf90   :  { %2962 = vtanh.f32 %v1505_v4 }
 0xf91   :  { %2964 = vpow2.f32 %v2706_v31 }
 0xf96   :  { %v2963_v58 = vpop.eup %2962 }
 0xf97   :  { %1508 = vrot.lane.b32.xlu1 %v2963_v58, %s3099_s0  ;;  %v2965_v39 = vpop.eup %2964 }
 0xf98   :  { %v1463_v8 = vadd.f32 1.0, %v2965_v39 }
 0xf9a   :  { %2966 = vrcp.f32 %v1463_v8  ;;  %v1490_v25 = vand.u32 2147483648, %v1463_v8  ;;  %vm1484_vm8 = vweird.f32 %v1463_v8  ;;  %v1488_v23 = vand.u32 2147483647, %v1463_v8 }
 0xf9c   :  { %v1491_v54 = vor.u32 1.1754944e-38, %v1490_v25  ;;  %vm1489_vm10 = vcmp.eq.f32.partialorder %v1488_v23, 8.507059e+37 }
 0xfa0   :  { %v2967_v1 = vpop.eup %2966 }
 0xfa1   :  { %v1480_v2 = vmul.f32 %v2967_v1, %v1463_v8  ;;  %vm1485_vm7 = vweird.f32 %v2967_v1  ;;  %v4019_v8 = vmov 0  }
 0xfa2   :  { %vm1486_vm9 = vmor %vm1484_vm8, %vm1485_vm7 }
 0xfa3   :  { %v1481_v52 = vsub.f32 1.0, %v1480_v2 }
 0xfa5   :  { %v1482_v17 = vmul.f32 %v2967_v1, %v1481_v52 }
 0xfa7   :  { %v1483_v11 = vadd.f32 %v2967_v1, %v1482_v17 }
 0xfa9   :  { %v1487_v44 = vsel %vm1486_vm9, %v2967_v1, %v1483_v11  ;;  %v4022_v1 = vld [vmem:[#allocation11_spill] sm:$0xff] }
 0xfaa   :  { %v1492_v4 = vsel %vm1489_vm10, %v1491_v54, %v1487_v44 }
0x1009   :  { %v1509_v58 = vpop.permute.xlu1 %1508 }
0x100a   :  { %v1511_v31 = vmul.f32 %v1509_v58, %v1492_v4 }
0x100c   :  { %v1512_v39 = vpack.c.bf16 %v1511_v31, %v1511_v31 }
0x100e   :  { %2707 = vmatmul.msk.bf16.vlgmr.msrb.gmra.mxu2 %vm348_vm6, %v1512_v39  ;;  %2708 = vmatmul.msk.bf16.vlgmr.msrb.gmra.mxu3 %vm348_vm6, %v1512_v39 }
0x100f   :  { %2709 = vmatmul.msk.bf16.vlgmr.msra.gmra.mxu0 %vm348_vm6, %v1512_v39  ;;  %2710 = vmatmul.msk.bf16.vlgmr.msra.gmra.mxu1 %vm348_vm6, %v1512_v39 }
0x1010   :  { %1819 = vmatpush.bf16.msrb.mxu3 %v3740_v38  ;;  %1806 = vmatpush.bf16.msrb.mxu2 %v3742_v59 }
0x1011   :  { %1913 = vmatpush.bf16.msra.mxu1 %v3740_v38  ;;  %1900 = vmatpush.bf16.msra.mxu0 %v3742_v59 }
0x1014   :  { %1820 = vmatpush.bf16.msrb.mxu3 %v3745_v20  ;;  %1807 = vmatpush.bf16.msrb.mxu2 %v3749_v21 }
0x1015   :  { %1914 = vmatpush.bf16.msra.mxu1 %v3745_v20  ;;  %1901 = vmatpush.bf16.msra.mxu0 %v3749_v21 }
0x1018   :  { %1821 = vmatpush.bf16.msrb.mxu3 %v3753_v33  ;;  %1808 = vmatpush.bf16.msrb.mxu2 %v3757_v37 }
0x1019   :  { %1915 = vmatpush.bf16.msra.mxu1 %v3753_v33  ;;  %1902 = vmatpush.bf16.msra.mxu0 %v3757_v37 }
0x101c   :  { %1822 = vmatpush.bf16.msrb.mxu3 %v3761_v22  ;;  %1809 = vmatpush.bf16.msrb.mxu2 %v3765_v43 }
0x101d   :  { %1916 = vmatpush.bf16.msra.mxu1 %v3761_v22  ;;  %1903 = vmatpush.bf16.msra.mxu0 %v3765_v43 }
0x101e   :  { %1622 = vmatmul.bf16.vlgmr.msra.gmra.mxu2 %v4019_v8  ;;  %1635 = vmatmul.bf16.vlgmr.msra.gmra.mxu3 %v4019_v8 }
0x1020   :  { %2003 = vmatpush.bf16.msra.mxu3 %v3740_v38  ;;  %1990 = vmatpush.bf16.msra.mxu2 %v3742_v59 }
0x1024   :  { %2004 = vmatpush.bf16.msra.mxu3 %v3745_v20  ;;  %1991 = vmatpush.bf16.msra.mxu2 %v3749_v21 }
0x1028   :  { %2005 = vmatpush.bf16.msra.mxu3 %v3753_v33  ;;  %1992 = vmatpush.bf16.msra.mxu2 %v3757_v37 }
0x102c   :  { %2006 = vmatpush.bf16.msra.mxu3 %v3761_v22  ;;  %1993 = vmatpush.bf16.msra.mxu2 %v3765_v43 }
0x108c   :  { %v1551_v51 = vpop.f32.mrf.mxu0  ;;  %v1564_v60 = vpop.f32.mrf.mxu1 }
0x108d   :  { %v3804_v13 = vadd.f32 %v1551_v51, %v492_v18  ;;  %v3810_v57 = vadd.f32 %v1564_v60, %v505_v26 }
0x1091   :  { %v1525_v3 = vpop.f32.mrf.mxu2  ;;  %v1538_v9 = vpop.f32.mrf.mxu3 }
0x1092   :  { %v1526_v47 = vadd.f32 %v1525_v3, %v3554_v45  ;;  %v1539_v50 = vadd.f32 %v1538_v9, %v3556_v49 }
0x1094   :  { %v3813_v10 = vadd.f32 %v1526_v47, %v4022_v1  ;;  %v3816_v2 = vadd.f32 %v1539_v50, %v4023_v36  ;;  %v1553_v29 = vpop.f32.mrf.mxu0  ;;  %v1566_v14 = vpop.f32.mrf.mxu1 }
0x1096   :  { %v1572_v52 = vsel %vm3227_vm13, %v3804_v13, %v3813_v10  ;;  %v2251_v45 = vsel %vm3227_vm13, %v3813_v10, %v3804_v13  ;;  %v2252_v49 = vsel %vm3204_vm12, %v3816_v2, %v3810_v57  ;;  %v1573_v23 = vsel %vm3204_vm12, %v3810_v57, %v3816_v2 }
0x1099   :  { %v1527_v17 = vpop.f32.mrf.mxu2  ;;  %v1540_v11 = vpop.f32.mrf.mxu3 }
0x10a1   :  { %v1623_v25 = vpop.f32.mrf.mxu2  ;;  %v1636_v44 = vpop.f32.mrf.mxu3 }
0x10a2   :  { %v1640_v54 = vadd.f32 %v1623_v25, %v1572_v52  ;;  %v1641_v4 = vadd.f32 %v1636_v44, %v1573_v23 }
0x10a4   :  { %2968 = vtanh.f32 %v1641_v4  ;;  %v2743_v8 = vmul.f32 -1.442695, %v1640_v54  ;;  %v2744_v23 = vmul.f32 -1.442695, %v1641_v4 }
0x10a6   :  { %2970 = vpow2.f32 %v2743_v8 }
0x10a9   :  { %v1638_v58 = vpop.f32.mrf.mxu3  ;;  %v1625_v31 = vpop.f32.mrf.mxu2 }
0x10aa   :  { %v2969_v39 = vpop.eup %2968 }
0x10ab   :  { %1683 = vrot.lane.b32.xlu2 %v2969_v39, %s3099_s0 }
0x10ac   :  { %v2971_v41 = vpop.eup %2970 }
0x10ad   :  { %v1648_v18 = vadd.f32 1.0, %v2971_v41 }
0x10af   :  { %2972 = vrcp.f32 %v1648_v18  ;;  %v1661_v26 = vand.u32 2147483648, %v1648_v18  ;;  %vm1655_vm14 = vweird.f32 %v1648_v18  ;;  %v1659_v47 = vand.u32 2147483647, %v1648_v18 }
0x10b1   :  { %v1662_v1 = vor.u32 1.1754944e-38, %v1661_v26  ;;  %vm1660_vm0 = vcmp.eq.f32.partialorder %v1659_v47, 8.507059e+37 }
0x10b5   :  { %v2973_v51 = vpop.eup %2972 }
0x10b6   :  { %v1651_v60 = vmul.f32 %v2973_v51, %v1648_v18  ;;  %vm1656_vm11 = vweird.f32 %v2973_v51 }
0x10b7   :  { %vm1657_vm15 = vmor %vm1655_vm14, %vm1656_vm11 }
0x10b8   :  { %v1652_v3 = vsub.f32 1.0, %v1651_v60 }
0x10ba   :  { %v1653_v9 = vmul.f32 %v2973_v51, %v1652_v3 }
0x10bc   :  { %v1654_v24 = vadd.f32 %v2973_v51, %v1653_v9 }
0x10be   :  { %v1658_v50 = vsel %vm1657_vm15, %v2973_v51, %v1654_v24 }
0x10bf   :  { %v1663_v29 = vsel %vm1660_vm0, %v1662_v1, %v1658_v50 }
0x10c0   :  { %v1681_v52 = vmul.f32 0.0, %v1663_v29 }
0x1105   :  { %v1684_v36 = vpop.permute.xlu2 %1683 }
0x1106   :  { %v1686_v14 = vmul.f32 %v1684_v36, %v1663_v29 }
0x1108   :  { %1688 = vrot.lane.b32.xlu0 %v1686_v14, %s3099_s0 }
0x117a   :  { %v1689_v17 = vpop.permute.xlu0 %1688 }
0x117b   :  { %v3836_v11 = vadd.f32 %v1689_v17, %v1681_v52 }
0x117d   :  { %2974 = vtanh.f32 %v3836_v11 }
0x117e   :  { %2976 = vpow2.f32 %v2744_v23 }
0x1183   :  { %v2975_v25 = vpop.eup %2974 }
0x1184   :  { %1694 = vrot.lane.b32.xlu1 %v2975_v25, %s3099_s0  ;;  %v2977_v44 = vpop.eup %2976 }
0x1185   :  { %v1649_v54 = vadd.f32 1.0, %v2977_v44 }
0x1187   :  { %2978 = vrcp.f32 %v1649_v54  ;;  %v1676_v18 = vand.u32 2147483648, %v1649_v54  ;;  %vm1670_vm2 = vweird.f32 %v1649_v54  ;;  %v1674_v51 = vand.u32 2147483647, %v1649_v54 }
0x1189   :  { %v1677_v3 = vor.u32 1.1754944e-38, %v1676_v18  ;;  %vm1675_vm4 = vcmp.eq.f32.partialorder %v1674_v51, 8.507059e+37 }
0x118d   :  { %v2979_v58 = vpop.eup %2978 }
0x118e   :  { %v1666_v31 = vmul.f32 %v2979_v58, %v1649_v54  ;;  %vm1671_vm1 = vweird.f32 %v2979_v58 }
0x118f   :  { %vm1672_vm3 = vmor %vm1670_vm2, %vm1671_vm1 }
0x1190   :  { %v1667_v39 = vsub.f32 1.0, %v1666_v31 }
0x1192   :  { %v1668_v8 = vmul.f32 %v2979_v58, %v1667_v39 }
0x1194   :  { %v1669_v41 = vadd.f32 %v2979_v58, %v1668_v8 }
0x1196   :  { %v1673_v60 = vsel %vm1672_vm3, %v2979_v58, %v1669_v41 }
0x1197   :  { %v1678_v9 = vsel %vm1675_vm4, %v1677_v3, %v1673_v60 }
0x11f6   :  { %v1695_v24 = vpop.permute.xlu1 %1694 }
0x11f7   :  { %v1697_v4 = vmul.f32 %v1695_v24, %v1678_v9 }
0x11f9   :  { %v1698_v26 = vpack.c.bf16 %v1697_v4, %v1697_v4 }
0x11fb   :  { %2745 = vmatmul.msk.bf16.vlgmr.msrb.gmra.mxu0 %vm348_vm6, %v1698_v26  ;;  %2746 = vmatmul.msk.bf16.vlgmr.msrb.gmra.mxu1 %vm348_vm6, %v1698_v26 }
0x11fc   :  { %2093 = vmatpush.bf16.msrb.mxu1 %v3740_v38  ;;  %2080 = vmatpush.bf16.msrb.mxu0 %v3742_v59 }
0x1200   :  { %2094 = vmatpush.bf16.msrb.mxu1 %v3745_v20  ;;  %2081 = vmatpush.bf16.msrb.mxu0 %v3749_v21 }
0x1204   :  { %2095 = vmatpush.bf16.msrb.mxu1 %v3753_v33  ;;  %2082 = vmatpush.bf16.msrb.mxu0 %v3757_v37 }
0x1208   :  { %2096 = vmatpush.bf16.msrb.mxu1 %v3761_v22  ;;  %2083 = vmatpush.bf16.msrb.mxu0 %v3765_v43 }
0x1278   :  { %v1717_v47 = vpop.f32.mrf.mxu0  ;;  %v1730_v50 = vpop.f32.mrf.mxu1 }
0x1279   :  { %v1734_v1 = vadd.f32 %v1717_v47, %v1703_v28  ;;  %v1735_v36 = vadd.f32 %v1730_v50, %v1704_v0 }
0x127b   :  { %2980 = vtanh.f32 %v1735_v36  ;;  %v2747_v17 = vmul.f32 -1.442695, %v1734_v1  ;;  %v2748_v26 = vmul.f32 -1.442695, %v1735_v36 }
0x127d   :  { %2982 = vpow2.f32 %v2747_v17 }
0x1280   :  { %v1719_v29 = vpop.f32.mrf.mxu0  ;;  %v1732_v14 = vpop.f32.mrf.mxu1 }
0x1281   :  { %v2981_v52 = vpop.eup %2980 }
0x1282   :  { %1777 = vrot.lane.b32.xlu2 %v2981_v52, %s3099_s0 }
0x1283   :  { %v2983_v25 = vpop.eup %2982 }
0x1284   :  { %v1742_v23 = vadd.f32 1.0, %v2983_v25 }
0x1286   :  { %2984 = vrcp.f32 %v1742_v23  ;;  %v1755_v39 = vand.u32 2147483648, %v1742_v23  ;;  %vm1749_vm7 = vweird.f32 %v1742_v23  ;;  %v1753_v0 = vand.u32 2147483647, %v1742_v23 }
0x1288   :  { %v1756_v41 = vor.u32 1.1754944e-38, %v1755_v39  ;;  %vm1754_vm9 = vcmp.eq.f32.partialorder %v1753_v0, 8.507059e+37 }
0x128c   :  { %v2985_v44 = vpop.eup %2984 }
0x128d   :  { %v1745_v54 = vmul.f32 %v2985_v44, %v1742_v23  ;;  %vm1750_vm5 = vweird.f32 %v2985_v44 }
0x128e   :  { %vm1751_vm8 = vmor %vm1749_vm7, %vm1750_vm5 }
0x128f   :  { %v1746_v28 = vsub.f32 1.0, %v1745_v54 }
0x1291   :  { %v1747_v58 = vmul.f32 %v2985_v44, %v1746_v28 }
0x1293   :  { %v1748_v31 = vadd.f32 %v2985_v44, %v1747_v58 }
0x1295   :  { %v1752_v8 = vsel %vm1751_vm8, %v2985_v44, %v1748_v31 }
0x1296   :  { %v1757_v51 = vsel %vm1754_vm9, %v1756_v41, %v1752_v8 }
0x1297   :  { %v1775_v3 = vmul.f32 %v1757_v51, %v3836_v11 }
0x12dc   :  { %v1778_v18 = vpop.permute.xlu2 %1777 }
0x12dd   :  { %v1780_v60 = vmul.f32 %v1778_v18, %v1757_v51 }
0x12df   :  { %1782 = vrot.lane.b32.xlu0 %v1780_v60, %s3099_s0 }
0x1351   :  { %v1783_v9 = vpop.permute.xlu0 %1782 }
0x1352   :  { %v3863_v24 = vadd.f32 %v1783_v9, %v1775_v3 }
0x1354   :  { %2986 = vtanh.f32 %v3863_v24 }
0x1355   :  { %2988 = vpow2.f32 %v2748_v26 }
0x135a   :  { %v2987_v4 = vpop.eup %2986 }
0x135b   :  { %1788 = vrot.lane.b32.xlu1 %v2987_v4, %s3099_s0  ;;  %v2989_v47 = vpop.eup %2988 }
0x135c   :  { %v1743_v50 = vadd.f32 1.0, %v2989_v47 }
0x135e   :  { %2990 = vrcp.f32 %v1743_v50  ;;  %v1770_v11 = vand.u32 2147483648, %v1743_v50  ;;  %vm1764_vm11 = vweird.f32 %v1743_v50  ;;  %v1768_v25 = vand.u32 2147483647, %v1743_v50 }
0x1360   :  { %v1771_v44 = vor.u32 1.1754944e-38, %v1770_v11  ;;  %vm1769_vm15 = vcmp.eq.f32.partialorder %v1768_v25, 8.507059e+37 }
0x1364   :  { %v2991_v1 = vpop.eup %2990 }
0x1365   :  { %v1760_v29 = vmul.f32 %v2991_v1, %v1743_v50  ;;  %vm1765_vm10 = vweird.f32 %v2991_v1 }
0x1366   :  { %vm1766_vm14 = vmor %vm1764_vm11, %vm1765_vm10 }
0x1367   :  { %v1761_v14 = vsub.f32 1.0, %v1760_v29 }
0x1369   :  { %v1762_v52 = vmul.f32 %v2991_v1, %v1761_v14 }
0x136b   :  { %v1763_v17 = vadd.f32 %v2991_v1, %v1762_v52 }
0x136d   :  { %v1767_v23 = vsel %vm1766_vm14, %v2991_v1, %v1763_v17 }
0x136e   :  { %v1772_v54 = vsel %vm1769_vm15, %v1771_v44, %v1767_v23 }
0x13cd   :  { %v1789_v28 = vpop.permute.xlu1 %1788 }
0x13ce   :  { %v1791_v36 = vmul.f32 %v1789_v28, %v1772_v54 }
0x13d0   :  { %v1792_v58 = vpack.c.bf16 %v1791_v36, %v1791_v36 }
0x13d2   :  { %2749 = vmatmul.msk.bf16.vlgmr.msrb.gmra.mxu2 %vm348_vm6, %v1792_v58  ;;  %2750 = vmatmul.msk.bf16.vlgmr.msrb.gmra.mxu3 %vm348_vm6, %v1792_v58 }
0x13d3   :  { %2183 = vmatpush.bf16.msrb.mxu3 %v3740_v38  ;;  %2170 = vmatpush.bf16.msrb.mxu2 %v3742_v59 }
0x13d7   :  { %2184 = vmatpush.bf16.msrb.mxu3 %v3745_v20  ;;  %2171 = vmatpush.bf16.msrb.mxu2 %v3749_v21 }
0x13db   :  { %2185 = vmatpush.bf16.msrb.mxu3 %v3753_v33  ;;  %2172 = vmatpush.bf16.msrb.mxu2 %v3757_v37 }
0x13df   :  { %2186 = vmatpush.bf16.msrb.mxu3 %v3761_v22  ;;  %2173 = vmatpush.bf16.msrb.mxu2 %v3765_v43 }
0x1455   :  { %v1811_v31 = vpop.f32.mrf.mxu2  ;;  %v1824_v39 = vpop.f32.mrf.mxu3 }
0x1456   :  { %v1828_v0 = vadd.f32 %v1811_v31, %v1797_v5  ;;  %v1829_v8 = vadd.f32 %v1824_v39, %v1798_v7 }
0x1458   :  { %2992 = vtanh.f32 %v1829_v8  ;;  %v2751_v60 = vmul.f32 -1.442695, %v1828_v0  ;;  %v2752_v28 = vmul.f32 -1.442695, %v1829_v8 }
0x145a   :  { %2994 = vpow2.f32 %v2751_v60 }
0x145d   :  { %v1813_v41 = vpop.f32.mrf.mxu2  ;;  %v1826_v18 = vpop.f32.mrf.mxu3 }
0x145e   :  { %v2993_v51 = vpop.eup %2992 }
0x145f   :  { %1871 = vrot.lane.b32.xlu2 %v2993_v51, %s3099_s0 }
0x1460   :  { %v2995_v3 = vpop.eup %2994 }
0x1461   :  { %v1836_v9 = vadd.f32 1.0, %v2995_v3 }
0x1463   :  { %2996 = vrcp.f32 %v1836_v9  ;;  %v1849_v1 = vand.u32 2147483648, %v1836_v9  ;;  %vm1843_vm1 = vweird.f32 %v1836_v9  ;;  %v1847_v7 = vand.u32 2147483647, %v1836_v9 }
0x1465   :  { %v1850_v14 = vor.u32 1.1754944e-38, %v1849_v1  ;;  %vm1848_vm3 = vcmp.eq.f32.partialorder %v1847_v7, 8.507059e+37 }
0x1469   :  { %v2997_v4 = vpop.eup %2996 }
0x146a   :  { %v1839_v26 = vmul.f32 %v2997_v4, %v1836_v9  ;;  %vm1844_vm0 = vweird.f32 %v2997_v4 }
0x146b   :  { %vm1845_vm2 = vmor %vm1843_vm1, %vm1844_vm0 }
0x146c   :  { %v1840_v5 = vsub.f32 1.0, %v1839_v26 }
0x146e   :  { %v1841_v47 = vmul.f32 %v2997_v4, %v1840_v5 }
0x1470   :  { %v1842_v50 = vadd.f32 %v2997_v4, %v1841_v47 }
0x1472   :  { %v1846_v29 = vsel %vm1845_vm2, %v2997_v4, %v1842_v50 }
0x1473   :  { %v1851_v17 = vsel %vm1848_vm3, %v1850_v14, %v1846_v29 }
0x1474   :  { %v1869_v25 = vmul.f32 %v1851_v17, %v3863_v24 }
0x14b9   :  { %v1872_v52 = vpop.permute.xlu2 %1871 }
0x14ba   :  { %v1874_v11 = vmul.f32 %v1872_v52, %v1851_v17 }
0x14bc   :  { %1876 = vrot.lane.b32.xlu0 %v1874_v11, %s3099_s0 }
0x152e   :  { %v1877_v23 = vpop.permute.xlu0 %1876 }
0x152f   :  { %v3890_v44 = vadd.f32 %v1877_v23, %v1869_v25 }
0x1531   :  { %2998 = vtanh.f32 %v3890_v44 }
0x1532   :  { %3000 = vpow2.f32 %v2752_v28 }
0x1537   :  { %v2999_v54 = vpop.eup %2998 }
0x1538   :  { %1882 = vrot.lane.b32.xlu1 %v2999_v54, %s3099_s0  ;;  %v3001_v36 = vpop.eup %3000 }
0x1539   :  { %v1837_v58 = vadd.f32 1.0, %v3001_v36 }
0x153b   :  { %3002 = vrcp.f32 %v1837_v58  ;;  %v1864_v24 = vand.u32 2147483648, %v1837_v58  ;;  %vm1858_vm5 = vweird.f32 %v1837_v58  ;;  %v1862_v51 = vand.u32 2147483647, %v1837_v58 }
0x153d   :  { %v1865_v3 = vor.u32 1.1754944e-38, %v1864_v24  ;;  %vm1863_vm8 = vcmp.eq.f32.partialorder %v1862_v51, 8.507059e+37 }
0x1541   :  { %v3003_v31 = vpop.eup %3002 }
0x1542   :  { %v1854_v39 = vmul.f32 %v3003_v31, %v1837_v58  ;;  %vm1859_vm4 = vweird.f32 %v3003_v31 }
0x1543   :  { %vm1860_vm7 = vmor %vm1858_vm5, %vm1859_vm4 }
0x1544   :  { %v1855_v0 = vsub.f32 1.0, %v1854_v39 }
0x1546   :  { %v1856_v41 = vmul.f32 %v3003_v31, %v1855_v0 }
0x1548   :  { %v1857_v18 = vadd.f32 %v3003_v31, %v1856_v41 }
0x154a   :  { %v1861_v60 = vsel %vm1860_vm7, %v3003_v31, %v1857_v18 }
0x154b   :  { %v1866_v9 = vsel %vm1863_vm8, %v1865_v3, %v1861_v60 }
0x15aa   :  { %v1883_v4 = vpop.permute.xlu1 %1882 }
0x15ab   :  { %v1885_v8 = vmul.f32 %v1883_v4, %v1866_v9 }
0x15ad   :  { %v1886_v26 = vpack.c.bf16 %v1885_v8, %v1885_v8 }
0x15af   :  { %2753 = vmatmul.msk.bf16.vlgmr.msra.gmra.mxu0 %vm348_vm6, %v1886_v26  ;;  %2754 = vmatmul.msk.bf16.vlgmr.msra.gmra.mxu1 %vm348_vm6, %v1886_v26 }
0x15b0   :  { %2273 = vmatpush.bf16.msra.mxu1 %v3740_v38  ;;  %2260 = vmatpush.bf16.msra.mxu0 %v3742_v59 }
0x15b4   :  { %2274 = vmatpush.bf16.msra.mxu1 %v3745_v20  ;;  %2261 = vmatpush.bf16.msra.mxu0 %v3749_v21 }
0x15b8   :  { %2275 = vmatpush.bf16.msra.mxu1 %v3753_v33  ;;  %2262 = vmatpush.bf16.msra.mxu0 %v3757_v37 }
0x15bc   :  { %2276 = vmatpush.bf16.msra.mxu1 %v3761_v22  ;;  %2263 = vmatpush.bf16.msra.mxu0 %v3765_v43 }
0x162c   :  { %v1905_v5 = vpop.f32.mrf.mxu0  ;;  %v1918_v47 = vpop.f32.mrf.mxu1 }
0x162d   :  { %v1922_v38 = vadd.f32 %v1905_v5, %v1891_v55  ;;  %v1923_v59 = vadd.f32 %v1918_v47, %v1892_v48 }
0x162f   :  { %3004 = vtanh.f32 %v1923_v59  ;;  %v2755_v37 = vmul.f32 -1.442695, %v1922_v38  ;;  %v2756_v31 = vmul.f32 -1.442695, %v1923_v59 }
0x1631   :  { %3006 = vpow2.f32 %v2755_v37 }
0x1634   :  { %v1907_v20 = vpop.f32.mrf.mxu0  ;;  %v1920_v21 = vpop.f32.mrf.mxu1 }
0x1635   :  { %v3005_v33 = vpop.eup %3004  ;;  %v4024_v20 = vsel %vm3227_vm13, %v3565_v42, %v3570_v15 }
0x1636   :  { %1965 = vrot.lane.b32.xlu2 %v3005_v33, %s3099_s0  ;;  %v4025_v33 = vsel %vm3204_vm12, %v3568_v61, %v3572_v63 }
0x1637   :  { %v3007_v22 = vpop.eup %3006 }
0x1638   :  { %v1930_v43 = vadd.f32 1.0, %v3007_v22 }
0x163a   :  { %3008 = vrcp.f32 %v1930_v43  ;;  %v1943_v14 = vand.u32 2147483648, %v1930_v43  ;;  %vm1937_vm10 = vweird.f32 %v1930_v43  ;;  %v1941_v48 = vand.u32 2147483647, %v1930_v43 }
0x163c   :  { %v1944_v17 = vor.u32 1.1754944e-38, %v1943_v14  ;;  %vm1942_vm14 = vcmp.eq.f32.partialorder %v1941_v48, 8.507059e+37 }
0x1640   :  { %v3009_v50 = vpop.eup %3008 }
0x1641   :  { %v1933_v1 = vmul.f32 %v3009_v50, %v1930_v43  ;;  %vm1938_vm9 = vweird.f32 %v3009_v50 }
0x1642   :  { %vm1939_vm11 = vmor %vm1937_vm10, %vm1938_vm9 }
0x1643   :  { %v1934_v55 = vsub.f32 1.0, %v1933_v1 }
0x1645   :  { %v1935_v7 = vmul.f32 %v3009_v50, %v1934_v55 }
0x1647   :  { %v1936_v29 = vadd.f32 %v3009_v50, %v1935_v7 }
0x1649   :  { %v1940_v52 = vsel %vm1939_vm11, %v3009_v50, %v1936_v29 }
0x164a   :  { %v1945_v25 = vsel %vm1942_vm14, %v1944_v17, %v1940_v52 }
0x164b   :  { %v1963_v54 = vmul.f32 %v1945_v25, %v3890_v44 }
0x1690   :  { %v1966_v11 = vpop.permute.xlu2 %1965 }
0x1691   :  { %v1968_v23 = vmul.f32 %v1966_v11, %v1945_v25 }
0x1693   :  { %1970 = vrot.lane.b32.xlu0 %v1968_v23, %s3099_s0 }
0x1705   :  { %v1971_v28 = vpop.permute.xlu0 %1970 }
0x1706   :  { %v1973_v36 = vadd.f32 %v1971_v28, %v1963_v54 }
0x1708   :  { %3010 = vtanh.f32 %v1973_v36 }
0x1709   :  { %3012 = vpow2.f32 %v2756_v31 }
0x170e   :  { %v3011_v58 = vpop.eup %3010 }
0x170f   :  { %1976 = vrot.lane.b32.xlu1 %v3011_v58, %s3099_s0  ;;  %v3013_v39 = vpop.eup %3012 }
0x1710   :  { %v1931_v0 = vadd.f32 1.0, %v3013_v39 }
0x1712   :  { %3014 = vrcp.f32 %v1931_v0  ;;  %v1958_v3 = vand.u32 2147483648, %v1931_v0  ;;  %vm1952_vm0 = vweird.f32 %v1931_v0  ;;  %v1956_v44 = vand.u32 2147483647, %v1931_v0 }
0x1714   :  { %v1959_v4 = vor.u32 1.1754944e-38, %v1958_v3  ;;  %vm1957_vm2 = vcmp.eq.f32.partialorder %v1956_v44, 8.507059e+37 }
0x1718   :  { %v3015_v41 = vpop.eup %3014 }
0x1719   :  { %v1948_v18 = vmul.f32 %v3015_v41, %v1931_v0  ;;  %vm1953_vm15 = vweird.f32 %v3015_v41 }
0x171a   :  { %vm1954_vm1 = vmor %vm1952_vm0, %vm1953_vm15 }
0x171b   :  { %v1949_v24 = vsub.f32 1.0, %v1948_v18 }
0x171d   :  { %v1950_v51 = vmul.f32 %v3015_v41, %v1949_v24 }
0x171f   :  { %v1951_v60 = vadd.f32 %v3015_v41, %v1950_v51 }
0x1721   :  { %v1955_v9 = vsel %vm1954_vm1, %v3015_v41, %v1951_v60 }
0x1722   :  { %v1960_v8 = vsel %vm1957_vm2, %v1959_v4, %v1955_v9 }
0x1781   :  { %v1977_v26 = vpop.permute.xlu1 %1976 }
0x1782   :  { %v1979_v5 = vmul.f32 %v1977_v26, %v1960_v8 }
0x1784   :  { %v1980_v47 = vpack.c.bf16 %v1979_v5, %v1979_v5 }
0x1786   :  { %2757 = vmatmul.msk.bf16.vlgmr.msra.gmra.mxu2 %vm348_vm6, %v1980_v47  ;;  %2758 = vmatmul.msk.bf16.vlgmr.msra.gmra.mxu3 %vm348_vm6, %v1980_v47 }
0x1809   :  { %v1995_v38 = vpop.f32.mrf.mxu2  ;;  %v2008_v59 = vpop.f32.mrf.mxu3 }
0x180a   :  { %v2012_v21 = vadd.f32 %v1995_v38, %v4024_v20  ;;  %v2013_v37 = vadd.f32 %v2008_v59, %v4025_v33 }
0x180c   :  { %3016 = vtanh.f32 %v2013_v37  ;;  %v2759_v1 = vmul.f32 -1.442695, %v2012_v21  ;;  %v2760_v39 = vmul.f32 -1.442695, %v2013_v37 }
0x180e   :  { %3018 = vpow2.f32 %v2759_v1 }
0x1811   :  { %v1997_v22 = vpop.f32.mrf.mxu2  ;;  %v2010_v43 = vpop.f32.mrf.mxu3 }
0x1812   :  { %v3017_v50 = vpop.eup %3016 }
0x1813   :  { %2055 = vrot.lane.b32.xlu2 %v3017_v50, %s3099_s0 }
0x1814   :  { %v3019_v55 = vpop.eup %3018 }
0x1815   :  { %v2020_v7 = vadd.f32 1.0, %v3019_v55 }
0x1817   :  { %3020 = vrcp.f32 %v2020_v7  ;;  %v2033_v52 = vand.u32 2147483648, %v2020_v7  ;;  %vm2027_vm4 = vweird.f32 %v2020_v7  ;;  %v2031_v61 = vand.u32 2147483647, %v2020_v7 }
0x1819   :  { %v2034_v17 = vor.u32 1.1754944e-38, %v2033_v52  ;;  %vm2032_vm7 = vcmp.eq.f32.partialorder %v2031_v61, 8.507059e+37 }
0x181d   :  { %v3021_v29 = vpop.eup %3020 }
0x181e   :  { %v2023_v42 = vmul.f32 %v3021_v29, %v2020_v7  ;;  %vm2028_vm3 = vweird.f32 %v3021_v29 }
0x181f   :  { %vm2029_vm5 = vmor %vm2027_vm4, %vm2028_vm3 }
0x1820   :  { %v2024_v15 = vsub.f32 1.0, %v2023_v42 }
0x1822   :  { %v2025_v14 = vmul.f32 %v3021_v29, %v2024_v15 }
0x1824   :  { %v2026_v48 = vadd.f32 %v3021_v29, %v2025_v14 }
0x1826   :  { %v2030_v63 = vsel %vm2029_vm5, %v3021_v29, %v2026_v48 }
0x1827   :  { %v2035_v25 = vsel %vm2032_vm7, %v2034_v17, %v2030_v63 }
0x1828   :  { %v2053_v54 = vmul.f32 %v2035_v25, %v1973_v36 }
0x186d   :  { %v2056_v11 = vpop.permute.xlu2 %2055 }
0x186e   :  { %v2058_v23 = vmul.f32 %v2056_v11, %v2035_v25 }
0x1870   :  { %2060 = vrot.lane.b32.xlu0 %v2058_v23, %s3099_s0 }
0x18e2   :  { %v2061_v28 = vpop.permute.xlu0 %2060 }
0x18e3   :  { %v2063_v58 = vadd.f32 %v2061_v28, %v2053_v54 }
0x18e5   :  { %3022 = vtanh.f32 %v2063_v58 }
0x18e6   :  { %3024 = vpow2.f32 %v2760_v39 }
0x18eb   :  { %v3023_v31 = vpop.eup %3022 }
0x18ec   :  { %2066 = vrot.lane.b32.xlu1 %v3023_v31, %s3099_s0  ;;  %v3025_v0 = vpop.eup %3024 }
0x18ed   :  { %v2021_v41 = vadd.f32 1.0, %v3025_v0 }
0x18ef   :  { %3026 = vrcp.f32 %v2021_v41  ;;  %v2048_v44 = vand.u32 2147483648, %v2021_v41  ;;  %vm2042_vm9 = vweird.f32 %v2021_v41  ;;  %v2046_v36 = vand.u32 2147483647, %v2021_v41 }
0x18f1   :  { %v2049_v4 = vor.u32 1.1754944e-38, %v2048_v44  ;;  %vm2047_vm11 = vcmp.eq.f32.partialorder %v2046_v36, 8.507059e+37 }
0x18f5   :  { %v3027_v18 = vpop.eup %3026 }
0x18f6   :  { %v2038_v24 = vmul.f32 %v3027_v18, %v2021_v41  ;;  %vm2043_vm8 = vweird.f32 %v3027_v18 }
0x18f7   :  { %vm2044_vm10 = vmor %vm2042_vm9, %vm2043_vm8 }
0x18f8   :  { %v2039_v51 = vsub.f32 1.0, %v2038_v24 }
0x18fa   :  { %v2040_v60 = vmul.f32 %v3027_v18, %v2039_v51 }
0x18fc   :  { %v2041_v3 = vadd.f32 %v3027_v18, %v2040_v60 }
0x18fe   :  { %v2045_v9 = vsel %vm2044_vm10, %v3027_v18, %v2041_v3 }
0x18ff   :  { %v2050_v8 = vsel %vm2047_vm11, %v2049_v4, %v2045_v9 }
0x195e   :  { %v2067_v26 = vpop.permute.xlu1 %2066 }
0x195f   :  { %v2069_v5 = vmul.f32 %v2067_v26, %v2050_v8 }
0x1961   :  { %v2070_v47 = vpack.c.bf16 %v2069_v5, %v2069_v5 }
0x1963   :  { %2761 = vmatmul.msk.bf16.vlgmr.msrb.gmra.mxu0 %vm348_vm6, %v2070_v47  ;;  %2762 = vmatmul.msk.bf16.vlgmr.msrb.gmra.mxu1 %vm348_vm6, %v2070_v47 }
0x19e0   :  { %v2085_v38 = vpop.f32.mrf.mxu0  ;;  %v2098_v59 = vpop.f32.mrf.mxu1 }
0x19e1   :  { %v2102_v20 = vadd.f32 %v2085_v38, %v2071_v12  ;;  %v2103_v21 = vadd.f32 %v2098_v59, %v2072_v35 }
0x19e3   :  { %3028 = vtanh.f32 %v2103_v21  ;;  %v2763_v43 = vmul.f32 -1.442695, %v2102_v20  ;;  %v2764_v17 = vmul.f32 -1.442695, %v2103_v21 }
0x19e5   :  { %3030 = vpow2.f32 %v2763_v43 }
0x19e8   :  { %v2087_v33 = vpop.f32.mrf.mxu0  ;;  %v2100_v37 = vpop.f32.mrf.mxu1 }
0x19e9   :  { %v3029_v22 = vpop.eup %3028 }
0x19ea   :  { %2145 = vrot.lane.b32.xlu2 %v3029_v22, %s3099_s0 }
0x19eb   :  { %v3031_v50 = vpop.eup %3030 }
0x19ec   :  { %v2110_v1 = vadd.f32 1.0, %v3031_v50 }
0x19ee   :  { %3032 = vrcp.f32 %v2110_v1  ;;  %v2123_v29 = vand.u32 2147483648, %v2110_v1  ;;  %vm2117_vm15 = vweird.f32 %v2110_v1  ;;  %v2121_v19 = vand.u32 2147483647, %v2110_v1 }
0x19f0   :  { %v2124_v35 = vor.u32 1.1754944e-38, %v2123_v29  ;;  %vm2122_vm1 = vcmp.eq.f32.partialorder %v2121_v19, 8.507059e+37 }
0x19f4   :  { %v3033_v55 = vpop.eup %3032 }
0x19f5   :  { %v2113_v16 = vmul.f32 %v3033_v55, %v2110_v1  ;;  %vm2118_vm14 = vweird.f32 %v3033_v55 }
0x19f6   :  { %vm2119_vm0 = vmor %vm2117_vm15, %vm2118_vm14 }
0x19f7   :  { %v2114_v32 = vsub.f32 1.0, %v2113_v16 }
0x19f9   :  { %v2115_v12 = vmul.f32 %v3033_v55, %v2114_v32 }
0x19fb   :  { %v2116_v7 = vadd.f32 %v3033_v55, %v2115_v12 }
0x19fd   :  { %v2120_v34 = vsel %vm2119_vm0, %v3033_v55, %v2116_v7 }
0x19fe   :  { %v2125_v15 = vsel %vm2122_vm1, %v2124_v35, %v2120_v34 }
0x19ff   :  { %v2143_v48 = vmul.f32 %v2125_v15, %v2063_v58 }
0x1a44   :  { %v2146_v42 = vpop.permute.xlu2 %2145 }
0x1a45   :  { %v2148_v14 = vmul.f32 %v2146_v42, %v2125_v15 }
0x1a47   :  { %2150 = vrot.lane.b32.xlu0 %v2148_v14, %s3099_s0 }
0x1ab9   :  { %v2151_v52 = vpop.permute.xlu0 %2150 }
0x1aba   :  { %v2153_v61 = vadd.f32 %v2151_v52, %v2143_v48 }
0x1abc   :  { %3034 = vtanh.f32 %v2153_v61 }
0x1abd   :  { %3036 = vpow2.f32 %v2764_v17 }
0x1ac2   :  { %v3035_v63 = vpop.eup %3034 }
0x1ac3   :  { %2156 = vrot.lane.b32.xlu1 %v3035_v63, %s3099_s0  ;;  %v3037_v11 = vpop.eup %3036 }
0x1ac4   :  { %v2111_v25 = vadd.f32 1.0, %v3037_v11 }
0x1ac6   :  { %3038 = vrcp.f32 %v2111_v25  ;;  %v2138_v0 = vand.u32 2147483648, %v2111_v25  ;;  %vm2132_vm3 = vweird.f32 %v2111_v25  ;;  %v2136_v58 = vand.u32 2147483647, %v2111_v25 }
0x1ac8   :  { %v2139_v18 = vor.u32 1.1754944e-38, %v2138_v0  ;;  %vm2137_vm5 = vcmp.eq.f32.partialorder %v2136_v58, 8.507059e+37 }
0x1acc   :  { %v3039_v23 = vpop.eup %3038 }
0x1acd   :  { %v2128_v54 = vmul.f32 %v3039_v23, %v2111_v25  ;;  %vm2133_vm2 = vweird.f32 %v3039_v23 }
0x1ace   :  { %vm2134_vm4 = vmor %vm2132_vm3, %vm2133_vm2 }
0x1acf   :  { %v2129_v28 = vsub.f32 1.0, %v2128_v54 }
0x1ad1   :  { %v2130_v31 = vmul.f32 %v3039_v23, %v2129_v28 }
0x1ad3   :  { %v2131_v39 = vadd.f32 %v3039_v23, %v2130_v31 }
0x1ad5   :  { %v2135_v41 = vsel %vm2134_vm4, %v3039_v23, %v2131_v39 }
0x1ad6   :  { %v2140_v24 = vsel %vm2137_vm5, %v2139_v18, %v2135_v41 }
0x1b35   :  { %v2157_v51 = vpop.permute.xlu1 %2156 }
0x1b36   :  { %v2159_v60 = vmul.f32 %v2157_v51, %v2140_v24 }
0x1b38   :  { %v2160_v3 = vpack.c.bf16 %v2159_v60, %v2159_v60 }
0x1b3a   :  { %2765 = vmatmul.msk.bf16.vlgmr.msrb.gmra.mxu2 %vm348_vm6, %v2160_v3  ;;  %2766 = vmatmul.msk.bf16.vlgmr.msrb.gmra.mxu3 %vm348_vm6, %v2160_v3 }
0x1bbd   :  { %v2175_v44 = vpop.f32.mrf.mxu2  ;;  %v2188_v36 = vpop.f32.mrf.mxu3 }
0x1bbe   :  { %v2192_v9 = vadd.f32 %v2175_v44, %v2161_v27  ;;  %v2193_v4 = vadd.f32 %v2188_v36, %v2162_v30  ;;  %v2787_v44 = vld [vmem:[#allocation2 + $0x1b0] sm:$0xf]  ;;  %v2858_v36 = vld [vmem:[#allocation2 + $0x1b4] sm:$0xf0] }
0x1bc0   :  { %3040 = vtanh.f32 %v2193_v4  ;;  %v2767_v47 = vmul.f32 -1.442695, %v2192_v9  ;;  %v2768_v32 = vmul.f32 -1.442695, %v2193_v4  ;;  %v2783_v9 = vld [vmem:[#allocation2 + $0x1a0] sm:$0xf]  ;;  %v2788_v4 = vor.u32 %v2858_v36, %v2787_v44 }
0x1bc2   :  { %3042 = vpow2.f32 %v2767_v47  ;;  %2385 = vmatpush.bf16.msra.mxu2 %v2788_v4  ;;  %v2856_v47 = vld [vmem:[#allocation2 + $0x194] sm:$0xf0] }
0x1bc5   :  { %v2177_v8 = vpop.f32.mrf.mxu2  ;;  %v2190_v26 = vpop.f32.mrf.mxu3 }
0x1bc6   :  { %v3041_v5 = vpop.eup %3040  ;;  %v2857_v8 = vld [vmem:[#allocation2 + $0x1a4] sm:$0xf0] }
0x1bc7   :  { %2235 = vrot.lane.b32.xlu2 %v3041_v5, %s3099_s0  ;;  %v2784_v26 = vor.u32 %v2857_v8, %v2783_v9  ;;  %v2779_v5 = vld [vmem:[#allocation2 + $0x190] sm:$0xf] }
0x1bc8   :  { %v3043_v38 = vpop.eup %3042 }
0x1bc9   :  { %v2200_v59 = vadd.f32 1.0, %v3043_v38  ;;  %2386 = vmatpush.bf16.msra.mxu2 %v2784_v26  ;;  %v2780_v38 = vor.u32 %v2856_v47, %v2779_v5 }
0x1bcb   :  { %3044 = vrcp.f32 %v2200_v59  ;;  %v2213_v33 = vand.u32 2147483648, %v2200_v59  ;;  %vm2207_vm8 = vweird.f32 %v2200_v59  ;;  %v2211_v6 = vand.u32 2147483647, %v2200_v59 }
0x1bcd   :  { %v2214_v30 = vor.u32 1.1754944e-38, %v2213_v33  ;;  %vm2212_vm10 = vcmp.eq.f32.partialorder %v2211_v6, 8.507059e+37  ;;  %2387 = vmatpush.bf16.msra.mxu2 %v2780_v38  ;;  %v2775_v6 = vld [vmem:[#allocation2 + $0x180] sm:$0xf] }
0x1bd1   :  { %v3045_v20 = vpop.eup %3044 }
0x1bd2   :  { %v2203_v62 = vmul.f32 %v3045_v20, %v2200_v59  ;;  %vm2208_vm7 = vweird.f32 %v3045_v20 }
0x1bd3   :  { %vm2209_vm9 = vmor %vm2207_vm8, %vm2208_vm7  ;;  %vm2445_vm8 = vcmask 15360  }
0x1bd4   :  { %v2204_v40 = vsub.f32 1.0, %v2203_v62 }
0x1bd6   :  { %v2205_v27 = vmul.f32 %v3045_v20, %v2204_v40 }
0x1bd8   :  { %v2206_v21 = vadd.f32 %v3045_v20, %v2205_v27 }
0x1bda   :  { %v2210_v53 = vsel %vm2209_vm9, %v3045_v20, %v2206_v21 }
0x1bdb   :  { %v2215_v22 = vsel %vm2212_vm10, %v2214_v30, %v2210_v53  ;;  %v2855_v53 = vld [vmem:[#allocation2 + $0x184] sm:$0xf0] }
0x1bdc   :  { %v2233_v50 = vmul.f32 %v2215_v22, %v2153_v61  ;;  %v2776_v30 = vor.u32 %v2855_v53, %v2775_v6 }
0x1bde   :  { %2388 = vmatpush.bf16.msra.mxu2 %v2776_v30 }
0x1c21   :  { %v2236_v37 = vpop.permute.xlu2 %2235 }
0x1c22   :  { %v2238_v43 = vmul.f32 %v2236_v37, %v2215_v22  ;;  %v2804_v37 = vld [vmem:[#allocation2 + $0x1f0] sm:$0xf]  ;;  %v2862_v22 = vld [vmem:[#allocation2 + $0x1f4] sm:$0xf0] }
0x1c24   :  { %2240 = vrot.lane.b32.xlu0 %v2238_v43, %s3099_s0  ;;  %v2800_v43 = vld [vmem:[#allocation2 + $0x1e0] sm:$0xf] }
0x1c96   :  { %v2241_v1 = vpop.permute.xlu0 %2240 }
0x1c97   :  { %v3962_v55 = vadd.f32 %v2241_v1, %v2233_v50  ;;  %v2805_v50 = vor.u32 %v2862_v22, %v2804_v37  ;;  %v2861_v1 = vld [vmem:[#allocation2 + $0x1e4] sm:$0xf0] }
0x1c99   :  { %3046 = vtanh.f32 %v3962_v55  ;;  %2436 = vmatpush.bf16.msra.mxu3 %v2805_v50 }
0x1c9a   :  { %3048 = vpow2.f32 %v2768_v32  ;;  %v2860_v32 = vld [vmem:[#allocation2 + $0x1d4] sm:$0xf0] }
0x1c9f   :  { %v3047_v16 = vpop.eup %3046 }
0x1ca0   :  { %2246 = vrot.lane.b32.xlu1 %v3047_v16, %s3099_s0  ;;  %v3049_v12 = vpop.eup %3048  ;;  %v2796_v16 = vld [vmem:[#allocation2 + $0x1d0] sm:$0xf] }
0x1ca1   :  { %v2201_v7 = vadd.f32 1.0, %v3049_v12 }
0x1ca3   :  { %3050 = vrcp.f32 %v2201_v7  ;;  %v2228_v15 = vand.u32 2147483648, %v2201_v7  ;;  %vm2222_vm14 = vweird.f32 %v2201_v7  ;;  %v2226_v14 = vand.u32 2147483647, %v2201_v7 }
0x1ca5   :  { %v2229_v52 = vor.u32 1.1754944e-38, %v2228_v15  ;;  %vm2227_vm0 = vcmp.eq.f32.partialorder %v2226_v14, 8.507059e+37 }
0x1ca9   :  { %v3051_v29 = vpop.eup %3050 }
0x1caa   :  { %v2218_v19 = vmul.f32 %v3051_v29, %v2201_v7  ;;  %vm2223_vm11 = vweird.f32 %v3051_v29  ;;  %v2797_v7 = vor.u32 %v2860_v32, %v2796_v16 }
0x1cab   :  { %vm2224_vm15 = vmor %vm2222_vm14, %vm2223_vm11 }
0x1cac   :  { %v2219_v34 = vsub.f32 1.0, %v2218_v19 }
0x1cae   :  { %v2220_v35 = vmul.f32 %v3051_v29, %v2219_v34 }
0x1cb0   :  { %v2221_v42 = vadd.f32 %v3051_v29, %v2220_v35 }
0x1cb2   :  { %v2225_v48 = vsel %vm2224_vm15, %v3051_v29, %v2221_v42 }
0x1cb3   :  { %v2230_v61 = vsel %vm2227_vm0, %v2229_v52, %v2225_v48 }
0x1d12   :  { %v2247_v63 = vpop.permute.xlu1 %2246 }
0x1d13   :  { %v2249_v17 = vmul.f32 %v2247_v63, %v2230_v61 }
0x1d15   :  { %v2250_v11 = vpack.c.bf16 %v2249_v17, %v2249_v17 }
0x1d17   :  { %2769 = vmatmul.msk.bf16.vlgmr.msra.gmra.mxu0 %vm348_vm6, %v2250_v11  ;;  %2770 = vmatmul.msk.bf16.vlgmr.msra.gmra.mxu1 %vm348_vm6, %v2250_v11  ;;  %v2792_v11 = vld [vmem:[#allocation2 + $0x1c0] sm:$0xf] }
0x1d94   :  { %v2265_v25 = vpop.f32.mrf.mxu0  ;;  %v2278_v23 = vpop.f32.mrf.mxu1 }
0x1d95   :  { %v2282_v54 = vadd.f32 %v2265_v25, %v2251_v45  ;;  %v2283_v28 = vadd.f32 %v2278_v23, %v2252_v49  ;;  %v2859_v25 = vld [vmem:[#allocation2 + $0x1c4] sm:$0xf0] }
0x1d96   :  { %v2793_v23 = vor.u32 %v2859_v25, %v2792_v11 }
0x1d97   :  { %3052 = vtanh.f32 %v2283_v28  ;;  %v2771_v58 = vmul.f32 -1.442695, %v2282_v54  ;;  %v2772_v27 = vmul.f32 -1.442695, %v2283_v28  ;;  %v2341_v54 = vld [vmem:[#allocation2 + $0x210] sm:$0x1] }
0x1d98   :  { %v2342_v28 = vunpack.c.l.bf16 %v2341_v54 }
0x1d99   :  { %3054 = vpow2.f32 %v2771_v58 }
0x1d9c   :  { %v2267_v31 = vpop.f32.mrf.mxu0  ;;  %v2280_v39 = vpop.f32.mrf.mxu1 }
0x1d9d   :  { %v3053_v0 = vpop.eup %3052  ;;  %v2353_v31 = vperm.slane %v2342_v28, 0 }
0x1d9e   :  { %2325 = vrot.lane.b32.xlu2 %v3053_v0, %s3099_s0 }
0x1d9f   :  { %v3055_v41 = vpop.eup %3054 }
0x1da0   :  { %v2290_v56 = vadd.f32 1.0, %v3055_v41 }
0x1da2   :  { %3056 = vrcp.f32 %v2290_v56  ;;  %v2303_v24 = vand.u32 2147483648, %v2290_v56  ;;  %vm2297_vm12 = vweird.f32 %v2290_v56  ;;  %v2301_v57 = vand.u32 2147483647, %v2290_v56 }
0x1da4   :  { %v2304_v49 = vor.u32 1.1754944e-38, %v2303_v24  ;;  %vm2302_vm2 = vcmp.eq.f32.partialorder %v2301_v57, 8.507059e+37 }
0x1da8   :  { %v3057_v18 = vpop.eup %3056 }
0x1da9   :  { %v2293_v13 = vmul.f32 %v3057_v18, %v2290_v56  ;;  %vm2298_vm13 = vweird.f32 %v3057_v18 }
0x1daa   :  { %vm2299_vm1 = vmor %vm2297_vm12, %vm2298_vm13 }
0x1dab   :  { %v2294_v10 = vsub.f32 1.0, %v2293_v13 }
0x1dad   :  { %v2295_v45 = vmul.f32 %v3057_v18, %v2294_v10 }
0x1daf   :  { %v2296_v46 = vadd.f32 %v3057_v18, %v2295_v45 }
0x1db1   :  { %v2300_v2 = vsel %vm2299_vm1, %v3057_v18, %v2296_v46  ;;  %v2343_v18 = vld [vmem:[#allocation2 + $0x220] sm:$0x1] }
0x1db2   :  { %v2305_v60 = vsel %vm2302_vm2, %v2304_v49, %v2300_v2  ;;  %v2344_v13 = vunpack.c.l.bf16 %v2343_v18 }
0x1db3   :  { %v2323_v59 = vmul.f32 %v2305_v60, %v3962_v55  ;;  %v2801_v55 = vor.u32 %v2861_v1, %v2800_v43 }
0x1db4   :  { %v2404_v10 = vperm.slane %v2344_v13, 0 }
0x1db5   :  { %2437 = vmatpush.bf16.msra.mxu3 %v2801_v55 }
0x1db9   :  { %2438 = vmatpush.bf16.msra.mxu3 %v2797_v7 }
0x1dbd   :  { %2439 = vmatpush.bf16.msra.mxu3 %v2793_v23 }
0x1df8   :  { %v2326_v51 = vpop.permute.xlu2 %2325 }
0x1df9   :  { %v2328_v3 = vmul.f32 %v2326_v51, %v2305_v60 }
0x1dfb   :  { %2330 = vrot.lane.b32.xlu0 %v2328_v3, %s3099_s0 }
0x1e6d   :  { %v2331_v20 = vpop.permute.xlu0 %2330 }
0x1e6e   :  { %v2333_v62 = vadd.f32 %v2331_v20, %v2323_v59 }
0x1e70   :  { %3058 = vtanh.f32 %v2333_v62 }
0x1e71   :  { %3060 = vpow2.f32 %v2772_v27 }
0x1e76   :  { %v3059_v40 = vpop.eup %3058 }
0x1e77   :  { %2336 = vrot.lane.b32.xlu1 %v3059_v40, %s3099_s0  ;;  %v3061_v21 = vpop.eup %3060 }
0x1e78   :  { %v2291_v33 = vadd.f32 1.0, %v3061_v21 }
0x1e7a   :  { %3062 = vrcp.f32 %v2291_v33  ;;  %v2318_v42 = vand.u32 2147483648, %v2291_v33  ;;  %vm2312_vm4 = vweird.f32 %v2291_v33  ;;  %v2316_v15 = vand.u32 2147483647, %v2291_v33 }
0x1e7c   :  { %v2319_v48 = vor.u32 1.1754944e-38, %v2318_v42  ;;  %vm2317_vm7 = vcmp.eq.f32.partialorder %v2316_v15, 8.507059e+37 }
0x1e80   :  { %v3063_v12 = vpop.eup %3062 }
0x1e81   :  { %v2308_v29 = vmul.f32 %v3063_v12, %v2291_v33  ;;  %vm2313_vm3 = vweird.f32 %v3063_v12 }
0x1e82   :  { %vm2314_vm5 = vmor %vm2312_vm4, %vm2313_vm3 }
0x1e83   :  { %v2309_v19 = vsub.f32 1.0, %v2308_v29 }
0x1e85   :  { %v2310_v34 = vmul.f32 %v3063_v12, %v2309_v19 }
0x1e87   :  { %v2311_v35 = vadd.f32 %v3063_v12, %v2310_v34 }
0x1e89   :  { %v2315_v14 = vsel %vm2314_vm5, %v3063_v12, %v2311_v35 }
0x1e8a   :  { %v2320_v52 = vsel %vm2317_vm7, %v2319_v48, %v2315_v14 }
0x1ee9   :  { %v2337_v61 = vpop.permute.xlu1 %2336 }
0x1eea   :  { %v2339_v63 = vmul.f32 %v2337_v61, %v2320_v52 }
0x1eec   :  { %v2340_v17 = vpack.c.bf16 %v2339_v63, %v2339_v63 }
0x1eee   :  { %2789 = vmatmul.msk.bf16.vlgmr.msra.gmra.mxu2 %vm348_vm6, %v2340_v17 }
0x1f71   :  { %v2390_v39 = vpop.f32.mrf.mxu2 }
0x1f72   :  { %v2391_v0 = vadd.f32 %v2390_v39, %v2353_v31 }
0x1f74   :  { %v2394_v58 = vmax.f32 %v2391_v0, 0.0 }
0x1f76   :  { %v2395_v41 = vpack.c.bf16 %v2394_v58, %v2394_v58 }
0x1f78   :  { %2806 = vmatmul.msk.bf16.vlgmr.msra.gmra.mxu3 %vm348_vm6, %v2395_v41 }
0x1f79   :  { %v2392_v56 = vpop.f32.mrf.mxu2 }
0x1ffb   :  { %v2441_v45 = vpop.f32.mrf.mxu3 }
0x1ffc   :  { %v2442_v46 = vadd.f32 %v2441_v45, %v2404_v10 }
0x1ffe   :  { %v2446_v24 = vsel %vm2445_vm8, %v2442_v46, -inf }
0x1fff   :  { %2447 = vmax.xlane.f32.xlu2 %v2446_v24 }
0x2003   :  { %v2443_v57 = vpop.f32.mrf.mxu3 }
0x2072   :  { %v2448_v2 = vpop.xlane.xlu2 %2447 }
0x2073   :  { %v2449_v49 = vsub.f32 %v2442_v46, %v2448_v2 }
0x2075   :  { %v2450_v51 = vmul.f32 1.442695, %v2449_v49 }
0x2077   :  { %3064 = vpow2.f32 %v2450_v51 }
0x207d   :  { %v3065_v60 = vpop.eup %3064 }
0x207e   :  { %v2452_v3 = vsel %vm2445_vm8, %v3065_v60, 0.0 }
0x207f   :  { %2453 = vadd.xlane.f32.xlu0 %v2452_v3 }
0x20f2   :  { %v2454_v44 = vpop.xlane.xlu0 %2453 }
0x20f3   :  { %3066 = vlog2.f32 %v2454_v44 }
0x20f9   :  { %v3067_v36 = vpop.eup %3066 }
0x20fa   :  { %v2456_v9 = vmul.f32 0.6931472, %v3067_v36 }
0x20fc   :  { %v2457_v4 = vadd.f32 %v2456_v9, %v2448_v2 }
0x20fe   :  { %v2458_v8 = vsub.f32 %v2442_v46, %v2457_v4 }
0x2100   :  { %2459 = vst.msk [vmem:[%s3992_s2] sm:$0xff] %vm2445_vm8, %v2458_v8 }
0x2101   :  { %2464 = vsyncpa [#allocation3], 1 }

</bundles_post_ra>
